<compile_context>
chip_gen: v7x
topology: tpu7x:2x2x1
jax: 0.10.0
libtpu: 0.0.40
codegen_flags: <defaults>
</compile_context>

<pallas_src>
import functools

import jax
import jax.numpy as jnp
from jax.experimental import pallas as pl
from jax.experimental.pallas import tpu as pltpu


# ---------------------------------------------------------------------------
# In-kernel helpers (operate on traced values / full-array VMEM refs)
# ---------------------------------------------------------------------------

def _ln(x, g, b, eps=1e-5):
    x = x.astype(jnp.float32)
    mu = jnp.mean(x, axis=-1, keepdims=True)
    xc = x - mu
    var = jnp.mean(xc * xc, axis=-1, keepdims=True)
    return xc * jax.lax.rsqrt(var + eps) * g + b


def _bdot(x, w):
    # bf16 operands on the MXU, f32 accumulation.
    return jnp.dot(x.astype(jnp.bfloat16), w.astype(jnp.bfloat16),
                   preferred_element_type=jnp.float32)


def _attention(qkv, rel_bias_ref, dim, heads, head_dim, scale):
    """qkv: (L, 3*dim) f32 slab. Per-head static column slices; returns (L, dim)."""
    outs = []
    for h in range(heads):
        q = qkv[:, h * head_dim:(h + 1) * head_dim] * scale
        k = qkv[:, dim + h * head_dim: dim + (h + 1) * head_dim]
        v = qkv[:, 2 * dim + h * head_dim: 2 * dim + (h + 1) * head_dim]
        # q @ k^T via dot_general (contract last dims of both), bf16 on the MXU.
        s = jax.lax.dot_general(
            q.astype(jnp.bfloat16), k.astype(jnp.bfloat16),
            (((1,), (1,)), ((), ())), preferred_element_type=jnp.float32)
        s = s + rel_bias_ref[h]
        s = s - jnp.max(s, axis=-1, keepdims=True)
        e = jnp.exp(s)
        p = e * pl.reciprocal(jnp.sum(e, axis=-1, keepdims=True), approx=True)
        outs.append(jnp.dot(p.astype(jnp.bfloat16), v.astype(jnp.bfloat16),
                            preferred_element_type=jnp.float32))
    return jnp.concatenate(outs, axis=-1)


# ---------------------------------------------------------------------------
# Fused kernel: one full sample per grid step
# ---------------------------------------------------------------------------

def _fused_kernel(x_ref, *refs, treedef, cfg):
    w_refs, o_ref = refs[:-1], refs[-1]
    p = jax.tree_util.tree_unflatten(treedef, list(w_refs))

    # -- patch embed: unfolded 4x4 patches @ W + b (== Conv2d k=4,s=4), then LN --
    tok = _bdot(x_ref[0], p['patch_w'][...]) + p['patch_b'][...]
    tok = _ln(tok, p['patch_ln_g'][...], p['patch_ln_b'][...])

    for si, scfg in enumerate(cfg['stages']):
        res, dim, heads = scfg['res'], scfg['dim'], scfg['heads']
        hd = dim // heads
        scale = float(hd) ** -0.5
        sp = p['stages'][si]
        for blk in sp['blocks']:
            shortcut = tok
            y = _ln(tok, blk['ln1_g'][...], blk['ln1_b'][...])
            qkv = _bdot(y, blk['qkv_w'][...]) + blk['qkv_b'][...]          # (L, 3*dim)
            attn = _attention(qkv, blk['rel_bias'], dim, heads, hd, scale)  # (L, dim)
            attn = _bdot(attn, blk['proj_w'][...]) + blk['proj_b'][...]
            tok = shortcut + attn
            y = _ln(tok, blk['ln2_g'][...], blk['ln2_b'][...])
            h1 = _bdot(y, blk['mlp_w1'][...]) + blk['mlp_b1'][...]
            # TODO(synk): timm Mlp uses exact (erf) GELU; tanh approx for robust lowering.
            h1 = jax.nn.gelu(h1, approximate=True)
            tok = tok + _bdot(h1, blk['mlp_w2'][...]) + blk['mlp_b2'][...]

        if scfg['merge']:
            # Swin patch merging: gather the 2x2 neighbourhood rows and concat features
            # ([x0,x1,x2,x3] = [(ev,ev),(od,ev),(ev,od),(od,od)]) -- all static slices.
            rows = []
            for i in range(res // 2):
                for j in range(res // 2):
                    r0 = (2 * i) * res + 2 * j
                    r1 = (2 * i + 1) * res + 2 * j
                    r2 = (2 * i) * res + 2 * j + 1
                    r3 = (2 * i + 1) * res + 2 * j + 1
                    rows.append(jnp.concatenate(
                        [tok[r0:r0 + 1, :], tok[r1:r1 + 1, :],
                         tok[r2:r2 + 1, :], tok[r3:r3 + 1, :]], axis=-1))
            merged = jnp.concatenate(rows, axis=0)          # (L/4, 4*dim); 4*dim = 128 lane-dense
            merged = _ln(merged, sp['merge_ln_g'][...], sp['merge_ln_b'][...])
            tok = _bdot(merged, sp['merge_w'][...])         # Swin reduction Linear: bias=False

    # -- forward_features tail: final norm, mean over spatial tokens, fc --
    tok = _ln(tok, p['final_ln_g'][...], p['final_ln_b'][...])
    pooled = jnp.mean(tok, axis=0, keepdims=True)           # (1, num_features)
    out = _bdot(pooled, p['fc_w'][...]) + p['fc_b'][...]    # (1, out_dim) -- lane-dense store
    o_ref[0] = out.astype(o_ref.dtype)


# ---------------------------------------------------------------------------
# Deterministic synthetic parameters (scaled-down swin-tiny-like backbone + fc)
# ---------------------------------------------------------------------------

def init_params(key, *, in_chans=1, patch=4, embed_dim=32, depths=(2, 2),
                num_heads=(2, 4), mlp_ratio=4, img=16, out_dim=128):
    keys = iter(jax.random.split(key, 64))
    nrm = lambda shape, s=0.02: s * jax.random.normal(next(keys), shape, jnp.float32)
    bf = lambda shape: nrm(shape).astype(jnp.bfloat16)      # matmul weights stored bf16

    cfg = {'patch': patch, 'out_dim': out_dim, 'in_chans': in_chans, 'stages': []}
    p = {
        'patch_w': bf((in_chans * patch * patch, embed_dim)),
        'patch_b': jnp.zeros((1, embed_dim), jnp.float32),
        'patch_ln_g': jnp.ones((1, embed_dim), jnp.float32),
        'patch_ln_b': jnp.zeros((1, embed_dim), jnp.float32),
        'stages': [],
    }

    res, dim = img // patch, embed_dim
    for si, (depth, h) in enumerate(zip(depths, num_heads)):
        L = res * res
        blocks = []
        for _ in range(depth):
            blocks.append({
                'ln1_g': jnp.ones((1, dim), jnp.float32),
                'ln1_b': jnp.zeros((1, dim), jnp.float32),
                'qkv_w': bf((dim, 3 * dim)),
                'qkv_b': jnp.zeros((1, 3 * dim), jnp.float32),
                # TODO(synk): swin uses a relative-position-bias table over 7x7 shifted
                # windows; a dense learned (heads, L, L) bias over the full map is used.
                'rel_bias': nrm((h, L, L)),
                'proj_w': bf((dim, dim)),
                'proj_b': jnp.zeros((1, dim), jnp.float32),
                'ln2_g': jnp.ones((1, dim), jnp.float32),
                'ln2_b': jnp.zeros((1, dim), jnp.float32),
                'mlp_w1': bf((dim, mlp_ratio * dim)),
                'mlp_b1': jnp.zeros((1, mlp_ratio * dim), jnp.float32),
                'mlp_w2': bf((mlp_ratio * dim, dim)),
                'mlp_b2': jnp.zeros((1, dim), jnp.float32),
            })
        stage_p = {'blocks': blocks}
        merge = si < len(depths) - 1
        cfg['stages'].append({'res': res, 'dim': dim, 'heads': h, 'merge': merge})
        if merge:
            stage_p['merge_ln_g'] = jnp.ones((1, 4 * dim), jnp.float32)
            stage_p['merge_ln_b'] = jnp.zeros((1, 4 * dim), jnp.float32)
            stage_p['merge_w'] = bf((4 * dim, 2 * dim))       # bias=False in Swin
            res, dim = res // 2, dim * 2
        p['stages'].append(stage_p)

    cfg['num_features'] = dim
    p['final_ln_g'] = jnp.ones((1, dim), jnp.float32)
    p['final_ln_b'] = jnp.zeros((1, dim), jnp.float32)
    p['fc_w'] = bf((dim, out_dim))
    p['fc_b'] = jnp.zeros((1, out_dim), jnp.float32)
    return cfg, p


# ---------------------------------------------------------------------------
# Forward pass: single fused pallas_call, grid = (batch,), parallel
# ---------------------------------------------------------------------------

def depth_encoder_forward(x, cfg, params):
    B, Cin, H, W = x.shape               # NCHW, matches PyTorch input convention
    P = cfg['patch']
    T0 = (H // P) * (W // P)

    # Conv2d(kernel=P, stride=P) expressed as a one-time patch unfold (glue) +
    # in-kernel matmul with patch_w.
    patches = x.reshape(B, Cin, H // P, P, W // P, P)
    patches = patches.transpose(0, 2, 4, 1, 3, 5).reshape(B, T0, Cin * P * P)

    flat, treedef = jax.tree_util.tree_flatten(params)
    kernel = functools.partial(_fused_kernel, treedef=treedef, cfg=cfg)

    def _const_spec(shape):              # full-array, resident across grid steps
        n = len(shape)
        return pl.BlockSpec(tuple(shape), lambda b, _n=n: (0,) * _n)

    out = pl.pallas_call(
        kernel,
        grid=(B,),
        out_shape=jax.ShapeDtypeStruct((B, 1, cfg['out_dim']), jnp.float32),
        in_specs=[pl.BlockSpec((1, T0, Cin * P * P), lambda b: (b, 0, 0))]
                 + [_const_spec(w.shape) for w in flat],
        out_specs=pl.BlockSpec((1, 1, cfg['out_dim']), lambda b: (b, 0, 0)),
        compiler_params=pltpu.CompilerParams(
            dimension_semantics=("parallel",)),
    )(patches, *flat)
    return out.reshape(B, cfg['out_dim'])


if __name__ == "__main__":
    key = jax.random.PRNGKey(0)
    kp, kx = jax.random.split(key)
    cfg, params = init_params(kp, img=16, out_dim=128)
    # in_chans=1 depth map, small spatial size; NCHW like PyTorch.
    x = jax.random.normal(kx, (2, 1, 16, 16), jnp.float32)
    out = depth_encoder_forward(x, cfg, params)
    jax.block_until_ready(out)
    assert out.shape == (2, 128) and out.dtype == jnp.float32
    print("KERNEL_OK")
</pallas_src>

<mosaic_0001>
module attributes {stable_mosaic.version = 11 : i64} {
  func.func @_fused_kernel(%arg0: i32, %arg1: memref<1x16x16xf32, #tpu.memory_space<vmem>>, %arg2: memref<1x128xf32, #tpu.memory_space<vmem>>, %arg3: memref<64x128xbf16, #tpu.memory_space<vmem>>, %arg4: memref<1x64xf32, #tpu.memory_space<vmem>>, %arg5: memref<1x64xf32, #tpu.memory_space<vmem>>, %arg6: memref<1x32xf32, #tpu.memory_space<vmem>>, %arg7: memref<1x32xf32, #tpu.memory_space<vmem>>, %arg8: memref<1x32xf32, #tpu.memory_space<vmem>>, %arg9: memref<16x32xbf16, #tpu.memory_space<vmem>>, %arg10: memref<1x32xf32, #tpu.memory_space<vmem>>, %arg11: memref<1x32xf32, #tpu.memory_space<vmem>>, %arg12: memref<1x32xf32, #tpu.memory_space<vmem>>, %arg13: memref<1x32xf32, #tpu.memory_space<vmem>>, %arg14: memref<1x128xf32, #tpu.memory_space<vmem>>, %arg15: memref<1x32xf32, #tpu.memory_space<vmem>>, %arg16: memref<32x128xbf16, #tpu.memory_space<vmem>>, %arg17: memref<128x32xbf16, #tpu.memory_space<vmem>>, %arg18: memref<1x32xf32, #tpu.memory_space<vmem>>, %arg19: memref<32x32xbf16, #tpu.memory_space<vmem>>, %arg20: memref<1x96xf32, #tpu.memory_space<vmem>>, %arg21: memref<32x96xbf16, #tpu.memory_space<vmem>>, %arg22: memref<2x16x16xf32, #tpu.memory_space<vmem>>, %arg23: memref<1x32xf32, #tpu.memory_space<vmem>>, %arg24: memref<1x32xf32, #tpu.memory_space<vmem>>, %arg25: memref<1x32xf32, #tpu.memory_space<vmem>>, %arg26: memref<1x32xf32, #tpu.memory_space<vmem>>, %arg27: memref<1x128xf32, #tpu.memory_space<vmem>>, %arg28: memref<1x32xf32, #tpu.memory_space<vmem>>, %arg29: memref<32x128xbf16, #tpu.memory_space<vmem>>, %arg30: memref<128x32xbf16, #tpu.memory_space<vmem>>, %arg31: memref<1x32xf32, #tpu.memory_space<vmem>>, %arg32: memref<32x32xbf16, #tpu.memory_space<vmem>>, %arg33: memref<1x96xf32, #tpu.memory_space<vmem>>, %arg34: memref<32x96xbf16, #tpu.memory_space<vmem>>, %arg35: memref<2x16x16xf32, #tpu.memory_space<vmem>>, %arg36: memref<1x128xf32, #tpu.memory_space<vmem>>, %arg37: memref<1x128xf32, #tpu.memory_space<vmem>>, %arg38: memref<128x64xbf16, #tpu.memory_space<vmem>>, %arg39: memref<1x64xf32, #tpu.memory_space<vmem>>, %arg40: memref<1x64xf32, #tpu.memory_space<vmem>>, %arg41: memref<1x64xf32, #tpu.memory_space<vmem>>, %arg42: memref<1x64xf32, #tpu.memory_space<vmem>>, %arg43: memref<1x256xf32, #tpu.memory_space<vmem>>, %arg44: memref<1x64xf32, #tpu.memory_space<vmem>>, %arg45: memref<64x256xbf16, #tpu.memory_space<vmem>>, %arg46: memref<256x64xbf16, #tpu.memory_space<vmem>>, %arg47: memref<1x64xf32, #tpu.memory_space<vmem>>, %arg48: memref<64x64xbf16, #tpu.memory_space<vmem>>, %arg49: memref<1x192xf32, #tpu.memory_space<vmem>>, %arg50: memref<64x192xbf16, #tpu.memory_space<vmem>>, %arg51: memref<4x4x4xf32, #tpu.memory_space<vmem>>, %arg52: memref<1x64xf32, #tpu.memory_space<vmem>>, %arg53: memref<1x64xf32, #tpu.memory_space<vmem>>, %arg54: memref<1x64xf32, #tpu.memory_space<vmem>>, %arg55: memref<1x64xf32, #tpu.memory_space<vmem>>, %arg56: memref<1x256xf32, #tpu.memory_space<vmem>>, %arg57: memref<1x64xf32, #tpu.memory_space<vmem>>, %arg58: memref<64x256xbf16, #tpu.memory_space<vmem>>, %arg59: memref<256x64xbf16, #tpu.memory_space<vmem>>, %arg60: memref<1x64xf32, #tpu.memory_space<vmem>>, %arg61: memref<64x64xbf16, #tpu.memory_space<vmem>>, %arg62: memref<1x192xf32, #tpu.memory_space<vmem>>, %arg63: memref<64x192xbf16, #tpu.memory_space<vmem>>, %arg64: memref<4x4x4xf32, #tpu.memory_space<vmem>>, %arg65: memref<1x1x128xf32, #tpu.memory_space<vmem>>) attributes {dimension_semantics = [#tpu.dimension_semantics<parallel>], iteration_bounds = array<i64: 2>, scalar_prefetch = 0 : i64, scratch_operands = 0 : i64, tpu.core_type = #tpu.core_type<tc>, window_params = [{transform_indices = @transform_0, window_bounds = array<i64: 1, 16, 16>}, {pipeline_mode = #tpu.pipeline_mode<synchronous>, transform_indices = @transform_1, window_bounds = array<i64: 1, 128>}, {pipeline_mode = #tpu.pipeline_mode<synchronous>, transform_indices = @transform_2, window_bounds = array<i64: 64, 128>}, {pipeline_mode = #tpu.pipeline_mode<synchronous>, transform_indices = @transform_3, window_bounds = array<i64: 1, 64>}, {pipeline_mode = #tpu.pipeline_mode<synchronous>, transform_indices = @transform_4, window_bounds = array<i64: 1, 64>}, {pipeline_mode = #tpu.pipeline_mode<synchronous>, transform_indices = @transform_5, window_bounds = array<i64: 1, 32>}, {pipeline_mode = #tpu.pipeline_mode<synchronous>, transform_indices = @transform_6, window_bounds = array<i64: 1, 32>}, {pipeline_mode = #tpu.pipeline_mode<synchronous>, transform_indices = @transform_7, window_bounds = array<i64: 1, 32>}, {pipeline_mode = #tpu.pipeline_mode<synchronous>, transform_indices = @transform_8, window_bounds = array<i64: 16, 32>}, {pipeline_mode = #tpu.pipeline_mode<synchronous>, transform_indices = @transform_9, window_bounds = array<i64: 1, 32>}, {pipeline_mode = #tpu.pipeline_mode<synchronous>, transform_indices = @transform_10, window_bounds = array<i64: 1, 32>}, {pipeline_mode = #tpu.pipeline_mode<synchronous>, transform_indices = @transform_11, window_bounds = array<i64: 1, 32>}, {pipeline_mode = #tpu.pipeline_mode<synchronous>, transform_indices = @transform_12, window_bounds = array<i64: 1, 32>}, {pipeline_mode = #tpu.pipeline_mode<synchronous>, transform_indices = @transform_13, window_bounds = array<i64: 1, 128>}, {pipeline_mode = #tpu.pipeline_mode<synchronous>, transform_indices = @transform_14, window_bounds = array<i64: 1, 32>}, {pipeline_mode = #tpu.pipeline_mode<synchronous>, transform_indices = @transform_15, window_bounds = array<i64: 32, 128>}, {pipeline_mode = #tpu.pipeline_mode<synchronous>, transform_indices = @transform_16, window_bounds = array<i64: 128, 32>}, {pipeline_mode = #tpu.pipeline_mode<synchronous>, transform_indices = @transform_17, window_bounds = array<i64: 1, 32>}, {pipeline_mode = #tpu.pipeline_mode<synchronous>, transform_indices = @transform_18, window_bounds = array<i64: 32, 32>}, {pipeline_mode = #tpu.pipeline_mode<synchronous>, transform_indices = @transform_19, window_bounds = array<i64: 1, 96>}, {pipeline_mode = #tpu.pipeline_mode<synchronous>, transform_indices = @transform_20, window_bounds = array<i64: 32, 96>}, {pipeline_mode = #tpu.pipeline_mode<synchronous>, transform_indices = @transform_21, window_bounds = array<i64: 2, 16, 16>}, {pipeline_mode = #tpu.pipeline_mode<synchronous>, transform_indices = @transform_22, window_bounds = array<i64: 1, 32>}, {pipeline_mode = #tpu.pipeline_mode<synchronous>, transform_indices = @transform_23, window_bounds = array<i64: 1, 32>}, {pipeline_mode = #tpu.pipeline_mode<synchronous>, transform_indices = @transform_24, window_bounds = array<i64: 1, 32>}, {pipeline_mode = #tpu.pipeline_mode<synchronous>, transform_indices = @transform_25, window_bounds = array<i64: 1, 32>}, {pipeline_mode = #tpu.pipeline_mode<synchronous>, transform_indices = @transform_26, window_bounds = array<i64: 1, 128>}, {pipeline_mode = #tpu.pipeline_mode<synchronous>, transform_indices = @transform_27, window_bounds = array<i64: 1, 32>}, {pipeline_mode = #tpu.pipeline_mode<synchronous>, transform_indices = @transform_28, window_bounds = array<i64: 32, 128>}, {pipeline_mode = #tpu.pipeline_mode<synchronous>, transform_indices = @transform_29, window_bounds = array<i64: 128, 32>}, {pipeline_mode = #tpu.pipeline_mode<synchronous>, transform_indices = @transform_30, window_bounds = array<i64: 1, 32>}, {pipeline_mode = #tpu.pipeline_mode<synchronous>, transform_indices = @transform_31, window_bounds = array<i64: 32, 32>}, {pipeline_mode = #tpu.pipeline_mode<synchronous>, transform_indices = @transform_32, window_bounds = array<i64: 1, 96>}, {pipeline_mode = #tpu.pipeline_mode<synchronous>, transform_indices = @transform_33, window_bounds = array<i64: 32, 96>}, {pipeline_mode = #tpu.pipeline_mode<synchronous>, transform_indices = @transform_34, window_bounds = array<i64: 2, 16, 16>}, {pipeline_mode = #tpu.pipeline_mode<synchronous>, transform_indices = @transform_35, window_bounds = array<i64: 1, 128>}, {pipeline_mode = #tpu.pipeline_mode<synchronous>, transform_indices = @transform_36, window_bounds = array<i64: 1, 128>}, {pipeline_mode = #tpu.pipeline_mode<synchronous>, transform_indices = @transform_37, window_bounds = array<i64: 128, 64>}, {pipeline_mode = #tpu.pipeline_mode<synchronous>, transform_indices = @transform_38, window_bounds = array<i64: 1, 64>}, {pipeline_mode = #tpu.pipeline_mode<synchronous>, transform_indices = @transform_39, window_bounds = array<i64: 1, 64>}, {pipeline_mode = #tpu.pipeline_mode<synchronous>, transform_indices = @transform_40, window_bounds = array<i64: 1, 64>}, {pipeline_mode = #tpu.pipeline_mode<synchronous>, transform_indices = @transform_41, window_bounds = array<i64: 1, 64>}, {pipeline_mode = #tpu.pipeline_mode<synchronous>, transform_indices = @transform_42, window_bounds = array<i64: 1, 256>}, {pipeline_mode = #tpu.pipeline_mode<synchronous>, transform_indices = @transform_43, window_bounds = array<i64: 1, 64>}, {pipeline_mode = #tpu.pipeline_mode<synchronous>, transform_indices = @transform_44, window_bounds = array<i64: 64, 256>}, {pipeline_mode = #tpu.pipeline_mode<synchronous>, transform_indices = @transform_45, window_bounds = array<i64: 256, 64>}, {pipeline_mode = #tpu.pipeline_mode<synchronous>, transform_indices = @transform_46, window_bounds = array<i64: 1, 64>}, {pipeline_mode = #tpu.pipeline_mode<synchronous>, transform_indices = @transform_47, window_bounds = array<i64: 64, 64>}, {pipeline_mode = #tpu.pipeline_mode<synchronous>, transform_indices = @transform_48, window_bounds = array<i64: 1, 192>}, {pipeline_mode = #tpu.pipeline_mode<synchronous>, transform_indices = @transform_49, window_bounds = array<i64: 64, 192>}, {pipeline_mode = #tpu.pipeline_mode<synchronous>, transform_indices = @transform_50, window_bounds = array<i64: 4, 4, 4>}, {pipeline_mode = #tpu.pipeline_mode<synchronous>, transform_indices = @transform_51, window_bounds = array<i64: 1, 64>}, {pipeline_mode = #tpu.pipeline_mode<synchronous>, transform_indices = @transform_52, window_bounds = array<i64: 1, 64>}, {pipeline_mode = #tpu.pipeline_mode<synchronous>, transform_indices = @transform_53, window_bounds = array<i64: 1, 64>}, {pipeline_mode = #tpu.pipeline_mode<synchronous>, transform_indices = @transform_54, window_bounds = array<i64: 1, 64>}, {pipeline_mode = #tpu.pipeline_mode<synchronous>, transform_indices = @transform_55, window_bounds = array<i64: 1, 256>}, {pipeline_mode = #tpu.pipeline_mode<synchronous>, transform_indices = @transform_56, window_bounds = array<i64: 1, 64>}, {pipeline_mode = #tpu.pipeline_mode<synchronous>, transform_indices = @transform_57, window_bounds = array<i64: 64, 256>}, {pipeline_mode = #tpu.pipeline_mode<synchronous>, transform_indices = @transform_58, window_bounds = array<i64: 256, 64>}, {pipeline_mode = #tpu.pipeline_mode<synchronous>, transform_indices = @transform_59, window_bounds = array<i64: 1, 64>}, {pipeline_mode = #tpu.pipeline_mode<synchronous>, transform_indices = @transform_60, window_bounds = array<i64: 64, 64>}, {pipeline_mode = #tpu.pipeline_mode<synchronous>, transform_indices = @transform_61, window_bounds = array<i64: 1, 192>}, {pipeline_mode = #tpu.pipeline_mode<synchronous>, transform_indices = @transform_62, window_bounds = array<i64: 64, 192>}, {pipeline_mode = #tpu.pipeline_mode<synchronous>, transform_indices = @transform_63, window_bounds = array<i64: 4, 4, 4>}, {transform_indices = @transform_64, window_bounds = array<i64: 1, 1, 128>}]} {
    %c0 = arith.constant 0 : index
    %c0_0 = arith.constant 0 : index
    %c0_1 = arith.constant 0 : index
    %0 = vector.load %arg1[%c0, %c0_0, %c0_1] : memref<1x16x16xf32, #tpu.memory_space<vmem>>, vector<1x16x16xf32>
    %1 = vector.shape_cast %0 : vector<1x16x16xf32> to vector<16x16xf32>
    %c0_2 = arith.constant 0 : index
    %c0_3 = arith.constant 0 : index
    %2 = vector.load %arg9[%c0_2, %c0_3] : memref<16x32xbf16, #tpu.memory_space<vmem>>, vector<16x32xbf16>
    %3 = arith.truncf %1 : vector<16x16xf32> to vector<16x16xbf16>
    %cst = arith.constant dense<0.000000e+00> : vector<16x32xf32>
    %4 = tpu.matmul %3, %2, %cst {dimension_numbers = #tpu.dot_dimension_numbers<[1], [0], [0], [1], [0, 0, 1, 1], [], []>} : vector<16x16xbf16>, vector<16x32xbf16>, vector<16x32xf32> -> vector<16x32xf32>
    %c0_4 = arith.constant 0 : index
    %c0_5 = arith.constant 0 : index
    %5 = vector.load %arg6[%c0_4, %c0_5] : memref<1x32xf32, #tpu.memory_space<vmem>>, vector<1x32xf32>
    %6 = vector.broadcast %5 : vector<1x32xf32> to vector<16x32xf32>
    %7 = arith.addf %4, %6 : vector<16x32xf32>
    %c0_6 = arith.constant 0 : index
    %c0_7 = arith.constant 0 : index
    %8 = vector.load %arg8[%c0_6, %c0_7] : memref<1x32xf32, #tpu.memory_space<vmem>>, vector<1x32xf32>
    %c0_8 = arith.constant 0 : index
    %c0_9 = arith.constant 0 : index
    %9 = vector.load %arg7[%c0_8, %c0_9] : memref<1x32xf32, #tpu.memory_space<vmem>>, vector<1x32xf32>
    %cst_10 = arith.constant dense<0.000000e+00> : vector<16xf32>
    %10 = vector.multi_reduction <add>, %7, %cst_10 [1] : vector<16x32xf32> to vector<16xf32>
    %11 = vector.shape_cast %10 : vector<16xf32> to vector<16x1xf32>
    %cst_11 = arith.constant 3.200000e+01 : f32
    %12 = vector.broadcast %cst_11 : f32 to vector<16x1xf32>
    %13 = arith.divf %11, %12 : vector<16x1xf32>
    %14 = vector.broadcast %13 : vector<16x1xf32> to vector<16x32xf32>
    %15 = arith.subf %7, %14 : vector<16x32xf32>
    %16 = arith.mulf %15, %15 : vector<16x32xf32>
    %cst_12 = arith.constant dense<0.000000e+00> : vector<16xf32>
    %17 = vector.multi_reduction <add>, %16, %cst_12 [1] : vector<16x32xf32> to vector<16xf32>
    %18 = vector.shape_cast %17 : vector<16xf32> to vector<16x1xf32>
    %cst_13 = arith.constant 3.200000e+01 : f32
    %19 = vector.broadcast %cst_13 : f32 to vector<16x1xf32>
    %20 = arith.divf %18, %19 : vector<16x1xf32>
    %cst_14 = arith.constant 9.99999974E-6 : f32
    %21 = vector.broadcast %cst_14 : f32 to vector<16x1xf32>
    %22 = arith.addf %20, %21 : vector<16x1xf32>
    %23 = math.rsqrt %22 : vector<16x1xf32>
    %24 = vector.broadcast %23 : vector<16x1xf32> to vector<16x32xf32>
    %25 = arith.mulf %15, %24 : vector<16x32xf32>
    %26 = vector.broadcast %8 : vector<1x32xf32> to vector<16x32xf32>
    %27 = arith.mulf %25, %26 : vector<16x32xf32>
    %28 = vector.broadcast %9 : vector<1x32xf32> to vector<16x32xf32>
    %29 = arith.addf %27, %28 : vector<16x32xf32>
    %c0_15 = arith.constant 0 : index
    %c0_16 = arith.constant 0 : index
    %30 = vector.load %arg11[%c0_15, %c0_16] : memref<1x32xf32, #tpu.memory_space<vmem>>, vector<1x32xf32>
    %c0_17 = arith.constant 0 : index
    %c0_18 = arith.constant 0 : index
    %31 = vector.load %arg10[%c0_17, %c0_18] : memref<1x32xf32, #tpu.memory_space<vmem>>, vector<1x32xf32>
    %cst_19 = arith.constant dense<0.000000e+00> : vector<16xf32>
    %32 = vector.multi_reduction <add>, %29, %cst_19 [1] : vector<16x32xf32> to vector<16xf32>
    %33 = vector.shape_cast %32 : vector<16xf32> to vector<16x1xf32>
    %cst_20 = arith.constant 3.200000e+01 : f32
    %34 = vector.broadcast %cst_20 : f32 to vector<16x1xf32>
    %35 = arith.divf %33, %34 : vector<16x1xf32>
    %36 = vector.broadcast %35 : vector<16x1xf32> to vector<16x32xf32>
    %37 = arith.subf %29, %36 : vector<16x32xf32>
    %38 = arith.mulf %37, %37 : vector<16x32xf32>
    %cst_21 = arith.constant dense<0.000000e+00> : vector<16xf32>
    %39 = vector.multi_reduction <add>, %38, %cst_21 [1] : vector<16x32xf32> to vector<16xf32>
    %40 = vector.shape_cast %39 : vector<16xf32> to vector<16x1xf32>
    %cst_22 = arith.constant 3.200000e+01 : f32
    %41 = vector.broadcast %cst_22 : f32 to vector<16x1xf32>
    %42 = arith.divf %40, %41 : vector<16x1xf32>
    %cst_23 = arith.constant 9.99999974E-6 : f32
    %43 = vector.broadcast %cst_23 : f32 to vector<16x1xf32>
    %44 = arith.addf %42, %43 : vector<16x1xf32>
    %45 = math.rsqrt %44 : vector<16x1xf32>
    %46 = vector.broadcast %45 : vector<16x1xf32> to vector<16x32xf32>
    %47 = arith.mulf %37, %46 : vector<16x32xf32>
    %48 = vector.broadcast %30 : vector<1x32xf32> to vector<16x32xf32>
    %49 = arith.mulf %47, %48 : vector<16x32xf32>
    %50 = vector.broadcast %31 : vector<1x32xf32> to vector<16x32xf32>
    %51 = arith.addf %49, %50 : vector<16x32xf32>
    %c0_24 = arith.constant 0 : index
    %c0_25 = arith.constant 0 : index
    %52 = vector.load %arg21[%c0_24, %c0_25] : memref<32x96xbf16, #tpu.memory_space<vmem>>, vector<32x96xbf16>
    %53 = arith.truncf %51 : vector<16x32xf32> to vector<16x32xbf16>
    %cst_26 = arith.constant dense<0.000000e+00> : vector<16x96xf32>
    %54 = tpu.matmul %53, %52, %cst_26 {dimension_numbers = #tpu.dot_dimension_numbers<[1], [0], [0], [1], [0, 0, 1, 1], [], []>} : vector<16x32xbf16>, vector<32x96xbf16>, vector<16x96xf32> -> vector<16x96xf32>
    %c0_27 = arith.constant 0 : index
    %c0_28 = arith.constant 0 : index
    %55 = vector.load %arg20[%c0_27, %c0_28] : memref<1x96xf32, #tpu.memory_space<vmem>>, vector<1x96xf32>
    %56 = vector.broadcast %55 : vector<1x96xf32> to vector<16x96xf32>
    %57 = arith.addf %54, %56 : vector<16x96xf32>
    %58 = vector.extract_strided_slice %57 {offsets = [0, 0], sizes = [16, 16], strides = [1, 1]} : vector<16x96xf32> to vector<16x16xf32>
    %cst_29 = arith.constant 2.500000e-01 : f32
    %59 = vector.broadcast %cst_29 : f32 to vector<16x16xf32>
    %60 = arith.mulf %58, %59 : vector<16x16xf32>
    %61 = vector.extract_strided_slice %57 {offsets = [0, 32], sizes = [16, 16], strides = [1, 1]} : vector<16x96xf32> to vector<16x16xf32>
    %62 = vector.extract_strided_slice %57 {offsets = [0, 64], sizes = [16, 16], strides = [1, 1]} : vector<16x96xf32> to vector<16x16xf32>
    %63 = arith.truncf %60 : vector<16x16xf32> to vector<16x16xbf16>
    %64 = arith.truncf %61 : vector<16x16xf32> to vector<16x16xbf16>
    %cst_30 = arith.constant dense<0.000000e+00> : vector<16x16xf32>
    %65 = tpu.matmul %63, %64, %cst_30 {dimension_numbers = #tpu.dot_dimension_numbers<[1], [1], [0], [0], [0, 0, 1, 0], [], []>} : vector<16x16xbf16>, vector<16x16xbf16>, vector<16x16xf32> -> vector<16x16xf32>
    %c0_31 = arith.constant 0 : index
    %c0_32 = arith.constant 0 : index
    %c0_33 = arith.constant 0 : index
    %66 = vector.load %arg22[%c0_31, %c0_32, %c0_33] : memref<2x16x16xf32, #tpu.memory_space<vmem>>, vector<1x16x16xf32>
    %67 = vector.shape_cast %66 : vector<1x16x16xf32> to vector<16x16xf32>
    %68 = arith.addf %65, %67 : vector<16x16xf32>
    %cst_34 = arith.constant dense<0xFF800000> : vector<16xf32>
    %69 = vector.multi_reduction <maximumf>, %68, %cst_34 [1] : vector<16x16xf32> to vector<16xf32>
    %70 = vector.shape_cast %69 : vector<16xf32> to vector<16x1xf32>
    %71 = vector.broadcast %70 : vector<16x1xf32> to vector<16x16xf32>
    %72 = arith.subf %68, %71 : vector<16x16xf32>
    %73 = math.exp %72 : vector<16x16xf32>
    %cst_35 = arith.constant dense<0.000000e+00> : vector<16xf32>
    %74 = vector.multi_reduction <add>, %73, %cst_35 [1] : vector<16x16xf32> to vector<16xf32>
    %75 = vector.shape_cast %74 : vector<16xf32> to vector<16x1xf32>
    %76 = tpu.reciprocal %75 {approx = true} : vector<16x1xf32> -> vector<16x1xf32>
    %77 = vector.broadcast %76 : vector<16x1xf32> to vector<16x16xf32>
    %78 = arith.mulf %73, %77 : vector<16x16xf32>
    %79 = arith.truncf %78 : vector<16x16xf32> to vector<16x16xbf16>
    %80 = arith.truncf %62 : vector<16x16xf32> to vector<16x16xbf16>
    %cst_36 = arith.constant dense<0.000000e+00> : vector<16x16xf32>
    %81 = tpu.matmul %79, %80, %cst_36 {dimension_numbers = #tpu.dot_dimension_numbers<[1], [0], [0], [1], [0, 0, 1, 1], [], []>} : vector<16x16xbf16>, vector<16x16xbf16>, vector<16x16xf32> -> vector<16x16xf32>
    %82 = vector.extract_strided_slice %57 {offsets = [0, 16], sizes = [16, 16], strides = [1, 1]} : vector<16x96xf32> to vector<16x16xf32>
    %cst_37 = arith.constant 2.500000e-01 : f32
    %83 = vector.broadcast %cst_37 : f32 to vector<16x16xf32>
    %84 = arith.mulf %82, %83 : vector<16x16xf32>
    %85 = vector.extract_strided_slice %57 {offsets = [0, 48], sizes = [16, 16], strides = [1, 1]} : vector<16x96xf32> to vector<16x16xf32>
    %86 = vector.extract_strided_slice %57 {offsets = [0, 80], sizes = [16, 16], strides = [1, 1]} : vector<16x96xf32> to vector<16x16xf32>
    %87 = arith.truncf %84 : vector<16x16xf32> to vector<16x16xbf16>
    %88 = arith.truncf %85 : vector<16x16xf32> to vector<16x16xbf16>
    %cst_38 = arith.constant dense<0.000000e+00> : vector<16x16xf32>
    %89 = tpu.matmul %87, %88, %cst_38 {dimension_numbers = #tpu.dot_dimension_numbers<[1], [1], [0], [0], [0, 0, 1, 0], [], []>} : vector<16x16xbf16>, vector<16x16xbf16>, vector<16x16xf32> -> vector<16x16xf32>
    %c1 = arith.constant 1 : index
    %c0_39 = arith.constant 0 : index
    %c0_40 = arith.constant 0 : index
    %90 = vector.load %arg22[%c1, %c0_39, %c0_40] : memref<2x16x16xf32, #tpu.memory_space<vmem>>, vector<1x16x16xf32>
    %91 = vector.shape_cast %90 : vector<1x16x16xf32> to vector<16x16xf32>
    %92 = arith.addf %89, %91 : vector<16x16xf32>
    %cst_41 = arith.constant dense<0xFF800000> : vector<16xf32>
    %93 = vector.multi_reduction <maximumf>, %92, %cst_41 [1] : vector<16x16xf32> to vector<16xf32>
    %94 = vector.shape_cast %93 : vector<16xf32> to vector<16x1xf32>
    %95 = vector.broadcast %94 : vector<16x1xf32> to vector<16x16xf32>
    %96 = arith.subf %92, %95 : vector<16x16xf32>
    %97 = math.exp %96 : vector<16x16xf32>
    %cst_42 = arith.constant dense<0.000000e+00> : vector<16xf32>
    %98 = vector.multi_reduction <add>, %97, %cst_42 [1] : vector<16x16xf32> to vector<16xf32>
    %99 = vector.shape_cast %98 : vector<16xf32> to vector<16x1xf32>
    %100 = tpu.reciprocal %99 {approx = true} : vector<16x1xf32> -> vector<16x1xf32>
    %101 = vector.broadcast %100 : vector<16x1xf32> to vector<16x16xf32>
    %102 = arith.mulf %97, %101 : vector<16x16xf32>
    %103 = arith.truncf %102 : vector<16x16xf32> to vector<16x16xbf16>
    %104 = arith.truncf %86 : vector<16x16xf32> to vector<16x16xbf16>
    %cst_43 = arith.constant dense<0.000000e+00> : vector<16x16xf32>
    %105 = tpu.matmul %103, %104, %cst_43 {dimension_numbers = #tpu.dot_dimension_numbers<[1], [0], [0], [1], [0, 0, 1, 1], [], []>} : vector<16x16xbf16>, vector<16x16xbf16>, vector<16x16xf32> -> vector<16x16xf32>
    %106 = tpu.concatenate %81, %105 in 1 : vector<16x16xf32>, vector<16x16xf32> -> vector<16x32xf32>
    %c0_44 = arith.constant 0 : index
    %c0_45 = arith.constant 0 : index
    %107 = vector.load %arg19[%c0_44, %c0_45] : memref<32x32xbf16, #tpu.memory_space<vmem>>, vector<32x32xbf16>
    %108 = arith.truncf %106 : vector<16x32xf32> to vector<16x32xbf16>
    %cst_46 = arith.constant dense<0.000000e+00> : vector<16x32xf32>
    %109 = tpu.matmul %108, %107, %cst_46 {dimension_numbers = #tpu.dot_dimension_numbers<[1], [0], [0], [1], [0, 0, 1, 1], [], []>} : vector<16x32xbf16>, vector<32x32xbf16>, vector<16x32xf32> -> vector<16x32xf32>
    %c0_47 = arith.constant 0 : index
    %c0_48 = arith.constant 0 : index
    %110 = vector.load %arg18[%c0_47, %c0_48] : memref<1x32xf32, #tpu.memory_space<vmem>>, vector<1x32xf32>
    %111 = vector.broadcast %110 : vector<1x32xf32> to vector<16x32xf32>
    %112 = arith.addf %109, %111 : vector<16x32xf32>
    %113 = arith.addf %29, %112 : vector<16x32xf32>
    %c0_49 = arith.constant 0 : index
    %c0_50 = arith.constant 0 : index
    %114 = vector.load %arg13[%c0_49, %c0_50] : memref<1x32xf32, #tpu.memory_space<vmem>>, vector<1x32xf32>
    %c0_51 = arith.constant 0 : index
    %c0_52 = arith.constant 0 : index
    %115 = vector.load %arg12[%c0_51, %c0_52] : memref<1x32xf32, #tpu.memory_space<vmem>>, vector<1x32xf32>
    %cst_53 = arith.constant dense<0.000000e+00> : vector<16xf32>
    %116 = vector.multi_reduction <add>, %113, %cst_53 [1] : vector<16x32xf32> to vector<16xf32>
    %117 = vector.shape_cast %116 : vector<16xf32> to vector<16x1xf32>
    %cst_54 = arith.constant 3.200000e+01 : f32
    %118 = vector.broadcast %cst_54 : f32 to vector<16x1xf32>
    %119 = arith.divf %117, %118 : vector<16x1xf32>
    %120 = vector.broadcast %119 : vector<16x1xf32> to vector<16x32xf32>
    %121 = arith.subf %113, %120 : vector<16x32xf32>
    %122 = arith.mulf %121, %121 : vector<16x32xf32>
    %cst_55 = arith.constant dense<0.000000e+00> : vector<16xf32>
    %123 = vector.multi_reduction <add>, %122, %cst_55 [1] : vector<16x32xf32> to vector<16xf32>
    %124 = vector.shape_cast %123 : vector<16xf32> to vector<16x1xf32>
    %cst_56 = arith.constant 3.200000e+01 : f32
    %125 = vector.broadcast %cst_56 : f32 to vector<16x1xf32>
    %126 = arith.divf %124, %125 : vector<16x1xf32>
    %cst_57 = arith.constant 9.99999974E-6 : f32
    %127 = vector.broadcast %cst_57 : f32 to vector<16x1xf32>
    %128 = arith.addf %126, %127 : vector<16x1xf32>
    %129 = math.rsqrt %128 : vector<16x1xf32>
    %130 = vector.broadcast %129 : vector<16x1xf32> to vector<16x32xf32>
    %131 = arith.mulf %121, %130 : vector<16x32xf32>
    %132 = vector.broadcast %114 : vector<1x32xf32> to vector<16x32xf32>
    %133 = arith.mulf %131, %132 : vector<16x32xf32>
    %134 = vector.broadcast %115 : vector<1x32xf32> to vector<16x32xf32>
    %135 = arith.addf %133, %134 : vector<16x32xf32>
    %c0_58 = arith.constant 0 : index
    %c0_59 = arith.constant 0 : index
    %136 = vector.load %arg16[%c0_58, %c0_59] : memref<32x128xbf16, #tpu.memory_space<vmem>>, vector<32x128xbf16>
    %137 = arith.truncf %135 : vector<16x32xf32> to vector<16x32xbf16>
    %cst_60 = arith.constant dense<0.000000e+00> : vector<16x128xf32>
    %138 = tpu.matmul %137, %136, %cst_60 {dimension_numbers = #tpu.dot_dimension_numbers<[1], [0], [0], [1], [0, 0, 1, 1], [], []>} : vector<16x32xbf16>, vector<32x128xbf16>, vector<16x128xf32> -> vector<16x128xf32>
    %c0_61 = arith.constant 0 : index
    %c0_62 = arith.constant 0 : index
    %139 = vector.load %arg14[%c0_61, %c0_62] : memref<1x128xf32, #tpu.memory_space<vmem>>, vector<1x128xf32>
    %140 = vector.broadcast %139 : vector<1x128xf32> to vector<16x128xf32>
    %141 = arith.addf %138, %140 : vector<16x128xf32>
    %142 = arith.mulf %141, %141 : vector<16x128xf32>
    %143 = arith.mulf %141, %142 : vector<16x128xf32>
    %cst_63 = arith.constant 4.471500e-02 : f32
    %144 = vector.broadcast %cst_63 : f32 to vector<16x128xf32>
    %145 = arith.mulf %144, %143 : vector<16x128xf32>
    %146 = arith.addf %141, %145 : vector<16x128xf32>
    %cst_64 = arith.constant 0.797884583 : f32
    %147 = vector.broadcast %cst_64 : f32 to vector<16x128xf32>
    %148 = arith.mulf %147, %146 : vector<16x128xf32>
    %149 = math.tanh %148 : vector<16x128xf32>
    %cst_65 = arith.constant 1.000000e+00 : f32
    %150 = vector.broadcast %cst_65 : f32 to vector<16x128xf32>
    %151 = arith.addf %150, %149 : vector<16x128xf32>
    %cst_66 = arith.constant 5.000000e-01 : f32
    %152 = vector.broadcast %cst_66 : f32 to vector<16x128xf32>
    %153 = arith.mulf %152, %151 : vector<16x128xf32>
    %154 = arith.mulf %141, %153 : vector<16x128xf32>
    %c0_67 = arith.constant 0 : index
    %c0_68 = arith.constant 0 : index
    %155 = vector.load %arg17[%c0_67, %c0_68] : memref<128x32xbf16, #tpu.memory_space<vmem>>, vector<128x32xbf16>
    %156 = arith.truncf %154 : vector<16x128xf32> to vector<16x128xbf16>
    %cst_69 = arith.constant dense<0.000000e+00> : vector<16x32xf32>
    %157 = tpu.matmul %156, %155, %cst_69 {dimension_numbers = #tpu.dot_dimension_numbers<[1], [0], [0], [1], [0, 0, 1, 1], [], []>} : vector<16x128xbf16>, vector<128x32xbf16>, vector<16x32xf32> -> vector<16x32xf32>
    %158 = arith.addf %113, %157 : vector<16x32xf32>
    %c0_70 = arith.constant 0 : index
    %c0_71 = arith.constant 0 : index
    %159 = vector.load %arg15[%c0_70, %c0_71] : memref<1x32xf32, #tpu.memory_space<vmem>>, vector<1x32xf32>
    %160 = vector.broadcast %159 : vector<1x32xf32> to vector<16x32xf32>
    %161 = arith.addf %158, %160 : vector<16x32xf32>
    %c0_72 = arith.constant 0 : index
    %c0_73 = arith.constant 0 : index
    %162 = vector.load %arg24[%c0_72, %c0_73] : memref<1x32xf32, #tpu.memory_space<vmem>>, vector<1x32xf32>
    %c0_74 = arith.constant 0 : index
    %c0_75 = arith.constant 0 : index
    %163 = vector.load %arg23[%c0_74, %c0_75] : memref<1x32xf32, #tpu.memory_space<vmem>>, vector<1x32xf32>
    %cst_76 = arith.constant dense<0.000000e+00> : vector<16xf32>
    %164 = vector.multi_reduction <add>, %161, %cst_76 [1] : vector<16x32xf32> to vector<16xf32>
    %165 = vector.shape_cast %164 : vector<16xf32> to vector<16x1xf32>
    %cst_77 = arith.constant 3.200000e+01 : f32
    %166 = vector.broadcast %cst_77 : f32 to vector<16x1xf32>
    %167 = arith.divf %165, %166 : vector<16x1xf32>
    %168 = vector.broadcast %167 : vector<16x1xf32> to vector<16x32xf32>
    %169 = arith.subf %161, %168 : vector<16x32xf32>
    %170 = arith.mulf %169, %169 : vector<16x32xf32>
    %cst_78 = arith.constant dense<0.000000e+00> : vector<16xf32>
    %171 = vector.multi_reduction <add>, %170, %cst_78 [1] : vector<16x32xf32> to vector<16xf32>
    %172 = vector.shape_cast %171 : vector<16xf32> to vector<16x1xf32>
    %cst_79 = arith.constant 3.200000e+01 : f32
    %173 = vector.broadcast %cst_79 : f32 to vector<16x1xf32>
    %174 = arith.divf %172, %173 : vector<16x1xf32>
    %cst_80 = arith.constant 9.99999974E-6 : f32
    %175 = vector.broadcast %cst_80 : f32 to vector<16x1xf32>
    %176 = arith.addf %174, %175 : vector<16x1xf32>
    %177 = math.rsqrt %176 : vector<16x1xf32>
    %178 = vector.broadcast %177 : vector<16x1xf32> to vector<16x32xf32>
    %179 = arith.mulf %169, %178 : vector<16x32xf32>
    %180 = vector.broadcast %162 : vector<1x32xf32> to vector<16x32xf32>
    %181 = arith.mulf %179, %180 : vector<16x32xf32>
    %182 = vector.broadcast %163 : vector<1x32xf32> to vector<16x32xf32>
    %183 = arith.addf %181, %182 : vector<16x32xf32>
    %c0_81 = arith.constant 0 : index
    %c0_82 = arith.constant 0 : index
    %184 = vector.load %arg34[%c0_81, %c0_82] : memref<32x96xbf16, #tpu.memory_space<vmem>>, vector<32x96xbf16>
    %185 = arith.truncf %183 : vector<16x32xf32> to vector<16x32xbf16>
    %cst_83 = arith.constant dense<0.000000e+00> : vector<16x96xf32>
    %186 = tpu.matmul %185, %184, %cst_83 {dimension_numbers = #tpu.dot_dimension_numbers<[1], [0], [0], [1], [0, 0, 1, 1], [], []>} : vector<16x32xbf16>, vector<32x96xbf16>, vector<16x96xf32> -> vector<16x96xf32>
    %c0_84 = arith.constant 0 : index
    %c0_85 = arith.constant 0 : index
    %187 = vector.load %arg33[%c0_84, %c0_85] : memref<1x96xf32, #tpu.memory_space<vmem>>, vector<1x96xf32>
    %188 = vector.broadcast %187 : vector<1x96xf32> to vector<16x96xf32>
    %189 = arith.addf %186, %188 : vector<16x96xf32>
    %190 = vector.extract_strided_slice %189 {offsets = [0, 0], sizes = [16, 16], strides = [1, 1]} : vector<16x96xf32> to vector<16x16xf32>
    %cst_86 = arith.constant 2.500000e-01 : f32
    %191 = vector.broadcast %cst_86 : f32 to vector<16x16xf32>
    %192 = arith.mulf %190, %191 : vector<16x16xf32>
    %193 = vector.extract_strided_slice %189 {offsets = [0, 32], sizes = [16, 16], strides = [1, 1]} : vector<16x96xf32> to vector<16x16xf32>
    %194 = vector.extract_strided_slice %189 {offsets = [0, 64], sizes = [16, 16], strides = [1, 1]} : vector<16x96xf32> to vector<16x16xf32>
    %195 = arith.truncf %192 : vector<16x16xf32> to vector<16x16xbf16>
    %196 = arith.truncf %193 : vector<16x16xf32> to vector<16x16xbf16>
    %cst_87 = arith.constant dense<0.000000e+00> : vector<16x16xf32>
    %197 = tpu.matmul %195, %196, %cst_87 {dimension_numbers = #tpu.dot_dimension_numbers<[1], [1], [0], [0], [0, 0, 1, 0], [], []>} : vector<16x16xbf16>, vector<16x16xbf16>, vector<16x16xf32> -> vector<16x16xf32>
    %c0_88 = arith.constant 0 : index
    %c0_89 = arith.constant 0 : index
    %c0_90 = arith.constant 0 : index
    %198 = vector.load %arg35[%c0_88, %c0_89, %c0_90] : memref<2x16x16xf32, #tpu.memory_space<vmem>>, vector<1x16x16xf32>
    %199 = vector.shape_cast %198 : vector<1x16x16xf32> to vector<16x16xf32>
    %200 = arith.addf %197, %199 : vector<16x16xf32>
    %cst_91 = arith.constant dense<0xFF800000> : vector<16xf32>
    %201 = vector.multi_reduction <maximumf>, %200, %cst_91 [1] : vector<16x16xf32> to vector<16xf32>
    %202 = vector.shape_cast %201 : vector<16xf32> to vector<16x1xf32>
    %203 = vector.broadcast %202 : vector<16x1xf32> to vector<16x16xf32>
    %204 = arith.subf %200, %203 : vector<16x16xf32>
    %205 = math.exp %204 : vector<16x16xf32>
    %cst_92 = arith.constant dense<0.000000e+00> : vector<16xf32>
    %206 = vector.multi_reduction <add>, %205, %cst_92 [1] : vector<16x16xf32> to vector<16xf32>
    %207 = vector.shape_cast %206 : vector<16xf32> to vector<16x1xf32>
    %208 = tpu.reciprocal %207 {approx = true} : vector<16x1xf32> -> vector<16x1xf32>
    %209 = vector.broadcast %208 : vector<16x1xf32> to vector<16x16xf32>
    %210 = arith.mulf %205, %209 : vector<16x16xf32>
    %211 = arith.truncf %210 : vector<16x16xf32> to vector<16x16xbf16>
    %212 = arith.truncf %194 : vector<16x16xf32> to vector<16x16xbf16>
    %cst_93 = arith.constant dense<0.000000e+00> : vector<16x16xf32>
    %213 = tpu.matmul %211, %212, %cst_93 {dimension_numbers = #tpu.dot_dimension_numbers<[1], [0], [0], [1], [0, 0, 1, 1], [], []>} : vector<16x16xbf16>, vector<16x16xbf16>, vector<16x16xf32> -> vector<16x16xf32>
    %214 = vector.extract_strided_slice %189 {offsets = [0, 16], sizes = [16, 16], strides = [1, 1]} : vector<16x96xf32> to vector<16x16xf32>
    %cst_94 = arith.constant 2.500000e-01 : f32
    %215 = vector.broadcast %cst_94 : f32 to vector<16x16xf32>
    %216 = arith.mulf %214, %215 : vector<16x16xf32>
    %217 = vector.extract_strided_slice %189 {offsets = [0, 48], sizes = [16, 16], strides = [1, 1]} : vector<16x96xf32> to vector<16x16xf32>
    %218 = vector.extract_strided_slice %189 {offsets = [0, 80], sizes = [16, 16], strides = [1, 1]} : vector<16x96xf32> to vector<16x16xf32>
    %219 = arith.truncf %216 : vector<16x16xf32> to vector<16x16xbf16>
    %220 = arith.truncf %217 : vector<16x16xf32> to vector<16x16xbf16>
    %cst_95 = arith.constant dense<0.000000e+00> : vector<16x16xf32>
    %221 = tpu.matmul %219, %220, %cst_95 {dimension_numbers = #tpu.dot_dimension_numbers<[1], [1], [0], [0], [0, 0, 1, 0], [], []>} : vector<16x16xbf16>, vector<16x16xbf16>, vector<16x16xf32> -> vector<16x16xf32>
    %c1_96 = arith.constant 1 : index
    %c0_97 = arith.constant 0 : index
    %c0_98 = arith.constant 0 : index
    %222 = vector.load %arg35[%c1_96, %c0_97, %c0_98] : memref<2x16x16xf32, #tpu.memory_space<vmem>>, vector<1x16x16xf32>
    %223 = vector.shape_cast %222 : vector<1x16x16xf32> to vector<16x16xf32>
    %224 = arith.addf %221, %223 : vector<16x16xf32>
    %cst_99 = arith.constant dense<0xFF800000> : vector<16xf32>
    %225 = vector.multi_reduction <maximumf>, %224, %cst_99 [1] : vector<16x16xf32> to vector<16xf32>
    %226 = vector.shape_cast %225 : vector<16xf32> to vector<16x1xf32>
    %227 = vector.broadcast %226 : vector<16x1xf32> to vector<16x16xf32>
    %228 = arith.subf %224, %227 : vector<16x16xf32>
    %229 = math.exp %228 : vector<16x16xf32>
    %cst_100 = arith.constant dense<0.000000e+00> : vector<16xf32>
    %230 = vector.multi_reduction <add>, %229, %cst_100 [1] : vector<16x16xf32> to vector<16xf32>
    %231 = vector.shape_cast %230 : vector<16xf32> to vector<16x1xf32>
    %232 = tpu.reciprocal %231 {approx = true} : vector<16x1xf32> -> vector<16x1xf32>
    %233 = vector.broadcast %232 : vector<16x1xf32> to vector<16x16xf32>
    %234 = arith.mulf %229, %233 : vector<16x16xf32>
    %235 = arith.truncf %234 : vector<16x16xf32> to vector<16x16xbf16>
    %236 = arith.truncf %218 : vector<16x16xf32> to vector<16x16xbf16>
    %cst_101 = arith.constant dense<0.000000e+00> : vector<16x16xf32>
    %237 = tpu.matmul %235, %236, %cst_101 {dimension_numbers = #tpu.dot_dimension_numbers<[1], [0], [0], [1], [0, 0, 1, 1], [], []>} : vector<16x16xbf16>, vector<16x16xbf16>, vector<16x16xf32> -> vector<16x16xf32>
    %238 = tpu.concatenate %213, %237 in 1 : vector<16x16xf32>, vector<16x16xf32> -> vector<16x32xf32>
    %c0_102 = arith.constant 0 : index
    %c0_103 = arith.constant 0 : index
    %239 = vector.load %arg32[%c0_102, %c0_103] : memref<32x32xbf16, #tpu.memory_space<vmem>>, vector<32x32xbf16>
    %240 = arith.truncf %238 : vector<16x32xf32> to vector<16x32xbf16>
    %cst_104 = arith.constant dense<0.000000e+00> : vector<16x32xf32>
    %241 = tpu.matmul %240, %239, %cst_104 {dimension_numbers = #tpu.dot_dimension_numbers<[1], [0], [0], [1], [0, 0, 1, 1], [], []>} : vector<16x32xbf16>, vector<32x32xbf16>, vector<16x32xf32> -> vector<16x32xf32>
    %c0_105 = arith.constant 0 : index
    %c0_106 = arith.constant 0 : index
    %242 = vector.load %arg31[%c0_105, %c0_106] : memref<1x32xf32, #tpu.memory_space<vmem>>, vector<1x32xf32>
    %243 = vector.broadcast %242 : vector<1x32xf32> to vector<16x32xf32>
    %244 = arith.addf %241, %243 : vector<16x32xf32>
    %245 = arith.addf %161, %244 : vector<16x32xf32>
    %c0_107 = arith.constant 0 : index
    %c0_108 = arith.constant 0 : index
    %246 = vector.load %arg26[%c0_107, %c0_108] : memref<1x32xf32, #tpu.memory_space<vmem>>, vector<1x32xf32>
    %c0_109 = arith.constant 0 : index
    %c0_110 = arith.constant 0 : index
    %247 = vector.load %arg25[%c0_109, %c0_110] : memref<1x32xf32, #tpu.memory_space<vmem>>, vector<1x32xf32>
    %cst_111 = arith.constant dense<0.000000e+00> : vector<16xf32>
    %248 = vector.multi_reduction <add>, %245, %cst_111 [1] : vector<16x32xf32> to vector<16xf32>
    %249 = vector.shape_cast %248 : vector<16xf32> to vector<16x1xf32>
    %cst_112 = arith.constant 3.200000e+01 : f32
    %250 = vector.broadcast %cst_112 : f32 to vector<16x1xf32>
    %251 = arith.divf %249, %250 : vector<16x1xf32>
    %252 = vector.broadcast %251 : vector<16x1xf32> to vector<16x32xf32>
    %253 = arith.subf %245, %252 : vector<16x32xf32>
    %254 = arith.mulf %253, %253 : vector<16x32xf32>
    %cst_113 = arith.constant dense<0.000000e+00> : vector<16xf32>
    %255 = vector.multi_reduction <add>, %254, %cst_113 [1] : vector<16x32xf32> to vector<16xf32>
    %256 = vector.shape_cast %255 : vector<16xf32> to vector<16x1xf32>
    %cst_114 = arith.constant 3.200000e+01 : f32
    %257 = vector.broadcast %cst_114 : f32 to vector<16x1xf32>
    %258 = arith.divf %256, %257 : vector<16x1xf32>
    %cst_115 = arith.constant 9.99999974E-6 : f32
    %259 = vector.broadcast %cst_115 : f32 to vector<16x1xf32>
    %260 = arith.addf %258, %259 : vector<16x1xf32>
    %261 = math.rsqrt %260 : vector<16x1xf32>
    %262 = vector.broadcast %261 : vector<16x1xf32> to vector<16x32xf32>
    %263 = arith.mulf %253, %262 : vector<16x32xf32>
    %264 = vector.broadcast %246 : vector<1x32xf32> to vector<16x32xf32>
    %265 = arith.mulf %263, %264 : vector<16x32xf32>
    %266 = vector.broadcast %247 : vector<1x32xf32> to vector<16x32xf32>
    %267 = arith.addf %265, %266 : vector<16x32xf32>
    %c0_116 = arith.constant 0 : index
    %c0_117 = arith.constant 0 : index
    %268 = vector.load %arg29[%c0_116, %c0_117] : memref<32x128xbf16, #tpu.memory_space<vmem>>, vector<32x128xbf16>
    %269 = arith.truncf %267 : vector<16x32xf32> to vector<16x32xbf16>
    %cst_118 = arith.constant dense<0.000000e+00> : vector<16x128xf32>
    %270 = tpu.matmul %269, %268, %cst_118 {dimension_numbers = #tpu.dot_dimension_numbers<[1], [0], [0], [1], [0, 0, 1, 1], [], []>} : vector<16x32xbf16>, vector<32x128xbf16>, vector<16x128xf32> -> vector<16x128xf32>
    %c0_119 = arith.constant 0 : index
    %c0_120 = arith.constant 0 : index
    %271 = vector.load %arg27[%c0_119, %c0_120] : memref<1x128xf32, #tpu.memory_space<vmem>>, vector<1x128xf32>
    %272 = vector.broadcast %271 : vector<1x128xf32> to vector<16x128xf32>
    %273 = arith.addf %270, %272 : vector<16x128xf32>
    %274 = arith.mulf %273, %273 : vector<16x128xf32>
    %275 = arith.mulf %273, %274 : vector<16x128xf32>
    %cst_121 = arith.constant 4.471500e-02 : f32
    %276 = vector.broadcast %cst_121 : f32 to vector<16x128xf32>
    %277 = arith.mulf %276, %275 : vector<16x128xf32>
    %278 = arith.addf %273, %277 : vector<16x128xf32>
    %cst_122 = arith.constant 0.797884583 : f32
    %279 = vector.broadcast %cst_122 : f32 to vector<16x128xf32>
    %280 = arith.mulf %279, %278 : vector<16x128xf32>
    %281 = math.tanh %280 : vector<16x128xf32>
    %cst_123 = arith.constant 1.000000e+00 : f32
    %282 = vector.broadcast %cst_123 : f32 to vector<16x128xf32>
    %283 = arith.addf %282, %281 : vector<16x128xf32>
    %cst_124 = arith.constant 5.000000e-01 : f32
    %284 = vector.broadcast %cst_124 : f32 to vector<16x128xf32>
    %285 = arith.mulf %284, %283 : vector<16x128xf32>
    %286 = arith.mulf %273, %285 : vector<16x128xf32>
    %c0_125 = arith.constant 0 : index
    %c0_126 = arith.constant 0 : index
    %287 = vector.load %arg30[%c0_125, %c0_126] : memref<128x32xbf16, #tpu.memory_space<vmem>>, vector<128x32xbf16>
    %288 = arith.truncf %286 : vector<16x128xf32> to vector<16x128xbf16>
    %cst_127 = arith.constant dense<0.000000e+00> : vector<16x32xf32>
    %289 = tpu.matmul %288, %287, %cst_127 {dimension_numbers = #tpu.dot_dimension_numbers<[1], [0], [0], [1], [0, 0, 1, 1], [], []>} : vector<16x128xbf16>, vector<128x32xbf16>, vector<16x32xf32> -> vector<16x32xf32>
    %290 = arith.addf %245, %289 : vector<16x32xf32>
    %c0_128 = arith.constant 0 : index
    %c0_129 = arith.constant 0 : index
    %291 = vector.load %arg28[%c0_128, %c0_129] : memref<1x32xf32, #tpu.memory_space<vmem>>, vector<1x32xf32>
    %292 = vector.broadcast %291 : vector<1x32xf32> to vector<16x32xf32>
    %293 = arith.addf %290, %292 : vector<16x32xf32>
    %294 = vector.extract_strided_slice %293 {offsets = [0, 0], sizes = [1, 32], strides = [1, 1]} : vector<16x32xf32> to vector<1x32xf32>
    %295 = vector.extract_strided_slice %293 {offsets = [4, 0], sizes = [1, 32], strides = [1, 1]} : vector<16x32xf32> to vector<1x32xf32>
    %296 = vector.extract_strided_slice %293 {offsets = [1, 0], sizes = [1, 32], strides = [1, 1]} : vector<16x32xf32> to vector<1x32xf32>
    %297 = vector.extract_strided_slice %293 {offsets = [5, 0], sizes = [1, 32], strides = [1, 1]} : vector<16x32xf32> to vector<1x32xf32>
    %298 = tpu.concatenate %294, %295, %296, %297 in 1 : vector<1x32xf32>, vector<1x32xf32>, vector<1x32xf32>, vector<1x32xf32> -> vector<1x128xf32>
    %299 = vector.extract_strided_slice %293 {offsets = [2, 0], sizes = [1, 32], strides = [1, 1]} : vector<16x32xf32> to vector<1x32xf32>
    %300 = vector.extract_strided_slice %293 {offsets = [6, 0], sizes = [1, 32], strides = [1, 1]} : vector<16x32xf32> to vector<1x32xf32>
    %301 = vector.extract_strided_slice %293 {offsets = [3, 0], sizes = [1, 32], strides = [1, 1]} : vector<16x32xf32> to vector<1x32xf32>
    %302 = vector.extract_strided_slice %293 {offsets = [7, 0], sizes = [1, 32], strides = [1, 1]} : vector<16x32xf32> to vector<1x32xf32>
    %303 = tpu.concatenate %299, %300, %301, %302 in 1 : vector<1x32xf32>, vector<1x32xf32>, vector<1x32xf32>, vector<1x32xf32> -> vector<1x128xf32>
    %304 = vector.extract_strided_slice %293 {offsets = [8, 0], sizes = [1, 32], strides = [1, 1]} : vector<16x32xf32> to vector<1x32xf32>
    %305 = vector.extract_strided_slice %293 {offsets = [12, 0], sizes = [1, 32], strides = [1, 1]} : vector<16x32xf32> to vector<1x32xf32>
    %306 = vector.extract_strided_slice %293 {offsets = [9, 0], sizes = [1, 32], strides = [1, 1]} : vector<16x32xf32> to vector<1x32xf32>
    %307 = vector.extract_strided_slice %293 {offsets = [13, 0], sizes = [1, 32], strides = [1, 1]} : vector<16x32xf32> to vector<1x32xf32>
    %308 = tpu.concatenate %304, %305, %306, %307 in 1 : vector<1x32xf32>, vector<1x32xf32>, vector<1x32xf32>, vector<1x32xf32> -> vector<1x128xf32>
    %309 = vector.extract_strided_slice %293 {offsets = [10, 0], sizes = [1, 32], strides = [1, 1]} : vector<16x32xf32> to vector<1x32xf32>
    %310 = vector.extract_strided_slice %293 {offsets = [14, 0], sizes = [1, 32], strides = [1, 1]} : vector<16x32xf32> to vector<1x32xf32>
    %311 = vector.extract_strided_slice %293 {offsets = [11, 0], sizes = [1, 32], strides = [1, 1]} : vector<16x32xf32> to vector<1x32xf32>
    %312 = vector.extract_strided_slice %293 {offsets = [15, 0], sizes = [1, 32], strides = [1, 1]} : vector<16x32xf32> to vector<1x32xf32>
    %313 = tpu.concatenate %309, %310, %311, %312 in 1 : vector<1x32xf32>, vector<1x32xf32>, vector<1x32xf32>, vector<1x32xf32> -> vector<1x128xf32>
    %314 = tpu.concatenate %298, %303, %308, %313 in 0 : vector<1x128xf32>, vector<1x128xf32>, vector<1x128xf32>, vector<1x128xf32> -> vector<4x128xf32>
    %c0_130 = arith.constant 0 : index
    %c0_131 = arith.constant 0 : index
    %315 = vector.load %arg37[%c0_130, %c0_131] : memref<1x128xf32, #tpu.memory_space<vmem>>, vector<1x128xf32>
    %c0_132 = arith.constant 0 : index
    %c0_133 = arith.constant 0 : index
    %316 = vector.load %arg36[%c0_132, %c0_133] : memref<1x128xf32, #tpu.memory_space<vmem>>, vector<1x128xf32>
    %cst_134 = arith.constant dense<0.000000e+00> : vector<4xf32>
    %317 = vector.multi_reduction <add>, %314, %cst_134 [1] : vector<4x128xf32> to vector<4xf32>
    %318 = vector.shape_cast %317 : vector<4xf32> to vector<4x1xf32>
    %cst_135 = arith.constant 1.280000e+02 : f32
    %319 = vector.broadcast %cst_135 : f32 to vector<4x1xf32>
    %320 = arith.divf %318, %319 : vector<4x1xf32>
    %321 = vector.broadcast %320 : vector<4x1xf32> to vector<4x128xf32>
    %322 = arith.subf %314, %321 : vector<4x128xf32>
    %323 = arith.mulf %322, %322 : vector<4x128xf32>
    %cst_136 = arith.constant dense<0.000000e+00> : vector<4xf32>
    %324 = vector.multi_reduction <add>, %323, %cst_136 [1] : vector<4x128xf32> to vector<4xf32>
    %325 = vector.shape_cast %324 : vector<4xf32> to vector<4x1xf32>
    %cst_137 = arith.constant 1.280000e+02 : f32
    %326 = vector.broadcast %cst_137 : f32 to vector<4x1xf32>
    %327 = arith.divf %325, %326 : vector<4x1xf32>
    %cst_138 = arith.constant 9.99999974E-6 : f32
    %328 = vector.broadcast %cst_138 : f32 to vector<4x1xf32>
    %329 = arith.addf %327, %328 : vector<4x1xf32>
    %330 = math.rsqrt %329 : vector<4x1xf32>
    %331 = vector.broadcast %330 : vector<4x1xf32> to vector<4x128xf32>
    %332 = arith.mulf %322, %331 : vector<4x128xf32>
    %333 = vector.broadcast %315 : vector<1x128xf32> to vector<4x128xf32>
    %334 = arith.mulf %332, %333 : vector<4x128xf32>
    %335 = vector.broadcast %316 : vector<1x128xf32> to vector<4x128xf32>
    %336 = arith.addf %334, %335 : vector<4x128xf32>
    %c0_139 = arith.constant 0 : index
    %c0_140 = arith.constant 0 : index
    %337 = vector.load %arg38[%c0_139, %c0_140] : memref<128x64xbf16, #tpu.memory_space<vmem>>, vector<128x64xbf16>
    %338 = arith.truncf %336 : vector<4x128xf32> to vector<4x128xbf16>
    %cst_141 = arith.constant dense<0.000000e+00> : vector<4x64xf32>
    %339 = tpu.matmul %338, %337, %cst_141 {dimension_numbers = #tpu.dot_dimension_numbers<[1], [0], [0], [1], [0, 0, 1, 1], [], []>} : vector<4x128xbf16>, vector<128x64xbf16>, vector<4x64xf32> -> vector<4x64xf32>
    %c0_142 = arith.constant 0 : index
    %c0_143 = arith.constant 0 : index
    %340 = vector.load %arg40[%c0_142, %c0_143] : memref<1x64xf32, #tpu.memory_space<vmem>>, vector<1x64xf32>
    %c0_144 = arith.constant 0 : index
    %c0_145 = arith.constant 0 : index
    %341 = vector.load %arg39[%c0_144, %c0_145] : memref<1x64xf32, #tpu.memory_space<vmem>>, vector<1x64xf32>
    %cst_146 = arith.constant dense<0.000000e+00> : vector<4xf32>
    %342 = vector.multi_reduction <add>, %339, %cst_146 [1] : vector<4x64xf32> to vector<4xf32>
    %343 = vector.shape_cast %342 : vector<4xf32> to vector<4x1xf32>
    %cst_147 = arith.constant 6.400000e+01 : f32
    %344 = vector.broadcast %cst_147 : f32 to vector<4x1xf32>
    %345 = arith.divf %343, %344 : vector<4x1xf32>
    %346 = vector.broadcast %345 : vector<4x1xf32> to vector<4x64xf32>
    %347 = arith.subf %339, %346 : vector<4x64xf32>
    %348 = arith.mulf %347, %347 : vector<4x64xf32>
    %cst_148 = arith.constant dense<0.000000e+00> : vector<4xf32>
    %349 = vector.multi_reduction <add>, %348, %cst_148 [1] : vector<4x64xf32> to vector<4xf32>
    %350 = vector.shape_cast %349 : vector<4xf32> to vector<4x1xf32>
    %cst_149 = arith.constant 6.400000e+01 : f32
    %351 = vector.broadcast %cst_149 : f32 to vector<4x1xf32>
    %352 = arith.divf %350, %351 : vector<4x1xf32>
    %cst_150 = arith.constant 9.99999974E-6 : f32
    %353 = vector.broadcast %cst_150 : f32 to vector<4x1xf32>
    %354 = arith.addf %352, %353 : vector<4x1xf32>
    %355 = math.rsqrt %354 : vector<4x1xf32>
    %356 = vector.broadcast %355 : vector<4x1xf32> to vector<4x64xf32>
    %357 = arith.mulf %347, %356 : vector<4x64xf32>
    %358 = vector.broadcast %340 : vector<1x64xf32> to vector<4x64xf32>
    %359 = arith.mulf %357, %358 : vector<4x64xf32>
    %360 = vector.broadcast %341 : vector<1x64xf32> to vector<4x64xf32>
    %361 = arith.addf %359, %360 : vector<4x64xf32>
    %c0_151 = arith.constant 0 : index
    %c0_152 = arith.constant 0 : index
    %362 = vector.load %arg50[%c0_151, %c0_152] : memref<64x192xbf16, #tpu.memory_space<vmem>>, vector<64x192xbf16>
    %363 = arith.truncf %361 : vector<4x64xf32> to vector<4x64xbf16>
    %cst_153 = arith.constant dense<0.000000e+00> : vector<4x192xf32>
    %364 = tpu.matmul %363, %362, %cst_153 {dimension_numbers = #tpu.dot_dimension_numbers<[1], [0], [0], [1], [0, 0, 1, 1], [], []>} : vector<4x64xbf16>, vector<64x192xbf16>, vector<4x192xf32> -> vector<4x192xf32>
    %c0_154 = arith.constant 0 : index
    %c0_155 = arith.constant 0 : index
    %365 = vector.load %arg49[%c0_154, %c0_155] : memref<1x192xf32, #tpu.memory_space<vmem>>, vector<1x192xf32>
    %366 = vector.broadcast %365 : vector<1x192xf32> to vector<4x192xf32>
    %367 = arith.addf %364, %366 : vector<4x192xf32>
    %368 = vector.extract_strided_slice %367 {offsets = [0, 0], sizes = [4, 16], strides = [1, 1]} : vector<4x192xf32> to vector<4x16xf32>
    %cst_156 = arith.constant 2.500000e-01 : f32
    %369 = vector.broadcast %cst_156 : f32 to vector<4x16xf32>
    %370 = arith.mulf %368, %369 : vector<4x16xf32>
    %371 = vector.extract_strided_slice %367 {offsets = [0, 64], sizes = [4, 16], strides = [1, 1]} : vector<4x192xf32> to vector<4x16xf32>
    %372 = vector.extract_strided_slice %367 {offsets = [0, 128], sizes = [4, 16], strides = [1, 1]} : vector<4x192xf32> to vector<4x16xf32>
    %373 = arith.truncf %370 : vector<4x16xf32> to vector<4x16xbf16>
    %374 = arith.truncf %371 : vector<4x16xf32> to vector<4x16xbf16>
    %cst_157 = arith.constant dense<0.000000e+00> : vector<4x4xf32>
    %375 = tpu.matmul %373, %374, %cst_157 {dimension_numbers = #tpu.dot_dimension_numbers<[1], [1], [0], [0], [0, 0, 1, 0], [], []>} : vector<4x16xbf16>, vector<4x16xbf16>, vector<4x4xf32> -> vector<4x4xf32>
    %c0_158 = arith.constant 0 : index
    %c0_159 = arith.constant 0 : index
    %c0_160 = arith.constant 0 : index
    %376 = vector.load %arg51[%c0_158, %c0_159, %c0_160] : memref<4x4x4xf32, #tpu.memory_space<vmem>>, vector<1x4x4xf32>
    %377 = vector.shape_cast %376 : vector<1x4x4xf32> to vector<4x4xf32>
    %378 = arith.addf %375, %377 : vector<4x4xf32>
    %cst_161 = arith.constant dense<0xFF800000> : vector<4xf32>
    %379 = vector.multi_reduction <maximumf>, %378, %cst_161 [1] : vector<4x4xf32> to vector<4xf32>
    %380 = vector.shape_cast %379 : vector<4xf32> to vector<4x1xf32>
    %381 = vector.broadcast %380 : vector<4x1xf32> to vector<4x4xf32>
    %382 = arith.subf %378, %381 : vector<4x4xf32>
    %383 = math.exp %382 : vector<4x4xf32>
    %cst_162 = arith.constant dense<0.000000e+00> : vector<4xf32>
    %384 = vector.multi_reduction <add>, %383, %cst_162 [1] : vector<4x4xf32> to vector<4xf32>
    %385 = vector.shape_cast %384 : vector<4xf32> to vector<4x1xf32>
    %386 = tpu.reciprocal %385 {approx = true} : vector<4x1xf32> -> vector<4x1xf32>
    %387 = vector.broadcast %386 : vector<4x1xf32> to vector<4x4xf32>
    %388 = arith.mulf %383, %387 : vector<4x4xf32>
    %389 = arith.truncf %388 : vector<4x4xf32> to vector<4x4xbf16>
    %390 = arith.truncf %372 : vector<4x16xf32> to vector<4x16xbf16>
    %cst_163 = arith.constant dense<0.000000e+00> : vector<4x16xf32>
    %391 = tpu.matmul %389, %390, %cst_163 {dimension_numbers = #tpu.dot_dimension_numbers<[1], [0], [0], [1], [0, 0, 1, 1], [], []>} : vector<4x4xbf16>, vector<4x16xbf16>, vector<4x16xf32> -> vector<4x16xf32>
    %392 = vector.extract_strided_slice %367 {offsets = [0, 16], sizes = [4, 16], strides = [1, 1]} : vector<4x192xf32> to vector<4x16xf32>
    %cst_164 = arith.constant 2.500000e-01 : f32
    %393 = vector.broadcast %cst_164 : f32 to vector<4x16xf32>
    %394 = arith.mulf %392, %393 : vector<4x16xf32>
    %395 = vector.extract_strided_slice %367 {offsets = [0, 80], sizes = [4, 16], strides = [1, 1]} : vector<4x192xf32> to vector<4x16xf32>
    %396 = vector.extract_strided_slice %367 {offsets = [0, 144], sizes = [4, 16], strides = [1, 1]} : vector<4x192xf32> to vector<4x16xf32>
    %397 = arith.truncf %394 : vector<4x16xf32> to vector<4x16xbf16>
    %398 = arith.truncf %395 : vector<4x16xf32> to vector<4x16xbf16>
    %cst_165 = arith.constant dense<0.000000e+00> : vector<4x4xf32>
    %399 = tpu.matmul %397, %398, %cst_165 {dimension_numbers = #tpu.dot_dimension_numbers<[1], [1], [0], [0], [0, 0, 1, 0], [], []>} : vector<4x16xbf16>, vector<4x16xbf16>, vector<4x4xf32> -> vector<4x4xf32>
    %c1_166 = arith.constant 1 : index
    %c0_167 = arith.constant 0 : index
    %c0_168 = arith.constant 0 : index
    %400 = vector.load %arg51[%c1_166, %c0_167, %c0_168] : memref<4x4x4xf32, #tpu.memory_space<vmem>>, vector<1x4x4xf32>
    %401 = vector.shape_cast %400 : vector<1x4x4xf32> to vector<4x4xf32>
    %402 = arith.addf %399, %401 : vector<4x4xf32>
    %cst_169 = arith.constant dense<0xFF800000> : vector<4xf32>
    %403 = vector.multi_reduction <maximumf>, %402, %cst_169 [1] : vector<4x4xf32> to vector<4xf32>
    %404 = vector.shape_cast %403 : vector<4xf32> to vector<4x1xf32>
    %405 = vector.broadcast %404 : vector<4x1xf32> to vector<4x4xf32>
    %406 = arith.subf %402, %405 : vector<4x4xf32>
    %407 = math.exp %406 : vector<4x4xf32>
    %cst_170 = arith.constant dense<0.000000e+00> : vector<4xf32>
    %408 = vector.multi_reduction <add>, %407, %cst_170 [1] : vector<4x4xf32> to vector<4xf32>
    %409 = vector.shape_cast %408 : vector<4xf32> to vector<4x1xf32>
    %410 = tpu.reciprocal %409 {approx = true} : vector<4x1xf32> -> vector<4x1xf32>
    %411 = vector.broadcast %410 : vector<4x1xf32> to vector<4x4xf32>
    %412 = arith.mulf %407, %411 : vector<4x4xf32>
    %413 = arith.truncf %412 : vector<4x4xf32> to vector<4x4xbf16>
    %414 = arith.truncf %396 : vector<4x16xf32> to vector<4x16xbf16>
    %cst_171 = arith.constant dense<0.000000e+00> : vector<4x16xf32>
    %415 = tpu.matmul %413, %414, %cst_171 {dimension_numbers = #tpu.dot_dimension_numbers<[1], [0], [0], [1], [0, 0, 1, 1], [], []>} : vector<4x4xbf16>, vector<4x16xbf16>, vector<4x16xf32> -> vector<4x16xf32>
    %416 = vector.extract_strided_slice %367 {offsets = [0, 32], sizes = [4, 16], strides = [1, 1]} : vector<4x192xf32> to vector<4x16xf32>
    %cst_172 = arith.constant 2.500000e-01 : f32
    %417 = vector.broadcast %cst_172 : f32 to vector<4x16xf32>
    %418 = arith.mulf %416, %417 : vector<4x16xf32>
    %419 = vector.extract_strided_slice %367 {offsets = [0, 96], sizes = [4, 16], strides = [1, 1]} : vector<4x192xf32> to vector<4x16xf32>
    %420 = vector.extract_strided_slice %367 {offsets = [0, 160], sizes = [4, 16], strides = [1, 1]} : vector<4x192xf32> to vector<4x16xf32>
    %421 = arith.truncf %418 : vector<4x16xf32> to vector<4x16xbf16>
    %422 = arith.truncf %419 : vector<4x16xf32> to vector<4x16xbf16>
    %cst_173 = arith.constant dense<0.000000e+00> : vector<4x4xf32>
    %423 = tpu.matmul %421, %422, %cst_173 {dimension_numbers = #tpu.dot_dimension_numbers<[1], [1], [0], [0], [0, 0, 1, 0], [], []>} : vector<4x16xbf16>, vector<4x16xbf16>, vector<4x4xf32> -> vector<4x4xf32>
    %c2 = arith.constant 2 : index
    %c0_174 = arith.constant 0 : index
    %c0_175 = arith.constant 0 : index
    %424 = vector.load %arg51[%c2, %c0_174, %c0_175] : memref<4x4x4xf32, #tpu.memory_space<vmem>>, vector<1x4x4xf32>
    %425 = vector.shape_cast %424 : vector<1x4x4xf32> to vector<4x4xf32>
    %426 = arith.addf %423, %425 : vector<4x4xf32>
    %cst_176 = arith.constant dense<0xFF800000> : vector<4xf32>
    %427 = vector.multi_reduction <maximumf>, %426, %cst_176 [1] : vector<4x4xf32> to vector<4xf32>
    %428 = vector.shape_cast %427 : vector<4xf32> to vector<4x1xf32>
    %429 = vector.broadcast %428 : vector<4x1xf32> to vector<4x4xf32>
    %430 = arith.subf %426, %429 : vector<4x4xf32>
    %431 = math.exp %430 : vector<4x4xf32>
    %cst_177 = arith.constant dense<0.000000e+00> : vector<4xf32>
    %432 = vector.multi_reduction <add>, %431, %cst_177 [1] : vector<4x4xf32> to vector<4xf32>
    %433 = vector.shape_cast %432 : vector<4xf32> to vector<4x1xf32>
    %434 = tpu.reciprocal %433 {approx = true} : vector<4x1xf32> -> vector<4x1xf32>
    %435 = vector.broadcast %434 : vector<4x1xf32> to vector<4x4xf32>
    %436 = arith.mulf %431, %435 : vector<4x4xf32>
    %437 = arith.truncf %436 : vector<4x4xf32> to vector<4x4xbf16>
    %438 = arith.truncf %420 : vector<4x16xf32> to vector<4x16xbf16>
    %cst_178 = arith.constant dense<0.000000e+00> : vector<4x16xf32>
    %439 = tpu.matmul %437, %438, %cst_178 {dimension_numbers = #tpu.dot_dimension_numbers<[1], [0], [0], [1], [0, 0, 1, 1], [], []>} : vector<4x4xbf16>, vector<4x16xbf16>, vector<4x16xf32> -> vector<4x16xf32>
    %440 = vector.extract_strided_slice %367 {offsets = [0, 48], sizes = [4, 16], strides = [1, 1]} : vector<4x192xf32> to vector<4x16xf32>
    %cst_179 = arith.constant 2.500000e-01 : f32
    %441 = vector.broadcast %cst_179 : f32 to vector<4x16xf32>
    %442 = arith.mulf %440, %441 : vector<4x16xf32>
    %443 = vector.extract_strided_slice %367 {offsets = [0, 112], sizes = [4, 16], strides = [1, 1]} : vector<4x192xf32> to vector<4x16xf32>
    %444 = vector.extract_strided_slice %367 {offsets = [0, 176], sizes = [4, 16], strides = [1, 1]} : vector<4x192xf32> to vector<4x16xf32>
    %445 = arith.truncf %442 : vector<4x16xf32> to vector<4x16xbf16>
    %446 = arith.truncf %443 : vector<4x16xf32> to vector<4x16xbf16>
    %cst_180 = arith.constant dense<0.000000e+00> : vector<4x4xf32>
    %447 = tpu.matmul %445, %446, %cst_180 {dimension_numbers = #tpu.dot_dimension_numbers<[1], [1], [0], [0], [0, 0, 1, 0], [], []>} : vector<4x16xbf16>, vector<4x16xbf16>, vector<4x4xf32> -> vector<4x4xf32>
    %c3 = arith.constant 3 : index
    %c0_181 = arith.constant 0 : index
    %c0_182 = arith.constant 0 : index
    %448 = vector.load %arg51[%c3, %c0_181, %c0_182] : memref<4x4x4xf32, #tpu.memory_space<vmem>>, vector<1x4x4xf32>
    %449 = vector.shape_cast %448 : vector<1x4x4xf32> to vector<4x4xf32>
    %450 = arith.addf %447, %449 : vector<4x4xf32>
    %cst_183 = arith.constant dense<0xFF800000> : vector<4xf32>
    %451 = vector.multi_reduction <maximumf>, %450, %cst_183 [1] : vector<4x4xf32> to vector<4xf32>
    %452 = vector.shape_cast %451 : vector<4xf32> to vector<4x1xf32>
    %453 = vector.broadcast %452 : vector<4x1xf32> to vector<4x4xf32>
    %454 = arith.subf %450, %453 : vector<4x4xf32>
    %455 = math.exp %454 : vector<4x4xf32>
    %cst_184 = arith.constant dense<0.000000e+00> : vector<4xf32>
    %456 = vector.multi_reduction <add>, %455, %cst_184 [1] : vector<4x4xf32> to vector<4xf32>
    %457 = vector.shape_cast %456 : vector<4xf32> to vector<4x1xf32>
    %458 = tpu.reciprocal %457 {approx = true} : vector<4x1xf32> -> vector<4x1xf32>
    %459 = vector.broadcast %458 : vector<4x1xf32> to vector<4x4xf32>
    %460 = arith.mulf %455, %459 : vector<4x4xf32>
    %461 = arith.truncf %460 : vector<4x4xf32> to vector<4x4xbf16>
    %462 = arith.truncf %444 : vector<4x16xf32> to vector<4x16xbf16>
    %cst_185 = arith.constant dense<0.000000e+00> : vector<4x16xf32>
    %463 = tpu.matmul %461, %462, %cst_185 {dimension_numbers = #tpu.dot_dimension_numbers<[1], [0], [0], [1], [0, 0, 1, 1], [], []>} : vector<4x4xbf16>, vector<4x16xbf16>, vector<4x16xf32> -> vector<4x16xf32>
    %464 = tpu.concatenate %391, %415, %439, %463 in 1 : vector<4x16xf32>, vector<4x16xf32>, vector<4x16xf32>, vector<4x16xf32> -> vector<4x64xf32>
    %c0_186 = arith.constant 0 : index
    %c0_187 = arith.constant 0 : index
    %465 = vector.load %arg48[%c0_186, %c0_187] : memref<64x64xbf16, #tpu.memory_space<vmem>>, vector<64x64xbf16>
    %466 = arith.truncf %464 : vector<4x64xf32> to vector<4x64xbf16>
    %cst_188 = arith.constant dense<0.000000e+00> : vector<4x64xf32>
    %467 = tpu.matmul %466, %465, %cst_188 {dimension_numbers = #tpu.dot_dimension_numbers<[1], [0], [0], [1], [0, 0, 1, 1], [], []>} : vector<4x64xbf16>, vector<64x64xbf16>, vector<4x64xf32> -> vector<4x64xf32>
    %c0_189 = arith.constant 0 : index
    %c0_190 = arith.constant 0 : index
    %468 = vector.load %arg47[%c0_189, %c0_190] : memref<1x64xf32, #tpu.memory_space<vmem>>, vector<1x64xf32>
    %469 = vector.broadcast %468 : vector<1x64xf32> to vector<4x64xf32>
    %470 = arith.addf %467, %469 : vector<4x64xf32>
    %471 = arith.addf %339, %470 : vector<4x64xf32>
    %c0_191 = arith.constant 0 : index
    %c0_192 = arith.constant 0 : index
    %472 = vector.load %arg42[%c0_191, %c0_192] : memref<1x64xf32, #tpu.memory_space<vmem>>, vector<1x64xf32>
    %c0_193 = arith.constant 0 : index
    %c0_194 = arith.constant 0 : index
    %473 = vector.load %arg41[%c0_193, %c0_194] : memref<1x64xf32, #tpu.memory_space<vmem>>, vector<1x64xf32>
    %cst_195 = arith.constant dense<0.000000e+00> : vector<4xf32>
    %474 = vector.multi_reduction <add>, %471, %cst_195 [1] : vector<4x64xf32> to vector<4xf32>
    %475 = vector.shape_cast %474 : vector<4xf32> to vector<4x1xf32>
    %cst_196 = arith.constant 6.400000e+01 : f32
    %476 = vector.broadcast %cst_196 : f32 to vector<4x1xf32>
    %477 = arith.divf %475, %476 : vector<4x1xf32>
    %478 = vector.broadcast %477 : vector<4x1xf32> to vector<4x64xf32>
    %479 = arith.subf %471, %478 : vector<4x64xf32>
    %480 = arith.mulf %479, %479 : vector<4x64xf32>
    %cst_197 = arith.constant dense<0.000000e+00> : vector<4xf32>
    %481 = vector.multi_reduction <add>, %480, %cst_197 [1] : vector<4x64xf32> to vector<4xf32>
    %482 = vector.shape_cast %481 : vector<4xf32> to vector<4x1xf32>
    %cst_198 = arith.constant 6.400000e+01 : f32
    %483 = vector.broadcast %cst_198 : f32 to vector<4x1xf32>
    %484 = arith.divf %482, %483 : vector<4x1xf32>
    %cst_199 = arith.constant 9.99999974E-6 : f32
    %485 = vector.broadcast %cst_199 : f32 to vector<4x1xf32>
    %486 = arith.addf %484, %485 : vector<4x1xf32>
    %487 = math.rsqrt %486 : vector<4x1xf32>
    %488 = vector.broadcast %487 : vector<4x1xf32> to vector<4x64xf32>
    %489 = arith.mulf %479, %488 : vector<4x64xf32>
    %490 = vector.broadcast %472 : vector<1x64xf32> to vector<4x64xf32>
    %491 = arith.mulf %489, %490 : vector<4x64xf32>
    %492 = vector.broadcast %473 : vector<1x64xf32> to vector<4x64xf32>
    %493 = arith.addf %491, %492 : vector<4x64xf32>
    %c0_200 = arith.constant 0 : index
    %c0_201 = arith.constant 0 : index
    %494 = vector.load %arg45[%c0_200, %c0_201] : memref<64x256xbf16, #tpu.memory_space<vmem>>, vector<64x256xbf16>
    %495 = arith.truncf %493 : vector<4x64xf32> to vector<4x64xbf16>
    %cst_202 = arith.constant dense<0.000000e+00> : vector<4x256xf32>
    %496 = tpu.matmul %495, %494, %cst_202 {dimension_numbers = #tpu.dot_dimension_numbers<[1], [0], [0], [1], [0, 0, 1, 1], [], []>} : vector<4x64xbf16>, vector<64x256xbf16>, vector<4x256xf32> -> vector<4x256xf32>
    %c0_203 = arith.constant 0 : index
    %c0_204 = arith.constant 0 : index
    %497 = vector.load %arg43[%c0_203, %c0_204] : memref<1x256xf32, #tpu.memory_space<vmem>>, vector<1x256xf32>
    %498 = vector.broadcast %497 : vector<1x256xf32> to vector<4x256xf32>
    %499 = arith.addf %496, %498 : vector<4x256xf32>
    %500 = arith.mulf %499, %499 : vector<4x256xf32>
    %501 = arith.mulf %499, %500 : vector<4x256xf32>
    %cst_205 = arith.constant 4.471500e-02 : f32
    %502 = vector.broadcast %cst_205 : f32 to vector<4x256xf32>
    %503 = arith.mulf %502, %501 : vector<4x256xf32>
    %504 = arith.addf %499, %503 : vector<4x256xf32>
    %cst_206 = arith.constant 0.797884583 : f32
    %505 = vector.broadcast %cst_206 : f32 to vector<4x256xf32>
    %506 = arith.mulf %505, %504 : vector<4x256xf32>
    %507 = math.tanh %506 : vector<4x256xf32>
    %cst_207 = arith.constant 1.000000e+00 : f32
    %508 = vector.broadcast %cst_207 : f32 to vector<4x256xf32>
    %509 = arith.addf %508, %507 : vector<4x256xf32>
    %cst_208 = arith.constant 5.000000e-01 : f32
    %510 = vector.broadcast %cst_208 : f32 to vector<4x256xf32>
    %511 = arith.mulf %510, %509 : vector<4x256xf32>
    %512 = arith.mulf %499, %511 : vector<4x256xf32>
    %c0_209 = arith.constant 0 : index
    %c0_210 = arith.constant 0 : index
    %513 = vector.load %arg46[%c0_209, %c0_210] : memref<256x64xbf16, #tpu.memory_space<vmem>>, vector<256x64xbf16>
    %514 = arith.truncf %512 : vector<4x256xf32> to vector<4x256xbf16>
    %cst_211 = arith.constant dense<0.000000e+00> : vector<4x64xf32>
    %515 = tpu.matmul %514, %513, %cst_211 {dimension_numbers = #tpu.dot_dimension_numbers<[1], [0], [0], [1], [0, 0, 1, 1], [], []>} : vector<4x256xbf16>, vector<256x64xbf16>, vector<4x64xf32> -> vector<4x64xf32>
    %516 = arith.addf %471, %515 : vector<4x64xf32>
    %c0_212 = arith.constant 0 : index
    %c0_213 = arith.constant 0 : index
    %517 = vector.load %arg44[%c0_212, %c0_213] : memref<1x64xf32, #tpu.memory_space<vmem>>, vector<1x64xf32>
    %518 = vector.broadcast %517 : vector<1x64xf32> to vector<4x64xf32>
    %519 = arith.addf %516, %518 : vector<4x64xf32>
    %c0_214 = arith.constant 0 : index
    %c0_215 = arith.constant 0 : index
    %520 = vector.load %arg53[%c0_214, %c0_215] : memref<1x64xf32, #tpu.memory_space<vmem>>, vector<1x64xf32>
    %c0_216 = arith.constant 0 : index
    %c0_217 = arith.constant 0 : index
    %521 = vector.load %arg52[%c0_216, %c0_217] : memref<1x64xf32, #tpu.memory_space<vmem>>, vector<1x64xf32>
    %cst_218 = arith.constant dense<0.000000e+00> : vector<4xf32>
    %522 = vector.multi_reduction <add>, %519, %cst_218 [1] : vector<4x64xf32> to vector<4xf32>
    %523 = vector.shape_cast %522 : vector<4xf32> to vector<4x1xf32>
    %cst_219 = arith.constant 6.400000e+01 : f32
    %524 = vector.broadcast %cst_219 : f32 to vector<4x1xf32>
    %525 = arith.divf %523, %524 : vector<4x1xf32>
    %526 = vector.broadcast %525 : vector<4x1xf32> to vector<4x64xf32>
    %527 = arith.subf %519, %526 : vector<4x64xf32>
    %528 = arith.mulf %527, %527 : vector<4x64xf32>
    %cst_220 = arith.constant dense<0.000000e+00> : vector<4xf32>
    %529 = vector.multi_reduction <add>, %528, %cst_220 [1] : vector<4x64xf32> to vector<4xf32>
    %530 = vector.shape_cast %529 : vector<4xf32> to vector<4x1xf32>
    %cst_221 = arith.constant 6.400000e+01 : f32
    %531 = vector.broadcast %cst_221 : f32 to vector<4x1xf32>
    %532 = arith.divf %530, %531 : vector<4x1xf32>
    %cst_222 = arith.constant 9.99999974E-6 : f32
    %533 = vector.broadcast %cst_222 : f32 to vector<4x1xf32>
    %534 = arith.addf %532, %533 : vector<4x1xf32>
    %535 = math.rsqrt %534 : vector<4x1xf32>
    %536 = vector.broadcast %535 : vector<4x1xf32> to vector<4x64xf32>
    %537 = arith.mulf %527, %536 : vector<4x64xf32>
    %538 = vector.broadcast %520 : vector<1x64xf32> to vector<4x64xf32>
    %539 = arith.mulf %537, %538 : vector<4x64xf32>
    %540 = vector.broadcast %521 : vector<1x64xf32> to vector<4x64xf32>
    %541 = arith.addf %539, %540 : vector<4x64xf32>
    %c0_223 = arith.constant 0 : index
    %c0_224 = arith.constant 0 : index
    %542 = vector.load %arg63[%c0_223, %c0_224] : memref<64x192xbf16, #tpu.memory_space<vmem>>, vector<64x192xbf16>
    %543 = arith.truncf %541 : vector<4x64xf32> to vector<4x64xbf16>
    %cst_225 = arith.constant dense<0.000000e+00> : vector<4x192xf32>
    %544 = tpu.matmul %543, %542, %cst_225 {dimension_numbers = #tpu.dot_dimension_numbers<[1], [0], [0], [1], [0, 0, 1, 1], [], []>} : vector<4x64xbf16>, vector<64x192xbf16>, vector<4x192xf32> -> vector<4x192xf32>
    %c0_226 = arith.constant 0 : index
    %c0_227 = arith.constant 0 : index
    %545 = vector.load %arg62[%c0_226, %c0_227] : memref<1x192xf32, #tpu.memory_space<vmem>>, vector<1x192xf32>
    %546 = vector.broadcast %545 : vector<1x192xf32> to vector<4x192xf32>
    %547 = arith.addf %544, %546 : vector<4x192xf32>
    %548 = vector.extract_strided_slice %547 {offsets = [0, 0], sizes = [4, 16], strides = [1, 1]} : vector<4x192xf32> to vector<4x16xf32>
    %cst_228 = arith.constant 2.500000e-01 : f32
    %549 = vector.broadcast %cst_228 : f32 to vector<4x16xf32>
    %550 = arith.mulf %548, %549 : vector<4x16xf32>
    %551 = vector.extract_strided_slice %547 {offsets = [0, 64], sizes = [4, 16], strides = [1, 1]} : vector<4x192xf32> to vector<4x16xf32>
    %552 = vector.extract_strided_slice %547 {offsets = [0, 128], sizes = [4, 16], strides = [1, 1]} : vector<4x192xf32> to vector<4x16xf32>
    %553 = arith.truncf %550 : vector<4x16xf32> to vector<4x16xbf16>
    %554 = arith.truncf %551 : vector<4x16xf32> to vector<4x16xbf16>
    %cst_229 = arith.constant dense<0.000000e+00> : vector<4x4xf32>
    %555 = tpu.matmul %553, %554, %cst_229 {dimension_numbers = #tpu.dot_dimension_numbers<[1], [1], [0], [0], [0, 0, 1, 0], [], []>} : vector<4x16xbf16>, vector<4x16xbf16>, vector<4x4xf32> -> vector<4x4xf32>
    %c0_230 = arith.constant 0 : index
    %c0_231 = arith.constant 0 : index
    %c0_232 = arith.constant 0 : index
    %556 = vector.load %arg64[%c0_230, %c0_231, %c0_232] : memref<4x4x4xf32, #tpu.memory_space<vmem>>, vector<1x4x4xf32>
    %557 = vector.shape_cast %556 : vector<1x4x4xf32> to vector<4x4xf32>
    %558 = arith.addf %555, %557 : vector<4x4xf32>
    %cst_233 = arith.constant dense<0xFF800000> : vector<4xf32>
    %559 = vector.multi_reduction <maximumf>, %558, %cst_233 [1] : vector<4x4xf32> to vector<4xf32>
    %560 = vector.shape_cast %559 : vector<4xf32> to vector<4x1xf32>
    %561 = vector.broadcast %560 : vector<4x1xf32> to vector<4x4xf32>
    %562 = arith.subf %558, %561 : vector<4x4xf32>
    %563 = math.exp %562 : vector<4x4xf32>
    %cst_234 = arith.constant dense<0.000000e+00> : vector<4xf32>
    %564 = vector.multi_reduction <add>, %563, %cst_234 [1] : vector<4x4xf32> to vector<4xf32>
    %565 = vector.shape_cast %564 : vector<4xf32> to vector<4x1xf32>
    %566 = tpu.reciprocal %565 {approx = true} : vector<4x1xf32> -> vector<4x1xf32>
    %567 = vector.broadcast %566 : vector<4x1xf32> to vector<4x4xf32>
    %568 = arith.mulf %563, %567 : vector<4x4xf32>
    %569 = arith.truncf %568 : vector<4x4xf32> to vector<4x4xbf16>
    %570 = arith.truncf %552 : vector<4x16xf32> to vector<4x16xbf16>
    %cst_235 = arith.constant dense<0.000000e+00> : vector<4x16xf32>
    %571 = tpu.matmul %569, %570, %cst_235 {dimension_numbers = #tpu.dot_dimension_numbers<[1], [0], [0], [1], [0, 0, 1, 1], [], []>} : vector<4x4xbf16>, vector<4x16xbf16>, vector<4x16xf32> -> vector<4x16xf32>
    %572 = vector.extract_strided_slice %547 {offsets = [0, 16], sizes = [4, 16], strides = [1, 1]} : vector<4x192xf32> to vector<4x16xf32>
    %cst_236 = arith.constant 2.500000e-01 : f32
    %573 = vector.broadcast %cst_236 : f32 to vector<4x16xf32>
    %574 = arith.mulf %572, %573 : vector<4x16xf32>
    %575 = vector.extract_strided_slice %547 {offsets = [0, 80], sizes = [4, 16], strides = [1, 1]} : vector<4x192xf32> to vector<4x16xf32>
    %576 = vector.extract_strided_slice %547 {offsets = [0, 144], sizes = [4, 16], strides = [1, 1]} : vector<4x192xf32> to vector<4x16xf32>
    %577 = arith.truncf %574 : vector<4x16xf32> to vector<4x16xbf16>
    %578 = arith.truncf %575 : vector<4x16xf32> to vector<4x16xbf16>
    %cst_237 = arith.constant dense<0.000000e+00> : vector<4x4xf32>
    %579 = tpu.matmul %577, %578, %cst_237 {dimension_numbers = #tpu.dot_dimension_numbers<[1], [1], [0], [0], [0, 0, 1, 0], [], []>} : vector<4x16xbf16>, vector<4x16xbf16>, vector<4x4xf32> -> vector<4x4xf32>
    %c1_238 = arith.constant 1 : index
    %c0_239 = arith.constant 0 : index
    %c0_240 = arith.constant 0 : index
    %580 = vector.load %arg64[%c1_238, %c0_239, %c0_240] : memref<4x4x4xf32, #tpu.memory_space<vmem>>, vector<1x4x4xf32>
    %581 = vector.shape_cast %580 : vector<1x4x4xf32> to vector<4x4xf32>
    %582 = arith.addf %579, %581 : vector<4x4xf32>
    %cst_241 = arith.constant dense<0xFF800000> : vector<4xf32>
    %583 = vector.multi_reduction <maximumf>, %582, %cst_241 [1] : vector<4x4xf32> to vector<4xf32>
    %584 = vector.shape_cast %583 : vector<4xf32> to vector<4x1xf32>
    %585 = vector.broadcast %584 : vector<4x1xf32> to vector<4x4xf32>
    %586 = arith.subf %582, %585 : vector<4x4xf32>
    %587 = math.exp %586 : vector<4x4xf32>
    %cst_242 = arith.constant dense<0.000000e+00> : vector<4xf32>
    %588 = vector.multi_reduction <add>, %587, %cst_242 [1] : vector<4x4xf32> to vector<4xf32>
    %589 = vector.shape_cast %588 : vector<4xf32> to vector<4x1xf32>
    %590 = tpu.reciprocal %589 {approx = true} : vector<4x1xf32> -> vector<4x1xf32>
    %591 = vector.broadcast %590 : vector<4x1xf32> to vector<4x4xf32>
    %592 = arith.mulf %587, %591 : vector<4x4xf32>
    %593 = arith.truncf %592 : vector<4x4xf32> to vector<4x4xbf16>
    %594 = arith.truncf %576 : vector<4x16xf32> to vector<4x16xbf16>
    %cst_243 = arith.constant dense<0.000000e+00> : vector<4x16xf32>
    %595 = tpu.matmul %593, %594, %cst_243 {dimension_numbers = #tpu.dot_dimension_numbers<[1], [0], [0], [1], [0, 0, 1, 1], [], []>} : vector<4x4xbf16>, vector<4x16xbf16>, vector<4x16xf32> -> vector<4x16xf32>
    %596 = vector.extract_strided_slice %547 {offsets = [0, 32], sizes = [4, 16], strides = [1, 1]} : vector<4x192xf32> to vector<4x16xf32>
    %cst_244 = arith.constant 2.500000e-01 : f32
    %597 = vector.broadcast %cst_244 : f32 to vector<4x16xf32>
    %598 = arith.mulf %596, %597 : vector<4x16xf32>
    %599 = vector.extract_strided_slice %547 {offsets = [0, 96], sizes = [4, 16], strides = [1, 1]} : vector<4x192xf32> to vector<4x16xf32>
    %600 = vector.extract_strided_slice %547 {offsets = [0, 160], sizes = [4, 16], strides = [1, 1]} : vector<4x192xf32> to vector<4x16xf32>
    %601 = arith.truncf %598 : vector<4x16xf32> to vector<4x16xbf16>
    %602 = arith.truncf %599 : vector<4x16xf32> to vector<4x16xbf16>
    %cst_245 = arith.constant dense<0.000000e+00> : vector<4x4xf32>
    %603 = tpu.matmul %601, %602, %cst_245 {dimension_numbers = #tpu.dot_dimension_numbers<[1], [1], [0], [0], [0, 0, 1, 0], [], []>} : vector<4x16xbf16>, vector<4x16xbf16>, vector<4x4xf32> -> vector<4x4xf32>
    %c2_246 = arith.constant 2 : index
    %c0_247 = arith.constant 0 : index
    %c0_248 = arith.constant 0 : index
    %604 = vector.load %arg64[%c2_246, %c0_247, %c0_248] : memref<4x4x4xf32, #tpu.memory_space<vmem>>, vector<1x4x4xf32>
    %605 = vector.shape_cast %604 : vector<1x4x4xf32> to vector<4x4xf32>
    %606 = arith.addf %603, %605 : vector<4x4xf32>
    %cst_249 = arith.constant dense<0xFF800000> : vector<4xf32>
    %607 = vector.multi_reduction <maximumf>, %606, %cst_249 [1] : vector<4x4xf32> to vector<4xf32>
    %608 = vector.shape_cast %607 : vector<4xf32> to vector<4x1xf32>
    %609 = vector.broadcast %608 : vector<4x1xf32> to vector<4x4xf32>
    %610 = arith.subf %606, %609 : vector<4x4xf32>
    %611 = math.exp %610 : vector<4x4xf32>
    %cst_250 = arith.constant dense<0.000000e+00> : vector<4xf32>
    %612 = vector.multi_reduction <add>, %611, %cst_250 [1] : vector<4x4xf32> to vector<4xf32>
    %613 = vector.shape_cast %612 : vector<4xf32> to vector<4x1xf32>
    %614 = tpu.reciprocal %613 {approx = true} : vector<4x1xf32> -> vector<4x1xf32>
    %615 = vector.broadcast %614 : vector<4x1xf32> to vector<4x4xf32>
    %616 = arith.mulf %611, %615 : vector<4x4xf32>
    %617 = arith.truncf %616 : vector<4x4xf32> to vector<4x4xbf16>
    %618 = arith.truncf %600 : vector<4x16xf32> to vector<4x16xbf16>
    %cst_251 = arith.constant dense<0.000000e+00> : vector<4x16xf32>
    %619 = tpu.matmul %617, %618, %cst_251 {dimension_numbers = #tpu.dot_dimension_numbers<[1], [0], [0], [1], [0, 0, 1, 1], [], []>} : vector<4x4xbf16>, vector<4x16xbf16>, vector<4x16xf32> -> vector<4x16xf32>
    %620 = vector.extract_strided_slice %547 {offsets = [0, 48], sizes = [4, 16], strides = [1, 1]} : vector<4x192xf32> to vector<4x16xf32>
    %cst_252 = arith.constant 2.500000e-01 : f32
    %621 = vector.broadcast %cst_252 : f32 to vector<4x16xf32>
    %622 = arith.mulf %620, %621 : vector<4x16xf32>
    %623 = vector.extract_strided_slice %547 {offsets = [0, 112], sizes = [4, 16], strides = [1, 1]} : vector<4x192xf32> to vector<4x16xf32>
    %624 = vector.extract_strided_slice %547 {offsets = [0, 176], sizes = [4, 16], strides = [1, 1]} : vector<4x192xf32> to vector<4x16xf32>
    %625 = arith.truncf %622 : vector<4x16xf32> to vector<4x16xbf16>
    %626 = arith.truncf %623 : vector<4x16xf32> to vector<4x16xbf16>
    %cst_253 = arith.constant dense<0.000000e+00> : vector<4x4xf32>
    %627 = tpu.matmul %625, %626, %cst_253 {dimension_numbers = #tpu.dot_dimension_numbers<[1], [1], [0], [0], [0, 0, 1, 0], [], []>} : vector<4x16xbf16>, vector<4x16xbf16>, vector<4x4xf32> -> vector<4x4xf32>
    %c3_254 = arith.constant 3 : index
    %c0_255 = arith.constant 0 : index
    %c0_256 = arith.constant 0 : index
    %628 = vector.load %arg64[%c3_254, %c0_255, %c0_256] : memref<4x4x4xf32, #tpu.memory_space<vmem>>, vector<1x4x4xf32>
    %629 = vector.shape_cast %628 : vector<1x4x4xf32> to vector<4x4xf32>
    %630 = arith.addf %627, %629 : vector<4x4xf32>
    %cst_257 = arith.constant dense<0xFF800000> : vector<4xf32>
    %631 = vector.multi_reduction <maximumf>, %630, %cst_257 [1] : vector<4x4xf32> to vector<4xf32>
    %632 = vector.shape_cast %631 : vector<4xf32> to vector<4x1xf32>
    %633 = vector.broadcast %632 : vector<4x1xf32> to vector<4x4xf32>
    %634 = arith.subf %630, %633 : vector<4x4xf32>
    %635 = math.exp %634 : vector<4x4xf32>
    %cst_258 = arith.constant dense<0.000000e+00> : vector<4xf32>
    %636 = vector.multi_reduction <add>, %635, %cst_258 [1] : vector<4x4xf32> to vector<4xf32>
    %637 = vector.shape_cast %636 : vector<4xf32> to vector<4x1xf32>
    %638 = tpu.reciprocal %637 {approx = true} : vector<4x1xf32> -> vector<4x1xf32>
    %639 = vector.broadcast %638 : vector<4x1xf32> to vector<4x4xf32>
    %640 = arith.mulf %635, %639 : vector<4x4xf32>
    %641 = arith.truncf %640 : vector<4x4xf32> to vector<4x4xbf16>
    %642 = arith.truncf %624 : vector<4x16xf32> to vector<4x16xbf16>
    %cst_259 = arith.constant dense<0.000000e+00> : vector<4x16xf32>
    %643 = tpu.matmul %641, %642, %cst_259 {dimension_numbers = #tpu.dot_dimension_numbers<[1], [0], [0], [1], [0, 0, 1, 1], [], []>} : vector<4x4xbf16>, vector<4x16xbf16>, vector<4x16xf32> -> vector<4x16xf32>
    %644 = tpu.concatenate %571, %595, %619, %643 in 1 : vector<4x16xf32>, vector<4x16xf32>, vector<4x16xf32>, vector<4x16xf32> -> vector<4x64xf32>
    %c0_260 = arith.constant 0 : index
    %c0_261 = arith.constant 0 : index
    %645 = vector.load %arg61[%c0_260, %c0_261] : memref<64x64xbf16, #tpu.memory_space<vmem>>, vector<64x64xbf16>
    %646 = arith.truncf %644 : vector<4x64xf32> to vector<4x64xbf16>
    %cst_262 = arith.constant dense<0.000000e+00> : vector<4x64xf32>
    %647 = tpu.matmul %646, %645, %cst_262 {dimension_numbers = #tpu.dot_dimension_numbers<[1], [0], [0], [1], [0, 0, 1, 1], [], []>} : vector<4x64xbf16>, vector<64x64xbf16>, vector<4x64xf32> -> vector<4x64xf32>
    %c0_263 = arith.constant 0 : index
    %c0_264 = arith.constant 0 : index
    %648 = vector.load %arg60[%c0_263, %c0_264] : memref<1x64xf32, #tpu.memory_space<vmem>>, vector<1x64xf32>
    %649 = vector.broadcast %648 : vector<1x64xf32> to vector<4x64xf32>
    %650 = arith.addf %647, %649 : vector<4x64xf32>
    %651 = arith.addf %519, %650 : vector<4x64xf32>
    %c0_265 = arith.constant 0 : index
    %c0_266 = arith.constant 0 : index
    %652 = vector.load %arg55[%c0_265, %c0_266] : memref<1x64xf32, #tpu.memory_space<vmem>>, vector<1x64xf32>
    %c0_267 = arith.constant 0 : index
    %c0_268 = arith.constant 0 : index
    %653 = vector.load %arg54[%c0_267, %c0_268] : memref<1x64xf32, #tpu.memory_space<vmem>>, vector<1x64xf32>
    %cst_269 = arith.constant dense<0.000000e+00> : vector<4xf32>
    %654 = vector.multi_reduction <add>, %651, %cst_269 [1] : vector<4x64xf32> to vector<4xf32>
    %655 = vector.shape_cast %654 : vector<4xf32> to vector<4x1xf32>
    %cst_270 = arith.constant 6.400000e+01 : f32
    %656 = vector.broadcast %cst_270 : f32 to vector<4x1xf32>
    %657 = arith.divf %655, %656 : vector<4x1xf32>
    %658 = vector.broadcast %657 : vector<4x1xf32> to vector<4x64xf32>
    %659 = arith.subf %651, %658 : vector<4x64xf32>
    %660 = arith.mulf %659, %659 : vector<4x64xf32>
    %cst_271 = arith.constant dense<0.000000e+00> : vector<4xf32>
    %661 = vector.multi_reduction <add>, %660, %cst_271 [1] : vector<4x64xf32> to vector<4xf32>
    %662 = vector.shape_cast %661 : vector<4xf32> to vector<4x1xf32>
    %cst_272 = arith.constant 6.400000e+01 : f32
    %663 = vector.broadcast %cst_272 : f32 to vector<4x1xf32>
    %664 = arith.divf %662, %663 : vector<4x1xf32>
    %cst_273 = arith.constant 9.99999974E-6 : f32
    %665 = vector.broadcast %cst_273 : f32 to vector<4x1xf32>
    %666 = arith.addf %664, %665 : vector<4x1xf32>
    %667 = math.rsqrt %666 : vector<4x1xf32>
    %668 = vector.broadcast %667 : vector<4x1xf32> to vector<4x64xf32>
    %669 = arith.mulf %659, %668 : vector<4x64xf32>
    %670 = vector.broadcast %652 : vector<1x64xf32> to vector<4x64xf32>
    %671 = arith.mulf %669, %670 : vector<4x64xf32>
    %672 = vector.broadcast %653 : vector<1x64xf32> to vector<4x64xf32>
    %673 = arith.addf %671, %672 : vector<4x64xf32>
    %c0_274 = arith.constant 0 : index
    %c0_275 = arith.constant 0 : index
    %674 = vector.load %arg58[%c0_274, %c0_275] : memref<64x256xbf16, #tpu.memory_space<vmem>>, vector<64x256xbf16>
    %675 = arith.truncf %673 : vector<4x64xf32> to vector<4x64xbf16>
    %cst_276 = arith.constant dense<0.000000e+00> : vector<4x256xf32>
    %676 = tpu.matmul %675, %674, %cst_276 {dimension_numbers = #tpu.dot_dimension_numbers<[1], [0], [0], [1], [0, 0, 1, 1], [], []>} : vector<4x64xbf16>, vector<64x256xbf16>, vector<4x256xf32> -> vector<4x256xf32>
    %c0_277 = arith.constant 0 : index
    %c0_278 = arith.constant 0 : index
    %677 = vector.load %arg56[%c0_277, %c0_278] : memref<1x256xf32, #tpu.memory_space<vmem>>, vector<1x256xf32>
    %678 = vector.broadcast %677 : vector<1x256xf32> to vector<4x256xf32>
    %679 = arith.addf %676, %678 : vector<4x256xf32>
    %680 = arith.mulf %679, %679 : vector<4x256xf32>
    %681 = arith.mulf %679, %680 : vector<4x256xf32>
    %cst_279 = arith.constant 4.471500e-02 : f32
    %682 = vector.broadcast %cst_279 : f32 to vector<4x256xf32>
    %683 = arith.mulf %682, %681 : vector<4x256xf32>
    %684 = arith.addf %679, %683 : vector<4x256xf32>
    %cst_280 = arith.constant 0.797884583 : f32
    %685 = vector.broadcast %cst_280 : f32 to vector<4x256xf32>
    %686 = arith.mulf %685, %684 : vector<4x256xf32>
    %687 = math.tanh %686 : vector<4x256xf32>
    %cst_281 = arith.constant 1.000000e+00 : f32
    %688 = vector.broadcast %cst_281 : f32 to vector<4x256xf32>
    %689 = arith.addf %688, %687 : vector<4x256xf32>
    %cst_282 = arith.constant 5.000000e-01 : f32
    %690 = vector.broadcast %cst_282 : f32 to vector<4x256xf32>
    %691 = arith.mulf %690, %689 : vector<4x256xf32>
    %692 = arith.mulf %679, %691 : vector<4x256xf32>
    %c0_283 = arith.constant 0 : index
    %c0_284 = arith.constant 0 : index
    %693 = vector.load %arg59[%c0_283, %c0_284] : memref<256x64xbf16, #tpu.memory_space<vmem>>, vector<256x64xbf16>
    %694 = arith.truncf %692 : vector<4x256xf32> to vector<4x256xbf16>
    %cst_285 = arith.constant dense<0.000000e+00> : vector<4x64xf32>
    %695 = tpu.matmul %694, %693, %cst_285 {dimension_numbers = #tpu.dot_dimension_numbers<[1], [0], [0], [1], [0, 0, 1, 1], [], []>} : vector<4x256xbf16>, vector<256x64xbf16>, vector<4x64xf32> -> vector<4x64xf32>
    %696 = arith.addf %651, %695 : vector<4x64xf32>
    %c0_286 = arith.constant 0 : index
    %c0_287 = arith.constant 0 : index
    %697 = vector.load %arg57[%c0_286, %c0_287] : memref<1x64xf32, #tpu.memory_space<vmem>>, vector<1x64xf32>
    %698 = vector.broadcast %697 : vector<1x64xf32> to vector<4x64xf32>
    %699 = arith.addf %696, %698 : vector<4x64xf32>
    %c0_288 = arith.constant 0 : index
    %c0_289 = arith.constant 0 : index
    %700 = vector.load %arg5[%c0_288, %c0_289] : memref<1x64xf32, #tpu.memory_space<vmem>>, vector<1x64xf32>
    %c0_290 = arith.constant 0 : index
    %c0_291 = arith.constant 0 : index
    %701 = vector.load %arg4[%c0_290, %c0_291] : memref<1x64xf32, #tpu.memory_space<vmem>>, vector<1x64xf32>
    %cst_292 = arith.constant dense<0.000000e+00> : vector<4xf32>
    %702 = vector.multi_reduction <add>, %699, %cst_292 [1] : vector<4x64xf32> to vector<4xf32>
    %703 = vector.shape_cast %702 : vector<4xf32> to vector<4x1xf32>
    %cst_293 = arith.constant 6.400000e+01 : f32
    %704 = vector.broadcast %cst_293 : f32 to vector<4x1xf32>
    %705 = arith.divf %703, %704 : vector<4x1xf32>
    %706 = vector.broadcast %705 : vector<4x1xf32> to vector<4x64xf32>
    %707 = arith.subf %699, %706 : vector<4x64xf32>
    %708 = arith.mulf %707, %707 : vector<4x64xf32>
    %cst_294 = arith.constant dense<0.000000e+00> : vector<4xf32>
    %709 = vector.multi_reduction <add>, %708, %cst_294 [1] : vector<4x64xf32> to vector<4xf32>
    %710 = vector.shape_cast %709 : vector<4xf32> to vector<4x1xf32>
    %cst_295 = arith.constant 6.400000e+01 : f32
    %711 = vector.broadcast %cst_295 : f32 to vector<4x1xf32>
    %712 = arith.divf %710, %711 : vector<4x1xf32>
    %cst_296 = arith.constant 9.99999974E-6 : f32
    %713 = vector.broadcast %cst_296 : f32 to vector<4x1xf32>
    %714 = arith.addf %712, %713 : vector<4x1xf32>
    %715 = math.rsqrt %714 : vector<4x1xf32>
    %716 = vector.broadcast %715 : vector<4x1xf32> to vector<4x64xf32>
    %717 = arith.mulf %707, %716 : vector<4x64xf32>
    %718 = vector.broadcast %700 : vector<1x64xf32> to vector<4x64xf32>
    %719 = arith.mulf %717, %718 : vector<4x64xf32>
    %720 = vector.broadcast %701 : vector<1x64xf32> to vector<4x64xf32>
    %721 = arith.addf %719, %720 : vector<4x64xf32>
    %cst_297 = arith.constant dense<0.000000e+00> : vector<64xf32>
    %722 = vector.multi_reduction <add>, %721, %cst_297 [0] : vector<4x64xf32> to vector<64xf32>
    %723 = vector.shape_cast %722 : vector<64xf32> to vector<1x64xf32>
    %cst_298 = arith.constant 4.000000e+00 : f32
    %724 = vector.broadcast %cst_298 : f32 to vector<1x64xf32>
    %725 = arith.divf %723, %724 : vector<1x64xf32>
    %c0_299 = arith.constant 0 : index
    %c0_300 = arith.constant 0 : index
    %726 = vector.load %arg3[%c0_299, %c0_300] : memref<64x128xbf16, #tpu.memory_space<vmem>>, vector<64x128xbf16>
    %727 = arith.truncf %725 : vector<1x64xf32> to vector<1x64xbf16>
    %cst_301 = arith.constant dense<0.000000e+00> : vector<1x128xf32>
    %728 = tpu.matmul %727, %726, %cst_301 {dimension_numbers = #tpu.dot_dimension_numbers<[1], [0], [0], [1], [0, 0, 1, 1], [], []>} : vector<1x64xbf16>, vector<64x128xbf16>, vector<1x128xf32> -> vector<1x128xf32>
    %c0_302 = arith.constant 0 : index
    %c0_303 = arith.constant 0 : index
    %729 = vector.load %arg2[%c0_302, %c0_303] : memref<1x128xf32, #tpu.memory_space<vmem>>, vector<1x128xf32>
    %730 = arith.addf %728, %729 : vector<1x128xf32>
    %c0_304 = arith.constant 0 : index
    %c0_305 = arith.constant 0 : index
    %c0_306 = arith.constant 0 : index
    %731 = vector.load %arg65[%c0_304, %c0_305, %c0_306] : memref<1x1x128xf32, #tpu.memory_space<vmem>>, vector<1x1x128xf32>
    %732 = vector.shape_cast %731 : vector<1x1x128xf32> to vector<1x128xf32>
    %733 = vector.shape_cast %730 : vector<1x128xf32> to vector<1x1x128xf32>
    tpu.vector_store %arg65[%c0_304, %c0_305, %c0_306], %733 {strides = array<i32>} : memref<1x1x128xf32, #tpu.memory_space<vmem>>, vector<1x1x128xf32>,
    return
  }
  func.func @transform_0(%arg0: i32) -> (i32, i32, i32) {
    %c0_i32 = arith.constant 0 : i32
    %c0_i32_0 = arith.constant 0 : i32
    %c0_i32_1 = arith.constant 0 : i32
    return %arg0, %c0_i32, %c0_i32_0 : i32, i32, i32
  }
  func.func @transform_1(%arg0: i32) -> (i32, i32) {
    %c0_i32 = arith.constant 0 : i32
    %c0_i32_0 = arith.constant 0 : i32
    %c0_i32_1 = arith.constant 0 : i32
    return %c0_i32, %c0_i32_0 : i32, i32
  }
  func.func @transform_2(%arg0: i32) -> (i32, i32) {
    %c0_i32 = arith.constant 0 : i32
    %c0_i32_0 = arith.constant 0 : i32
    %c0_i32_1 = arith.constant 0 : i32
    return %c0_i32, %c0_i32_0 : i32, i32
  }
  func.func @transform_3(%arg0: i32) -> (i32, i32) {
    %c0_i32 = arith.constant 0 : i32
    %c0_i32_0 = arith.constant 0 : i32
    %c0_i32_1 = arith.constant 0 : i32
    return %c0_i32, %c0_i32_0 : i32, i32
  }
  func.func @transform_4(%arg0: i32) -> (i32, i32) {
    %c0_i32 = arith.constant 0 : i32
    %c0_i32_0 = arith.constant 0 : i32
    %c0_i32_1 = arith.constant 0 : i32
    return %c0_i32, %c0_i32_0 : i32, i32
  }
  func.func @transform_5(%arg0: i32) -> (i32, i32) {
    %c0_i32 = arith.constant 0 : i32
    %c0_i32_0 = arith.constant 0 : i32
    %c0_i32_1 = arith.constant 0 : i32
    return %c0_i32, %c0_i32_0 : i32, i32
  }
  func.func @transform_6(%arg0: i32) -> (i32, i32) {
    %c0_i32 = arith.constant 0 : i32
    %c0_i32_0 = arith.constant 0 : i32
    %c0_i32_1 = arith.constant 0 : i32
    return %c0_i32, %c0_i32_0 : i32, i32
  }
  func.func @transform_7(%arg0: i32) -> (i32, i32) {
    %c0_i32 = arith.constant 0 : i32
    %c0_i32_0 = arith.constant 0 : i32
    %c0_i32_1 = arith.constant 0 : i32
    return %c0_i32, %c0_i32_0 : i32, i32
  }
  func.func @transform_8(%arg0: i32) -> (i32, i32) {
    %c0_i32 = arith.constant 0 : i32
    %c0_i32_0 = arith.constant 0 : i32
    %c0_i32_1 = arith.constant 0 : i32
    return %c0_i32, %c0_i32_0 : i32, i32
  }
  func.func @transform_9(%arg0: i32) -> (i32, i32) {
    %c0_i32 = arith.constant 0 : i32
    %c0_i32_0 = arith.constant 0 : i32
    %c0_i32_1 = arith.constant 0 : i32
    return %c0_i32, %c0_i32_0 : i32, i32
  }
  func.func @transform_10(%arg0: i32) -> (i32, i32) {
    %c0_i32 = arith.constant 0 : i32
    %c0_i32_0 = arith.constant 0 : i32
    %c0_i32_1 = arith.constant 0 : i32
    return %c0_i32, %c0_i32_0 : i32, i32
  }
  func.func @transform_11(%arg0: i32) -> (i32, i32) {
    %c0_i32 = arith.constant 0 : i32
    %c0_i32_0 = arith.constant 0 : i32
    %c0_i32_1 = arith.constant 0 : i32
    return %c0_i32, %c0_i32_0 : i32, i32
  }
  func.func @transform_12(%arg0: i32) -> (i32, i32) {
    %c0_i32 = arith.constant 0 : i32
    %c0_i32_0 = arith.constant 0 : i32
    %c0_i32_1 = arith.constant 0 : i32
    return %c0_i32, %c0_i32_0 : i32, i32
  }
  func.func @transform_13(%arg0: i32) -> (i32, i32) {
    %c0_i32 = arith.constant 0 : i32
    %c0_i32_0 = arith.constant 0 : i32
    %c0_i32_1 = arith.constant 0 : i32
    return %c0_i32, %c0_i32_0 : i32, i32
  }
  func.func @transform_14(%arg0: i32) -> (i32, i32) {
    %c0_i32 = arith.constant 0 : i32
    %c0_i32_0 = arith.constant 0 : i32
    %c0_i32_1 = arith.constant 0 : i32
    return %c0_i32, %c0_i32_0 : i32, i32
  }
  func.func @transform_15(%arg0: i32) -> (i32, i32) {
    %c0_i32 = arith.constant 0 : i32
    %c0_i32_0 = arith.constant 0 : i32
    %c0_i32_1 = arith.constant 0 : i32
    return %c0_i32, %c0_i32_0 : i32, i32
  }
  func.func @transform_16(%arg0: i32) -> (i32, i32) {
    %c0_i32 = arith.constant 0 : i32
    %c0_i32_0 = arith.constant 0 : i32
    %c0_i32_1 = arith.constant 0 : i32
    return %c0_i32, %c0_i32_0 : i32, i32
  }
  func.func @transform_17(%arg0: i32) -> (i32, i32) {
    %c0_i32 = arith.constant 0 : i32
    %c0_i32_0 = arith.constant 0 : i32
    %c0_i32_1 = arith.constant 0 : i32
    return %c0_i32, %c0_i32_0 : i32, i32
  }
  func.func @transform_18(%arg0: i32) -> (i32, i32) {
    %c0_i32 = arith.constant 0 : i32
    %c0_i32_0 = arith.constant 0 : i32
    %c0_i32_1 = arith.constant 0 : i32
    return %c0_i32, %c0_i32_0 : i32, i32
  }
  func.func @transform_19(%arg0: i32) -> (i32, i32) {
    %c0_i32 = arith.constant 0 : i32
    %c0_i32_0 = arith.constant 0 : i32
    %c0_i32_1 = arith.constant 0 : i32
    return %c0_i32, %c0_i32_0 : i32, i32
  }
  func.func @transform_20(%arg0: i32) -> (i32, i32) {
    %c0_i32 = arith.constant 0 : i32
    %c0_i32_0 = arith.constant 0 : i32
    %c0_i32_1 = arith.constant 0 : i32
    return %c0_i32, %c0_i32_0 : i32, i32
  }
  func.func @transform_21(%arg0: i32) -> (i32, i32, i32) {
    %c0_i32 = arith.constant 0 : i32
    %c0_i32_0 = arith.constant 0 : i32
    %c0_i32_1 = arith.constant 0 : i32
    %c0_i32_2 = arith.constant 0 : i32
    return %c0_i32, %c0_i32_0, %c0_i32_1 : i32, i32, i32
  }
  func.func @transform_22(%arg0: i32) -> (i32, i32) {
    %c0_i32 = arith.constant 0 : i32
    %c0_i32_0 = arith.constant 0 : i32
    %c0_i32_1 = arith.constant 0 : i32
    return %c0_i32, %c0_i32_0 : i32, i32
  }
  func.func @transform_23(%arg0: i32) -> (i32, i32) {
    %c0_i32 = arith.constant 0 : i32
    %c0_i32_0 = arith.constant 0 : i32
    %c0_i32_1 = arith.constant 0 : i32
    return %c0_i32, %c0_i32_0 : i32, i32
  }
  func.func @transform_24(%arg0: i32) -> (i32, i32) {
    %c0_i32 = arith.constant 0 : i32
    %c0_i32_0 = arith.constant 0 : i32
    %c0_i32_1 = arith.constant 0 : i32
    return %c0_i32, %c0_i32_0 : i32, i32
  }
  func.func @transform_25(%arg0: i32) -> (i32, i32) {
    %c0_i32 = arith.constant 0 : i32
    %c0_i32_0 = arith.constant 0 : i32
    %c0_i32_1 = arith.constant 0 : i32
    return %c0_i32, %c0_i32_0 : i32, i32
  }
  func.func @transform_26(%arg0: i32) -> (i32, i32) {
    %c0_i32 = arith.constant 0 : i32
    %c0_i32_0 = arith.constant 0 : i32
    %c0_i32_1 = arith.constant 0 : i32
    return %c0_i32, %c0_i32_0 : i32, i32
  }
  func.func @transform_27(%arg0: i32) -> (i32, i32) {
    %c0_i32 = arith.constant 0 : i32
    %c0_i32_0 = arith.constant 0 : i32
    %c0_i32_1 = arith.constant 0 : i32
    return %c0_i32, %c0_i32_0 : i32, i32
  }
  func.func @transform_28(%arg0: i32) -> (i32, i32) {
    %c0_i32 = arith.constant 0 : i32
    %c0_i32_0 = arith.constant 0 : i32
    %c0_i32_1 = arith.constant 0 : i32
    return %c0_i32, %c0_i32_0 : i32, i32
  }
  func.func @transform_29(%arg0: i32) -> (i32, i32) {
    %c0_i32 = arith.constant 0 : i32
    %c0_i32_0 = arith.constant 0 : i32
    %c0_i32_1 = arith.constant 0 : i32
    return %c0_i32, %c0_i32_0 : i32, i32
  }
  func.func @transform_30(%arg0: i32) -> (i32, i32) {
    %c0_i32 = arith.constant 0 : i32
    %c0_i32_0 = arith.constant 0 : i32
    %c0_i32_1 = arith.constant 0 : i32
    return %c0_i32, %c0_i32_0 : i32, i32
  }
  func.func @transform_31(%arg0: i32) -> (i32, i32) {
    %c0_i32 = arith.constant 0 : i32
    %c0_i32_0 = arith.constant 0 : i32
    %c0_i32_1 = arith.constant 0 : i32
    return %c0_i32, %c0_i32_0 : i32, i32
  }
  func.func @transform_32(%arg0: i32) -> (i32, i32) {
    %c0_i32 = arith.constant 0 : i32
    %c0_i32_0 = arith.constant 0 : i32
    %c0_i32_1 = arith.constant 0 : i32
    return %c0_i32, %c0_i32_0 : i32, i32
  }
  func.func @transform_33(%arg0: i32) -> (i32, i32) {
    %c0_i32 = arith.constant 0 : i32
    %c0_i32_0 = arith.constant 0 : i32
    %c0_i32_1 = arith.constant 0 : i32
    return %c0_i32, %c0_i32_0 : i32, i32
  }
  func.func @transform_34(%arg0: i32) -> (i32, i32, i32) {
    %c0_i32 = arith.constant 0 : i32
    %c0_i32_0 = arith.constant 0 : i32
    %c0_i32_1 = arith.constant 0 : i32
    %c0_i32_2 = arith.constant 0 : i32
    return %c0_i32, %c0_i32_0, %c0_i32_1 : i32, i32, i32
  }
  func.func @transform_35(%arg0: i32) -> (i32, i32) {
    %c0_i32 = arith.constant 0 : i32
    %c0_i32_0 = arith.constant 0 : i32
    %c0_i32_1 = arith.constant 0 : i32
    return %c0_i32, %c0_i32_0 : i32, i32
  }
  func.func @transform_36(%arg0: i32) -> (i32, i32) {
    %c0_i32 = arith.constant 0 : i32
    %c0_i32_0 = arith.constant 0 : i32
    %c0_i32_1 = arith.constant 0 : i32
    return %c0_i32, %c0_i32_0 : i32, i32
  }
  func.func @transform_37(%arg0: i32) -> (i32, i32) {
    %c0_i32 = arith.constant 0 : i32
    %c0_i32_0 = arith.constant 0 : i32
    %c0_i32_1 = arith.constant 0 : i32
    return %c0_i32, %c0_i32_0 : i32, i32
  }
  func.func @transform_38(%arg0: i32) -> (i32, i32) {
    %c0_i32 = arith.constant 0 : i32
    %c0_i32_0 = arith.constant 0 : i32
    %c0_i32_1 = arith.constant 0 : i32
    return %c0_i32, %c0_i32_0 : i32, i32
  }
  func.func @transform_39(%arg0: i32) -> (i32, i32) {
    %c0_i32 = arith.constant 0 : i32
    %c0_i32_0 = arith.constant 0 : i32
    %c0_i32_1 = arith.constant 0 : i32
    return %c0_i32, %c0_i32_0 : i32, i32
  }
  func.func @transform_40(%arg0: i32) -> (i32, i32) {
    %c0_i32 = arith.constant 0 : i32
    %c0_i32_0 = arith.constant 0 : i32
    %c0_i32_1 = arith.constant 0 : i32
    return %c0_i32, %c0_i32_0 : i32, i32
  }
  func.func @transform_41(%arg0: i32) -> (i32, i32) {
    %c0_i32 = arith.constant 0 : i32
    %c0_i32_0 = arith.constant 0 : i32
    %c0_i32_1 = arith.constant 0 : i32
    return %c0_i32, %c0_i32_0 : i32, i32
  }
  func.func @transform_42(%arg0: i32) -> (i32, i32) {
    %c0_i32 = arith.constant 0 : i32
    %c0_i32_0 = arith.constant 0 : i32
    %c0_i32_1 = arith.constant 0 : i32
    return %c0_i32, %c0_i32_0 : i32, i32
  }
  func.func @transform_43(%arg0: i32) -> (i32, i32) {
    %c0_i32 = arith.constant 0 : i32
    %c0_i32_0 = arith.constant 0 : i32
    %c0_i32_1 = arith.constant 0 : i32
    return %c0_i32, %c0_i32_0 : i32, i32
  }
  func.func @transform_44(%arg0: i32) -> (i32, i32) {
    %c0_i32 = arith.constant 0 : i32
    %c0_i32_0 = arith.constant 0 : i32
    %c0_i32_1 = arith.constant 0 : i32
    return %c0_i32, %c0_i32_0 : i32, i32
  }
  func.func @transform_45(%arg0: i32) -> (i32, i32) {
    %c0_i32 = arith.constant 0 : i32
    %c0_i32_0 = arith.constant 0 : i32
    %c0_i32_1 = arith.constant 0 : i32
    return %c0_i32, %c0_i32_0 : i32, i32
  }
  func.func @transform_46(%arg0: i32) -> (i32, i32) {
    %c0_i32 = arith.constant 0 : i32
    %c0_i32_0 = arith.constant 0 : i32
    %c0_i32_1 = arith.constant 0 : i32
    return %c0_i32, %c0_i32_0 : i32, i32
  }
  func.func @transform_47(%arg0: i32) -> (i32, i32) {
    %c0_i32 = arith.constant 0 : i32
    %c0_i32_0 = arith.constant 0 : i32
    %c0_i32_1 = arith.constant 0 : i32
    return %c0_i32, %c0_i32_0 : i32, i32
  }
  func.func @transform_48(%arg0: i32) -> (i32, i32) {
    %c0_i32 = arith.constant 0 : i32
    %c0_i32_0 = arith.constant 0 : i32
    %c0_i32_1 = arith.constant 0 : i32
    return %c0_i32, %c0_i32_0 : i32, i32
  }
  func.func @transform_49(%arg0: i32) -> (i32, i32) {
    %c0_i32 = arith.constant 0 : i32
    %c0_i32_0 = arith.constant 0 : i32
    %c0_i32_1 = arith.constant 0 : i32
    return %c0_i32, %c0_i32_0 : i32, i32
  }
  func.func @transform_50(%arg0: i32) -> (i32, i32, i32) {
    %c0_i32 = arith.constant 0 : i32
    %c0_i32_0 = arith.constant 0 : i32
    %c0_i32_1 = arith.constant 0 : i32
    %c0_i32_2 = arith.constant 0 : i32
    return %c0_i32, %c0_i32_0, %c0_i32_1 : i32, i32, i32
  }
  func.func @transform_51(%arg0: i32) -> (i32, i32) {
    %c0_i32 = arith.constant 0 : i32
    %c0_i32_0 = arith.constant 0 : i32
    %c0_i32_1 = arith.constant 0 : i32
    return %c0_i32, %c0_i32_0 : i32, i32
  }
  func.func @transform_52(%arg0: i32) -> (i32, i32) {
    %c0_i32 = arith.constant 0 : i32
    %c0_i32_0 = arith.constant 0 : i32
    %c0_i32_1 = arith.constant 0 : i32
    return %c0_i32, %c0_i32_0 : i32, i32
  }
  func.func @transform_53(%arg0: i32) -> (i32, i32) {
    %c0_i32 = arith.constant 0 : i32
    %c0_i32_0 = arith.constant 0 : i32
    %c0_i32_1 = arith.constant 0 : i32
    return %c0_i32, %c0_i32_0 : i32, i32
  }
  func.func @transform_54(%arg0: i32) -> (i32, i32) {
    %c0_i32 = arith.constant 0 : i32
    %c0_i32_0 = arith.constant 0 : i32
    %c0_i32_1 = arith.constant 0 : i32
    return %c0_i32, %c0_i32_0 : i32, i32
  }
  func.func @transform_55(%arg0: i32) -> (i32, i32) {
    %c0_i32 = arith.constant 0 : i32
    %c0_i32_0 = arith.constant 0 : i32
    %c0_i32_1 = arith.constant 0 : i32
    return %c0_i32, %c0_i32_0 : i32, i32
  }
  func.func @transform_56(%arg0: i32) -> (i32, i32) {
    %c0_i32 = arith.constant 0 : i32
    %c0_i32_0 = arith.constant 0 : i32
    %c0_i32_1 = arith.constant 0 : i32
    return %c0_i32, %c0_i32_0 : i32, i32
  }
  func.func @transform_57(%arg0: i32) -> (i32, i32) {
    %c0_i32 = arith.constant 0 : i32
    %c0_i32_0 = arith.constant 0 : i32
    %c0_i32_1 = arith.constant 0 : i32
    return %c0_i32, %c0_i32_0 : i32, i32
  }
  func.func @transform_58(%arg0: i32) -> (i32, i32) {
    %c0_i32 = arith.constant 0 : i32
    %c0_i32_0 = arith.constant 0 : i32
    %c0_i32_1 = arith.constant 0 : i32
    return %c0_i32, %c0_i32_0 : i32, i32
  }
  func.func @transform_59(%arg0: i32) -> (i32, i32) {
    %c0_i32 = arith.constant 0 : i32
    %c0_i32_0 = arith.constant 0 : i32
    %c0_i32_1 = arith.constant 0 : i32
    return %c0_i32, %c0_i32_0 : i32, i32
  }
  func.func @transform_60(%arg0: i32) -> (i32, i32) {
    %c0_i32 = arith.constant 0 : i32
    %c0_i32_0 = arith.constant 0 : i32
    %c0_i32_1 = arith.constant 0 : i32
    return %c0_i32, %c0_i32_0 : i32, i32
  }
  func.func @transform_61(%arg0: i32) -> (i32, i32) {
    %c0_i32 = arith.constant 0 : i32
    %c0_i32_0 = arith.constant 0 : i32
    %c0_i32_1 = arith.constant 0 : i32
    return %c0_i32, %c0_i32_0 : i32, i32
  }
  func.func @transform_62(%arg0: i32) -> (i32, i32) {
    %c0_i32 = arith.constant 0 : i32
    %c0_i32_0 = arith.constant 0 : i32
    %c0_i32_1 = arith.constant 0 : i32
    return %c0_i32, %c0_i32_0 : i32, i32
  }
  func.func @transform_63(%arg0: i32) -> (i32, i32, i32) {
    %c0_i32 = arith.constant 0 : i32
    %c0_i32_0 = arith.constant 0 : i32
    %c0_i32_1 = arith.constant 0 : i32
    %c0_i32_2 = arith.constant 0 : i32
    return %c0_i32, %c0_i32_0, %c0_i32_1 : i32, i32, i32
  }
  func.func @transform_64(%arg0: i32) -> (i32, i32, i32) {
    %c0_i32 = arith.constant 0 : i32
    %c0_i32_0 = arith.constant 0 : i32
    %c0_i32_1 = arith.constant 0 : i32
    return %arg0, %c0_i32, %c0_i32_0 : i32, i32, i32
  }
}

</mosaic_0001>

<bundles_post_ra>
// kernel: tpu_custom_call.1
= control target key start
LH: loop header
LB: loop body
LE: loop exit
PB: predicated region body
PF: predicated region fallthrough
CT: control target
= control target key end

     0   :  { %s8338_s6 = smov 1   ;;  %s8339_s10 = smov 2   ;;  %s9770_s0 = inlined_call_operand.smem [shape: u32[65], index: -1, kind: input, shape index: {}] }
   0x1   :  { %s8445_s5 = sld [smem:[%s9770_s0]]   ;;  %s8340_s14 = smov 3  }
   0x2   :  { %s8450_s9 = sld [smem:[%s9770_s0 + %s8338_s6]]   ;;  %s8341_s18 = smov 4  }
   0x3   :  { %s8455_s13 = sld [smem:[%s9770_s0 + %s8339_s10]]   ;;  %s8342_s22 = smov 5  }
   0x4   :  { %s8460_s17 = sld [smem:[%s9770_s0 + %s8340_s14]]   ;;  %s8343_s26 = smov 6  }
   0x5   :  { %s8465_s21 = sld [smem:[%s9770_s0 + %s8341_s18]]   ;;  %s8344_s30 = smov 7  }
   0x6   :  { %s8470_s25 = sld [smem:[%s9770_s0 + %s8342_s22]]   ;;  %s8345_s4 = smov 8  }
   0x7   :  { %9848 = sst [smem:[#allocation51_spill]] %s8445_s5  ;;  %s8346_s10 = smov 9  }
   0x8   :  { %9849 = sst [smem:[#allocation52_spill]] %s8450_s9  ;;  %s8347_s15 = smov 10  }
   0x9   :  { %9850 = sst [smem:[#allocation53_spill]] %s8455_s13  ;;  %s8348_s20 = smov 11  }
   0xa   :  { %9851 = sst [smem:[#allocation54_spill]] %s8460_s17  ;;  %s8350_s1 = smov 13  }
   0xb   :  { %s8475_s29 = sld [smem:[%s9770_s0 + %s8343_s26]]   ;;  %s8349_s26 = smov 12  }
   0xc   :  { %9852 = sst [smem:[#allocation55_spill]] %s8470_s25  ;;  %s8351_s7 = smov 14  }
   0xd   :  { %s8480_s3 = sld [smem:[%s9770_s0 + %s8344_s30]]   ;;  %s8353_s22 = smov 16  }
   0xe   :  { %s8485_s8 = sld [smem:[%s9770_s0 + %s8345_s4]]   ;;  %s8354_s28 = smov 17  }
   0xf   :  { %s8490_s14 = sld [smem:[%s9770_s0 + %s8346_s10]]  }
  0x10   :  { %s8495_s19 = sld [smem:[%s9770_s0 + %s8347_s15]]   ;;  %s8352_s15 = smov 15  }
  0x11   :  { %s8500_s24 = sld [smem:[%s9770_s0 + %s8348_s20]]  }
  0x12   :  { %s8505_s30 = sld [smem:[%s9770_s0 + %s8349_s26]]  }
  0x13   :  { %9853 = sst [smem:[#allocation56_spill]] %s8480_s3 }
  0x14   :  { %9854 = sst [smem:[#allocation57_spill]] %s8485_s8 }
  0x15   :  { %s8510_s6 = sld [smem:[%s9770_s0 + %s8350_s1]]  }
  0x16   :  { %9855 = sst [smem:[#allocation58_spill]] %s8495_s19 }
  0x17   :  { %s8515_s12 = sld [smem:[%s9770_s0 + %s8351_s7]]   ;;  %s8355_s7 = smov 18  }
  0x18   :  { %9856 = sst [smem:[#allocation59_spill]] %s8505_s30 }
  0x19   :  { %s8520_s20 = sld [smem:[%s9770_s0 + %s8352_s15]]   ;;  %s8356_s15 = smov 19  }
  0x1a   :  { %s8525_s27 = sld [smem:[%s9770_s0 + %s8353_s22]]   ;;  %s8357_s22 = smov 20  }
  0x1b   :  { %9857 = sst [smem:[#allocation60_spill]] %s8510_s6 }
  0x1c   :  { %s8530_s4 = sld [smem:[%s9770_s0 + %s8354_s28]]   ;;  %s8358_s28 = smov 21  }
  0x1d   :  { %9858 = sst [smem:[#allocation61_spill]] %s8515_s12 }
  0x1e   :  { %s8535_s13 = sld [smem:[%s9770_s0 + %s8355_s7]]   ;;  %s8359_s7 = smov 22  }
  0x1f   :  { %9859 = sst [smem:[#allocation62_spill]] %s8520_s20 }
  0x20   :  { %9860 = sst [smem:[#allocation63_spill]] %s8525_s27 }
  0x21   :  { %s8540_s20 = sld [smem:[%s9770_s0 + %s8356_s15]]   ;;  %s8360_s15 = smov 23  }
  0x22   :  { %9861 = sst [smem:[#allocation64_spill]] %s8530_s4 }
  0x23   :  { %s8545_s27 = sld [smem:[%s9770_s0 + %s8357_s22]]   ;;  %s8361_s22 = smov 24  }
  0x24   :  { %9862 = sst [smem:[#allocation65_spill]] %s8535_s13 }
  0x25   :  { %s8550_s5 = sld [smem:[%s9770_s0 + %s8358_s28]]   ;;  %s8362_s28 = smov 25  }
  0x26   :  { %s8555_s13 = sld [smem:[%s9770_s0 + %s8359_s7]]   ;;  %s8363_s7 = smov 26  }
  0x27   :  { %9863 = sst [smem:[#allocation66_spill]] %s8540_s20 }
  0x28   :  { %s8560_s20 = sld [smem:[%s9770_s0 + %s8360_s15]]   ;;  %s8364_s15 = smov 27  }
  0x29   :  { %9864 = sst [smem:[#allocation67_spill]] %s8545_s27 }
  0x2a   :  { %s8565_s27 = sld [smem:[%s9770_s0 + %s8361_s22]]   ;;  %s8365_s22 = smov 28  }
  0x2b   :  { %9865 = sst [smem:[#allocation68_spill]] %s8550_s5 }
  0x2c   :  { %9866 = sst [smem:[#allocation69_spill]] %s8555_s13 }
  0x2d   :  { %s8570_s5 = sld [smem:[%s9770_s0 + %s8362_s28]]   ;;  %s8366_s28 = smov 29  }
  0x2e   :  { %9867 = sst [smem:[#allocation70_spill]] %s8560_s20 }
  0x2f   :  { %s8575_s12 = sld [smem:[%s9770_s0 + %s8363_s7]]   ;;  %s8367_s7 = smov 30  }
  0x30   :  { %s8580_s20 = sld [smem:[%s9770_s0 + %s8364_s15]]   ;;  %s8368_s15 = smov 31  }
  0x31   :  { %s8585_s30 = sld [smem:[%s9770_s0 + %s8365_s22]]   ;;  %s8369_s22 = smov 32  }
  0x32   :  { %s8595_s19 = sld [smem:[%s9770_s0 + %s8367_s7]]   ;;  %s8371_s7 = smov 34  }
  0x33   :  { %9868 = sst [smem:[#allocation71_spill]] %s8570_s5 }
  0x34   :  { %s8590_s5 = sld [smem:[%s9770_s0 + %s8366_s28]]   ;;  %s8370_s28 = smov 33  }
  0x35   :  { %9869 = sst [smem:[#allocation72_spill]] %s8575_s12 }
  0x36   :  { %9870 = sst [smem:[#allocation73_spill]] %s8580_s20 }
  0x37   :  { %9871 = sst [smem:[#allocation74_spill]] %s8585_s30 }
  0x38   :  { %9873 = sst [smem:[#allocation76_spill]] %s8595_s19 }
  0x39   :  { %s8600_s20 = sld [smem:[%s9770_s0 + %s8368_s15]]   ;;  %s8372_s15 = smov 35  }
  0x3a   :  { %9872 = sst [smem:[#allocation75_spill]] %s8590_s5 }
  0x3b   :  { %s8605_s30 = sld [smem:[%s9770_s0 + %s8369_s22]]   ;;  %s8373_s22 = smov 36  }
  0x3c   :  { %s8610_s5 = sld [smem:[%s9770_s0 + %s8370_s28]]   ;;  %s8374_s28 = smov 37  }
  0x3d   :  { %s8615_s19 = sld [smem:[%s9770_s0 + %s8371_s7]]   ;;  %s8375_s7 = smov 38  }
  0x3f   :  { %9874 = sst [smem:[#allocation77_spill]] %s8600_s20 }
  0x40   :  { %s8620_s20 = sld [smem:[%s9770_s0 + %s8372_s15]]   ;;  %s8376_s15 = smov 39  }
  0x41   :  { %9875 = sst [smem:[#allocation78_spill]] %s8605_s30 }
  0x42   :  { %9876 = sst [smem:[#allocation79_spill]] %s8610_s5 }
  0x43   :  { %9877 = sst [smem:[#allocation80_spill]] %s8615_s19 }
  0x44   :  { %s8625_s30 = sld [smem:[%s9770_s0 + %s8373_s22]]   ;;  %s8377_s22 = smov 40  }
  0x45   :  { %s8630_s5 = sld [smem:[%s9770_s0 + %s8374_s28]]   ;;  %s8378_s28 = smov 41  }
  0x46   :  { %9878 = sst [smem:[#allocation81_spill]] %s8620_s20 }
  0x47   :  { %s8635_s19 = sld [smem:[%s9770_s0 + %s8375_s7]]   ;;  %s8379_s7 = smov 42  }
  0x48   :  { %s8640_s20 = sld [smem:[%s9770_s0 + %s8376_s15]]   ;;  %s8380_s15 = smov 43  }
  0x4a   :  { %9879 = sst [smem:[#allocation82_spill]] %s8625_s30 }
  0x4b   :  { %9880 = sst [smem:[#allocation83_spill]] %s8630_s5 }
  0x4c   :  { %s8645_s30 = sld [smem:[%s9770_s0 + %s8377_s22]]   ;;  %s8381_s22 = smov 44  }
  0x4d   :  { %9881 = sst [smem:[#allocation84_spill]] %s8635_s19 }
  0x4e   :  { %9882 = sst [smem:[#allocation85_spill]] %s8640_s20 }
  0x4f   :  { %s8650_s5 = sld [smem:[%s9770_s0 + %s8378_s28]]   ;;  %s8382_s28 = smov 45  }
  0x50   :  { %s8655_s19 = sld [smem:[%s9770_s0 + %s8379_s7]]   ;;  %s8383_s7 = smov 46  }
  0x51   :  { %s8660_s20 = sld [smem:[%s9770_s0 + %s8380_s15]]   ;;  %s8384_s15 = smov 47  }
  0x52   :  { %9883 = sst [smem:[#allocation86_spill]] %s8645_s30 }
  0x53   :  { %s8665_s30 = sld [smem:[%s9770_s0 + %s8381_s22]]   ;;  %s8385_s22 = smov 48  }
  0x55   :  { %9884 = sst [smem:[#allocation87_spill]] %s8650_s5 }
  0x56   :  { %9885 = sst [smem:[#allocation88_spill]] %s8655_s19 }
  0x57   :  { %9886 = sst [smem:[#allocation89_spill]] %s8660_s20 }
  0x58   :  { %s8670_s5 = sld [smem:[%s9770_s0 + %s8382_s28]]   ;;  %s8386_s28 = smov 49  }
  0x59   :  { %9887 = sst [smem:[#allocation90_spill]] %s8665_s30 }
  0x5a   :  { %s8675_s19 = sld [smem:[%s9770_s0 + %s8383_s7]]   ;;  %s8387_s7 = smov 50  }
  0x5b   :  { %s8680_s20 = sld [smem:[%s9770_s0 + %s8384_s15]]   ;;  %s8388_s15 = smov 51  }
  0x5c   :  { %s8685_s30 = sld [smem:[%s9770_s0 + %s8385_s22]]   ;;  %s8389_s22 = smov 52  }
  0x5e   :  { %9888 = sst [smem:[#allocation91_spill]] %s8670_s5 }
  0x5f   :  { %s8690_s5 = sld [smem:[%s9770_s0 + %s8386_s28]]   ;;  %s8390_s28 = smov 53  }
  0x60   :  { %9889 = sst [smem:[#allocation92_spill]] %s8675_s19 }
  0x61   :  { %9890 = sst [smem:[#allocation93_spill]] %s8680_s20 }
  0x62   :  { %9891 = sst [smem:[#allocation94_spill]] %s8685_s30 }
  0x63   :  { %s8695_s19 = sld [smem:[%s9770_s0 + %s8387_s7]]   ;;  %s8391_s7 = smov 54  }
  0x64   :  { %s8700_s20 = sld [smem:[%s9770_s0 + %s8388_s15]]   ;;  %s8392_s15 = smov 55  }
  0x65   :  { %9892 = sst [smem:[#allocation95_spill]] %s8690_s5 }
  0x66   :  { %s8705_s30 = sld [smem:[%s9770_s0 + %s8389_s22]]   ;;  %s8393_s22 = smov 56  }
  0x67   :  { %s8710_s5 = sld [smem:[%s9770_s0 + %s8390_s28]]   ;;  %s8394_s28 = smov 57  }
  0x69   :  { %9893 = sst [smem:[#allocation96_spill]] %s8695_s19 }
  0x6a   :  { %9894 = sst [smem:[#allocation97_spill]] %s8700_s20 }
  0x6b   :  { %s8715_s19 = sld [smem:[%s9770_s0 + %s8391_s7]]   ;;  %s8395_s7 = smov 58  }
  0x6c   :  { %9895 = sst [smem:[#allocation98_spill]] %s8705_s30 }
  0x6d   :  { %9896 = sst [smem:[#allocation99_spill]] %s8710_s5 }
  0x6e   :  { %s8720_s20 = sld [smem:[%s9770_s0 + %s8392_s15]]   ;;  %s8396_s15 = smov 59  }
  0x6f   :  { %s8725_s30 = sld [smem:[%s9770_s0 + %s8393_s22]]   ;;  %s8397_s22 = smov 60  }
  0x70   :  { %s8730_s5 = sld [smem:[%s9770_s0 + %s8394_s28]]   ;;  %s8398_s28 = smov 61  }
  0x71   :  { %9897 = sst [smem:[#allocation100_spill]] %s8715_s19 }
  0x72   :  { %s8735_s19 = sld [smem:[%s9770_s0 + %s8395_s7]]   ;;  %s8399_s7 = smov 62  }
  0x74   :  { %9898 = sst [smem:[#allocation101_spill]] %s8720_s20 }
  0x75   :  { %9899 = sst [smem:[#allocation102_spill]] %s8725_s30 }
  0x76   :  { %9900 = sst [smem:[#allocation103_spill]] %s8730_s5 }
  0x77   :  { %s8740_s20 = sld [smem:[%s9770_s0 + %s8396_s15]]   ;;  %s8400_s15 = smov 63  }
  0x78   :  { %9901 = sst [smem:[#allocation104_spill]] %s8735_s19 }
  0x79   :  { %s8745_s30 = sld [smem:[%s9770_s0 + %s8397_s22]]   ;;  %s8401_s22 = smov 64  }
  0x7a   :  { %s8750_s5 = sld [smem:[%s9770_s0 + %s8398_s28]]  }
  0x7b   :  { %s8755_s19 = sld [smem:[%s9770_s0 + %s8399_s7]]  }
  0x7d   :  { %9902 = sst [smem:[#allocation105_spill]] %s8740_s20 }
  0x7e   :  { %s8760_s20 = sld [smem:[%s9770_s0 + %s8400_s15]]  }
  0x7f   :  { %9903 = sst [smem:[#allocation106_spill]] %s8745_s30 }
  0x80   :  { %9904 = sst [smem:[#allocation107_spill]] %s8750_s5 }
  0x81   :  { %s8765_s30 = sld [smem:[%s9770_s0 + %s8401_s22]]  }
  0x82   :  { %134 = vsyncpa [#allocation3], 0 }
  0x83   :  { %135 = vsyncpa [#allocation6], 0 }
  0x84   :  { %136 = vsyncpa [#allocation9], 0 }
  0x85   :  { %137 = vsyncpa [#allocation12], 0 }
  0x86   :  { %138 = vsyncpa [#allocation15], 0 }
  0x87   :  { %139 = vsyncpa [#allocation18], 0 }
  0x88   :  { %140 = vsyncpa [#allocation21], 0 }
  0x89   :  { %141 = vsyncpa [#allocation24], 0 }
  0x8a   :  { %142 = vsyncpa [#allocation27], 0 }
  0x8b   :  { %143 = vsyncpa [#allocation30], 0 }
  0x8c   :  { %144 = vsyncpa [#allocation33], 0 }
  0x8d   :  { %145 = vsyncpa [#allocation36], 0 }
  0x8e   :  { %146 = vsyncpa [#allocation4], 0 }
  0x8f   :  { %148 = vsyncpa [#allocation4 + $0x1], 0  ;;  %s8767_s28 = smov 0   ;;  %s8769_s1 = smov 0  }
  0x90   :  { %s8771_s0 = smov 0   ;;  %s8773_s2 = smov 0  }
  0x91 LB: > { %s9905_s13 = sld [smem:[#allocation69_spill]]  ;;  %s9906_s12 = sld [smem:[#allocation72_spill]]  ;;  %s8324_s28 = sphi %s8767_s28, %s10020_s28   ;;  %s8336_s2 = sphi %s8773_s2, %s10017_s2   ;;  %s8332_s0 = sphi %s8771_s0, %s10019_s0   ;;  %s8328_s1 = sphi %s8769_s1, %s10021_s1  }
  0x92   : > { %s9907_s9 = sld [smem:[#allocation52_spill]]  ;;  %s9908_s8 = sld [smem:[#allocation57_spill]] }
  0x93   : > { %s9909_s6 = sld [smem:[#allocation60_spill]]  ;;  %s9910_s4 = sld [smem:[#allocation64_spill]] }
  0x94   : > { %s9911_s3 = sld [smem:[#allocation56_spill]]  ;;  %s9912_s25 = sld [smem:[#allocation55_spill]] }
  0x95   : > { %s9913_s17 = sld [smem:[#allocation54_spill]]  ;;  %9914 = sst [smem:[#allocation108_spill]] %s8324_s28 }
  0x96   : > { %9915 = sst [smem:[#allocation109_spill]] %s8332_s0  ;;  %s8788_s7 = sadd.s32 4294967295, %s8336_s2  }
  0x97   : > { %s6325_s10 = sadd.s32 4294967294, %s8336_s2   ;;  %s8792_s11 = sadd.s32 1, %s8336_s2  }
  0x98   : > { %9916 = sst [smem:[#allocation110_spill]] %s8792_s11  ;;  %s1510_s15 = sadd.s32 1, %s8332_s0 }
  0x99   : > { %s1507_s16 = ssub.s32 %s8336_s2, %s8792_s11  ;;  %p1520_p0 = scmp.ne.s32.totalorder %s8332_s0, %s8328_s1 }
  0x9a   : > { %p1508_p1 = scmp.eq.s32.totalorder %s1507_s16, 0  ;;  %p1521_p2 = scmp.eq.s32.totalorder %s8788_s7, 1 }
  0x9b   : > { %p1526_p3 = scmp.ne.s32.totalorder %s8328_s1, %s8324_s28  ;;  %p1527_p4 = scmp.eq.s32.totalorder %s6325_s10, 1 }
  0x9c   : > { %s8803_s18 = scalar_select %p1508_p1, %s8332_s0, %s1510_s15  }
  0x9d   : > { %p8805_p5 = por %p1521_p2, %p1520_p0  ;;  %p8809_p6 = por %p1527_p4, %p1526_p3 }
  0x9e   : > { %9917 = sst [smem:[#allocation111_spill]] %s8803_s18  ;;  %p6326_p7 = scmp.ge.s32.totalorder %s8336_s2, 1 }
  0x9f   : > { %s9918_s22 = scalar_select %p8805_p5, 1, 0 }
  0xa0   : > { %s9919_s23 = scalar_select %p8809_p6, 1, 0 }
  0xa1   : > { %p1534_p8 = scmp.lt.s32.totalorder %s8336_s2, 3  ;;  %p9804_p9 = scmp.eq.s32.totalorder %s8788_s7, 0 }
  0xa2   : > { %9920 = sst [smem:[#allocation112_spill]] %s9919_s23  ;;  %s8402_s10 = smov [#allocation5]  }
  0xa3   : > { %p8816_p10 = pnand %p6326_p7, %p1534_p8  ;;  %s1561_s15 = sshll.u32 %s8402_s10, 4  ;;  %s1562_s15 = int_to_ptr.vmem [resolvable:$true] %s1561_s15 }
  0xa4   : > { %s8403_s16 = smov [#allocation8]   ;;  %s8404_s11 = smov [#allocation11]  }
  0xa5   : > { %s9921_s26 = scalar_select %p8816_p10, 1, 0 }
  0xa6   : > { %p7113_p11 = pneg %p8816_p10  ;;  %s1583_s18 = sshll.u32 %s8403_s16, 4  ;;  %s8828_s18 = int_to_ptr.vmem [resolvable:$true] %s1583_s18 }
  0xa7   : > { %s1605_s23 = sshll.u32 %s8404_s11, 4  ;;  %s7610_s28 = scalar_lea.hbm %s9913_s17, 16  ;;  %s8830_s23 = int_to_ptr.vmem [resolvable:$true] %s1605_s23 }
  0xa8   : > { %p8824_p12 = pnand %p9804_p9, %p7113_p11  ;;  %p7611_p13 = scmp.ne.s32.totalorder %s9913_s17, %s7610_s28 }
  0xa9   : > { %p7617_p3 = scmp.lt.u32.totalorder %s7610_s28, %s9913_s17 }
  0xaa   : > { %p8836_p0 = pneg %p8824_p12 }
  0xac   : > { %p7613_p1 = pnand %p8836_p0, %p7611_p13 }
  0xae   : > { %p7614_p2 = pneg %p7613_p1 }
  0xb0   : > { %p7619_p4 = pnand %p7617_p3, %p7614_p2 }
  0xb2   : > { %7622 = shalt.err (!%p7619_p4)
}
  0xb3   : > { %s7623_s16 = scalar_lea.vmem %s1562_s15, 16  ;;  %s7630_s11 = scalar_lea.vmem %s1562_s15, 32 }
  0xb4   : > { %p7624_p7 = scmp.ne.s32.totalorder %s1562_s15, %s7623_s16  ;;  %p7631_p9 = scmp.lt.s32.totalorder %s1562_s15, %s1562_s15 }
  0xb5   : > { %p7632_p6 = scmp.lt.s32.totalorder %s7630_s11, %s7623_s16 }
  0xb6   : > { %p7626_p8 = pnand %p7624_p7, %p8836_p0 }
  0xb7   : > { %p7633_p5 = por %p7632_p6, %p7631_p9 }
  0xb8   : > { %p7627_p11 = pneg %p7626_p8 }
  0xba   : > { %p7634_p10 = pnand %p7633_p5, %p7627_p11 }
  0xbc   : > { %7637 = shalt.err (!%p7634_p10)
}
  0xbd   : > { %7119 = dma.hbm_to_vmem [thread:$0]  (!%p8824_p12), %s9913_s17, 16, %s1562_s15, [#allocation6]  }
  0xbe   : > { %s7638_s28 = scalar_lea.hbm %s9912_s25, 16 }
  0xbf   : > { %p7639_p13 = scmp.ne.s32.totalorder %s9912_s25, %s7638_s28  ;;  %p7645_p3 = scmp.lt.u32.totalorder %s7638_s28, %s9912_s25 }
  0xc1   : > { %p7641_p1 = pnand %p7639_p13, %p8836_p0 }
  0xc3   : > { %p7642_p2 = pneg %p7641_p1 }
  0xc5   : > { %p7647_p4 = pnand %p7645_p3, %p7642_p2 }
  0xc7   : > { %7650 = shalt.err (!%p7647_p4)
}
  0xc8   : > { %s7651_s16 = scalar_lea.vmem %s8828_s18, 16  ;;  %s7658_s11 = scalar_lea.vmem %s8828_s18, 32 }
  0xc9   : > { %p7652_p5 = scmp.ne.s32.totalorder %s8828_s18, %s7651_s16  ;;  %p7659_p10 = scmp.lt.s32.totalorder %s8828_s18, %s8828_s18 }
  0xca   : > { %p7660_p7 = scmp.lt.s32.totalorder %s7658_s11, %s7651_s16 }
  0xcb   : > { %p7654_p6 = pnand %p7652_p5, %p8836_p0 }
  0xcc   : > { %p7661_p8 = por %p7660_p7, %p7659_p10 }
  0xcd   : > { %p7655_p9 = pneg %p7654_p6 }
  0xcf   : > { %p7662_p11 = pnand %p7661_p8, %p7655_p9 }
  0xd1   : > { %7665 = shalt.err (!%p7662_p11)
}
  0xd2   : > { %7125 = dma.hbm_to_vmem [thread:$0]  (!%p8824_p12), %s9912_s25, 16, %s8828_s18, [#allocation9]  }
  0xd3   : > { %s7666_s15 = scalar_lea.hbm %s9911_s3, 16 }
  0xd4   : > { %p7667_p13 = scmp.ne.s32.totalorder %s9911_s3, %s7666_s15  ;;  %p7673_p3 = scmp.lt.u32.totalorder %s7666_s15, %s9911_s3 }
  0xd6   : > { %p7669_p1 = pnand %p7667_p13, %p8836_p0 }
  0xd8   : > { %p7670_p2 = pneg %p7669_p1 }
  0xda   : > { %p7675_p4 = pnand %p7673_p3, %p7670_p2 }
  0xdc   : > { %7678 = shalt.err (!%p7675_p4)
}
  0xdd   : > { %s7679_s28 = scalar_lea.vmem %s8830_s23, 16  ;;  %s7686_s16 = scalar_lea.vmem %s8830_s23, 32 }
  0xde   : > { %p7680_p5 = scmp.ne.s32.totalorder %s8830_s23, %s7679_s28  ;;  %p7687_p10 = scmp.lt.s32.totalorder %s8830_s23, %s8830_s23 }
  0xdf   : > { %p7688_p7 = scmp.lt.s32.totalorder %s7686_s16, %s7679_s28 }
  0xe0   : > { %p7682_p6 = pnand %p7680_p5, %p8836_p0 }
  0xe1   : > { %p7689_p8 = por %p7688_p7, %p7687_p10 }
  0xe2   : > { %p7683_p9 = pneg %p7682_p6 }
  0xe4   : > { %p7690_p11 = pnand %p7689_p8, %p7683_p9 }
  0xe6   : > { %7693 = shalt.err (!%p7690_p11)
}
  0xe7   : > { %7131 = dma.hbm_to_vmem [thread:$0]  (!%p8824_p12), %s9911_s3, 16, %s8830_s23, [#allocation12]  }
  0xe8   : > { %s8405_s18 = smov [#allocation14]   ;;  %s8406_s15 = smov [#allocation17]  }
  0xe9   : > { %s1629_s11 = sshll.u32 %s8405_s18, 4  ;;  %s1651_s17 = sshll.u32 %s8406_s15, 4  ;;  %s1630_s11 = int_to_ptr.vmem [resolvable:$true] %s1629_s11  ;;  %s1652_s17 = int_to_ptr.vmem [resolvable:$true] %s1651_s17 }
  0xea   : > { %s7694_s25 = scalar_lea.hbm %s8490_s14, 16 }
  0xeb   : > { %p7695_p13 = scmp.ne.s32.totalorder %s8490_s14, %s7694_s25  ;;  %p7701_p3 = scmp.lt.u32.totalorder %s7694_s25, %s8490_s14 }
  0xed   : > { %p7697_p1 = pnand %p7695_p13, %p8836_p0 }
  0xef   : > { %p7698_p2 = pneg %p7697_p1 }
  0xf1   : > { %p7703_p4 = pnand %p7701_p3, %p7698_p2 }
  0xf3   : > { %7706 = shalt.err (!%p7703_p4)
}
  0xf4   : > { %s7707_s28 = scalar_lea.vmem %s1630_s11, 16  ;;  %s7714_s23 = scalar_lea.vmem %s1630_s11, 32 }
  0xf5   : > { %p7708_p5 = scmp.ne.s32.totalorder %s1630_s11, %s7707_s28  ;;  %p7715_p10 = scmp.lt.s32.totalorder %s1630_s11, %s1630_s11 }
  0xf6   : > { %p7716_p7 = scmp.lt.s32.totalorder %s7714_s23, %s7707_s28 }
  0xf7   : > { %p7710_p6 = pnand %p7708_p5, %p8836_p0 }
  0xf8   : > { %p7717_p8 = por %p7716_p7, %p7715_p10 }
  0xf9   : > { %p7711_p9 = pneg %p7710_p6 }
  0xfb   : > { %p7718_p11 = pnand %p7717_p8, %p7711_p9 }
  0xfd   : > { %7721 = shalt.err (!%p7718_p11)
}
  0xfe   : > { %7137 = dma.hbm_to_vmem [thread:$0]  (!%p8824_p12), %s8490_s14, 16, %s1630_s11, [#allocation15]  }
  0xff   : > { %s7722_s25 = scalar_lea.hbm %s8500_s24, 16 }
 0x100   : > { %p7723_p13 = scmp.ne.s32.totalorder %s8500_s24, %s7722_s25  ;;  %p7729_p3 = scmp.lt.u32.totalorder %s7722_s25, %s8500_s24 }
 0x102   : > { %p7725_p1 = pnand %p7723_p13, %p8836_p0 }
 0x104   : > { %p7726_p2 = pneg %p7725_p1 }
 0x106   : > { %p7731_p4 = pnand %p7729_p3, %p7726_p2 }
 0x108   : > { %7734 = shalt.err (!%p7731_p4)
}
 0x109   : > { %s7735_s16 = scalar_lea.vmem %s1652_s17, 16  ;;  %s7742_s18 = scalar_lea.vmem %s1652_s17, 32 }
 0x10a   : > { %p7736_p5 = scmp.ne.s32.totalorder %s1652_s17, %s7735_s16  ;;  %p7743_p10 = scmp.lt.s32.totalorder %s1652_s17, %s1652_s17 }
 0x10b   : > { %p7744_p7 = scmp.lt.s32.totalorder %s7742_s18, %s7735_s16 }
 0x10c   : > { %p7738_p6 = pnand %p7736_p5, %p8836_p0 }
 0x10d   : > { %p7745_p8 = por %p7744_p7, %p7743_p10 }
 0x10e   : > { %p7739_p9 = pneg %p7738_p6 }
 0x110   : > { %p7746_p11 = pnand %p7745_p8, %p7739_p9 }
 0x112   : > { %7749 = shalt.err (!%p7746_p11)
}
 0x113   : > { %7143 = dma.hbm_to_vmem [thread:$0]  (!%p8824_p12), %s8500_s24, 16, %s1652_s17, [#allocation18]  }
 0x114   : > { %s8407_s11 = smov [#allocation20]   ;;  %s8408_s28 = smov [#allocation23]  }
 0x115   : > { %s1673_s15 = sshll.u32 %s8407_s11, 4  ;;  %s1701_s23 = sshll.u32 %s8408_s28, 4  ;;  %s1674_s15 = int_to_ptr.vmem [resolvable:$true] %s1673_s15  ;;  %s1702_s23 = int_to_ptr.vmem [resolvable:$true] %s1701_s23 }
 0x116   : > { %s7750_s25 = scalar_lea.hbm %s9909_s6, 16 }
 0x117   : > { %p7751_p13 = scmp.ne.s32.totalorder %s9909_s6, %s7750_s25  ;;  %p7757_p3 = scmp.lt.u32.totalorder %s7750_s25, %s9909_s6 }
 0x119   : > { %p7753_p1 = pnand %p7751_p13, %p8836_p0 }
 0x11b   : > { %p7754_p2 = pneg %p7753_p1 }
 0x11d   : > { %p7759_p4 = pnand %p7757_p3, %p7754_p2 }
 0x11f   : > { %7762 = shalt.err (!%p7759_p4)
}
 0x120   : > { %s7763_s16 = scalar_lea.vmem %s1674_s15, 16  ;;  %s7770_s17 = scalar_lea.vmem %s1674_s15, 32 }
 0x121   : > { %p7764_p5 = scmp.ne.s32.totalorder %s1674_s15, %s7763_s16  ;;  %p7771_p10 = scmp.lt.s32.totalorder %s1674_s15, %s1674_s15 }
 0x122   : > { %p7772_p7 = scmp.lt.s32.totalorder %s7770_s17, %s7763_s16 }
 0x123   : > { %p7766_p6 = pnand %p7764_p5, %p8836_p0 }
 0x124   : > { %p7773_p8 = por %p7772_p7, %p7771_p10 }
 0x125   : > { %p7767_p9 = pneg %p7766_p6 }
 0x127   : > { %p7774_p11 = pnand %p7773_p8, %p7767_p9 }
 0x129   : > { %7777 = shalt.err (!%p7774_p11)
}
 0x12a   : > { %7149 = dma.hbm_to_vmem [thread:$0]  (!%p8824_p12), %s9909_s6, 16, %s1674_s15, [#allocation21]  }
 0x12b   : > { %s7778_s18 = scalar_lea.hbm %s9910_s4, 16 }
 0x12c   : > { %p7779_p13 = scmp.ne.s32.totalorder %s9910_s4, %s7778_s18  ;;  %p7785_p3 = scmp.lt.u32.totalorder %s7778_s18, %s9910_s4 }
 0x12e   : > { %p7781_p1 = pnand %p7779_p13, %p8836_p0 }
 0x130   : > { %p7782_p2 = pneg %p7781_p1 }
 0x132   : > { %p7787_p4 = pnand %p7785_p3, %p7782_p2 }
 0x134   : > { %7790 = shalt.err (!%p7787_p4)
}
 0x135   : > { %s7791_s11 = scalar_lea.vmem %s1702_s23, 16  ;;  %s7798_s28 = scalar_lea.vmem %s1702_s23, 32 }
 0x136   : > { %p7792_p5 = scmp.ne.s32.totalorder %s1702_s23, %s7791_s11  ;;  %p7799_p10 = scmp.lt.s32.totalorder %s1702_s23, %s1702_s23 }
 0x137   : > { %p7800_p7 = scmp.lt.s32.totalorder %s7798_s28, %s7791_s11 }
 0x138   : > { %p7794_p6 = pnand %p7792_p5, %p8836_p0 }
 0x139   : > { %p7801_p8 = por %p7800_p7, %p7799_p10 }
 0x13a   : > { %p7795_p9 = pneg %p7794_p6 }
 0x13c   : > { %p7802_p11 = pnand %p7801_p8, %p7795_p9 }
 0x13e   : > { %7805 = shalt.err (!%p7802_p11)
}
 0x13f   : > { %7155 = dma.hbm_to_vmem [thread:$0]  (!%p8824_p12), %s9910_s4, 16, %s1702_s23, [#allocation24]  }
 0x140   : > { %s8409_s15 = smov [#allocation26]   ;;  %s8410_s16 = smov [#allocation29]  }
 0x141   : > { %s1732_s25 = sshll.u32 %s8409_s15, 4  ;;  %s1754_s17 = sshll.u32 %s8410_s16, 4  ;;  %s1733_s25 = int_to_ptr.vmem [resolvable:$true] %s1732_s25  ;;  %s1755_s17 = int_to_ptr.vmem [resolvable:$true] %s1754_s17 }
 0x142   : > { %s7806_s18 = scalar_lea.hbm %s9905_s13, 16 }
 0x143   : > { %p7807_p13 = scmp.ne.s32.totalorder %s9905_s13, %s7806_s18  ;;  %p7813_p3 = scmp.lt.u32.totalorder %s7806_s18, %s9905_s13 }
 0x145   : > { %p7809_p1 = pnand %p7807_p13, %p8836_p0 }
 0x147   : > { %p7810_p2 = pneg %p7809_p1 }
 0x149   : > { %p7815_p4 = pnand %p7813_p3, %p7810_p2 }
 0x14b   : > { %7818 = shalt.err (!%p7815_p4)
}
 0x14c   : > { %s7819_s11 = scalar_lea.vmem %s1733_s25, 16  ;;  %s7826_s23 = scalar_lea.vmem %s1733_s25, 32 }
 0x14d   : > { %p7820_p5 = scmp.ne.s32.totalorder %s1733_s25, %s7819_s11  ;;  %p7827_p10 = scmp.lt.s32.totalorder %s1733_s25, %s1733_s25 }
 0x14e   : > { %p7828_p7 = scmp.lt.s32.totalorder %s7826_s23, %s7819_s11 }
 0x14f   : > { %p7822_p6 = pnand %p7820_p5, %p8836_p0 }
 0x150   : > { %p7829_p8 = por %p7828_p7, %p7827_p10 }
 0x151   : > { %p7823_p9 = pneg %p7822_p6 }
 0x153   : > { %p7830_p11 = pnand %p7829_p8, %p7823_p9 }
 0x155   : > { %7833 = shalt.err (!%p7830_p11)
}
 0x156   : > { %7161 = dma.hbm_to_vmem [thread:$0]  (!%p8824_p12), %s9905_s13, 16, %s1733_s25, [#allocation27]  }
 0x157   : > { %s7834_s28 = scalar_lea.hbm %s8565_s27, 16 }
 0x158   : > { %p7835_p13 = scmp.ne.s32.totalorder %s8565_s27, %s7834_s28  ;;  %p7841_p3 = scmp.lt.u32.totalorder %s7834_s28, %s8565_s27 }
 0x15a   : > { %p7837_p1 = pnand %p7835_p13, %p8836_p0 }
 0x15c   : > { %p7838_p2 = pneg %p7837_p1 }
 0x15e   : > { %p7843_p4 = pnand %p7841_p3, %p7838_p2 }
 0x160   : > { %7846 = shalt.err (!%p7843_p4)
}
 0x161   : > { %s7847_s15 = scalar_lea.vmem %s1755_s17, 16  ;;  %s7854_s16 = scalar_lea.vmem %s1755_s17, 32 }
 0x162   : > { %p7848_p5 = scmp.ne.s32.totalorder %s1755_s17, %s7847_s15  ;;  %p7855_p10 = scmp.lt.s32.totalorder %s1755_s17, %s1755_s17 }
 0x163   : > { %p7856_p7 = scmp.lt.s32.totalorder %s7854_s16, %s7847_s15 }
 0x164   : > { %p7850_p6 = pnand %p7848_p5, %p8836_p0 }
 0x165   : > { %p7857_p8 = por %p7856_p7, %p7855_p10 }
 0x166   : > { %p7851_p9 = pneg %p7850_p6 }
 0x168   : > { %p7858_p11 = pnand %p7857_p8, %p7851_p9 }
 0x16a   : > { %7861 = shalt.err (!%p7858_p11)
}
 0x16b   : > { %7167 = dma.hbm_to_vmem [thread:$0]  (!%p8824_p12), %s8565_s27, 16, %s1755_s17, [#allocation30]  }
 0x16c   : > { %s8411_s25 = smov [#allocation32]   ;;  %s8412_s11 = smov [#allocation2]  }
 0x16d   : > { %s1776_s18 = sshll.u32 %s8411_s25, 4  ;;  %s1547_s23 = sshll.u32 %s8412_s11, 4  ;;  %s1777_s18 = int_to_ptr.vmem [resolvable:$true] %s1776_s18  ;;  %s1548_s23 = int_to_ptr.vmem [resolvable:$true] %s1547_s23 }
 0x16e   : > { %s7862_s28 = scalar_lea.hbm %s9906_s12, 16 }
 0x16f   : > { %p7863_p13 = scmp.ne.s32.totalorder %s9906_s12, %s7862_s28  ;;  %p7869_p3 = scmp.lt.u32.totalorder %s7862_s28, %s9906_s12 }
 0x171   : > { %p7865_p1 = pnand %p7863_p13, %p8836_p0 }
 0x173   : > { %p7866_p2 = pneg %p7865_p1 }
 0x175   : > { %p7871_p4 = pnand %p7869_p3, %p7866_p2 }
 0x177   : > { %7874 = shalt.err (!%p7871_p4)
}
 0x178   : > { %s7875_s15 = scalar_lea.vmem %s1777_s18, 16  ;;  %s7882_s17 = scalar_lea.vmem %s1777_s18, 32 }
 0x179   : > { %p7876_p5 = scmp.ne.s32.totalorder %s1777_s18, %s7875_s15  ;;  %p7883_p10 = scmp.lt.s32.totalorder %s1777_s18, %s1777_s18 }
 0x17a   : > { %p7884_p7 = scmp.lt.s32.totalorder %s7882_s17, %s7875_s15 }
 0x17b   : > { %p7878_p6 = pnand %p7876_p5, %p8836_p0 }
 0x17c   : > { %p7885_p8 = por %p7884_p7, %p7883_p10 }
 0x17d   : > { %p7879_p9 = pneg %p7878_p6 }
 0x17f   : > { %p7886_p11 = pnand %p7885_p8, %p7879_p9 }
 0x181   : > { %7889 = shalt.err (!%p7886_p11)
}
 0x182   : > { %7173 = dma.hbm_to_vmem [thread:$0]  (!%p8824_p12), %s9906_s12, 16, %s1777_s18, [#allocation33]  }
 0x183   : > { %s7890_s16 = scalar_lea.hbm %s9907_s9, 16 }
 0x184   : > { %p7891_p13 = scmp.ne.s32.totalorder %s9907_s9, %s7890_s16  ;;  %p7897_p3 = scmp.lt.u32.totalorder %s7890_s16, %s9907_s9 }
 0x186   : > { %p7893_p1 = pnand %p7891_p13, %p8836_p0 }
 0x188   : > { %p7894_p2 = pneg %p7893_p1 }
 0x18a   : > { %p7899_p4 = pnand %p7897_p3, %p7894_p2 }
 0x18c   : > { %7902 = shalt.err (!%p7899_p4)
}
 0x18d   : > { %s7903_s25 = scalar_lea.vmem %s1548_s23, 16  ;;  %s7910_s11 = scalar_lea.vmem %s1548_s23, 32 }
 0x18e   : > { %p7904_p5 = scmp.ne.s32.totalorder %s1548_s23, %s7903_s25  ;;  %p7911_p10 = scmp.lt.s32.totalorder %s1548_s23, %s1548_s23 }
 0x18f   : > { %p7912_p7 = scmp.lt.s32.totalorder %s7910_s11, %s7903_s25 }
 0x190   : > { %p7906_p6 = pnand %p7904_p5, %p8836_p0 }
 0x191   : > { %p7913_p8 = por %p7912_p7, %p7911_p10 }
 0x192   : > { %p7907_p9 = pneg %p7906_p6 }
 0x194   : > { %p7914_p11 = pnand %p7913_p8, %p7907_p9 }
 0x196   : > { %7917 = shalt.err (!%p7914_p11)
}
 0x197   : > { %7116 = dma.hbm_to_vmem [thread:$0]  (!%p8824_p12), %s9907_s9, 16, %s1548_s23, [#allocation3]  }
 0x198   : > { %s8413_s18 = smov [#allocation7]   ;;  %s8414_s15 = smov [#allocation10]  }
 0x199   : > { %s1572_s28 = sshll.u32 %s8413_s18, 4  ;;  %s1594_s17 = sshll.u32 %s8414_s15, 4  ;;  %s1573_s28 = int_to_ptr.vmem [resolvable:$true] %s1572_s28  ;;  %s1595_s17 = int_to_ptr.vmem [resolvable:$true] %s1594_s17 }
 0x19a   : > { %s7918_s16 = scalar_lea.hbm %s8465_s21, 16 }
 0x19b   : > { %p7919_p13 = scmp.ne.s32.totalorder %s8465_s21, %s7918_s16  ;;  %p7925_p3 = scmp.lt.u32.totalorder %s7918_s16, %s8465_s21 }
 0x19d   : > { %p7921_p1 = pnand %p7919_p13, %p8836_p0 }
 0x19f   : > { %p7922_p2 = pneg %p7921_p1 }
 0x1a1   : > { %p7927_p4 = pnand %p7925_p3, %p7922_p2 }
 0x1a3   : > { %7930 = shalt.err (!%p7927_p4)
}
 0x1a4   : > { %s7931_s25 = scalar_lea.vmem %s1573_s28, 16  ;;  %s7938_s23 = scalar_lea.vmem %s1573_s28, 32 }
 0x1a5   : > { %p7932_p5 = scmp.ne.s32.totalorder %s1573_s28, %s7931_s25  ;;  %p7939_p10 = scmp.lt.s32.totalorder %s1573_s28, %s1573_s28 }
 0x1a6   : > { %p7940_p7 = scmp.lt.s32.totalorder %s7938_s23, %s7931_s25 }
 0x1a7   : > { %p7934_p6 = pnand %p7932_p5, %p8836_p0 }
 0x1a8   : > { %p7941_p8 = por %p7940_p7, %p7939_p10 }
 0x1a9   : > { %p7935_p9 = pneg %p7934_p6 }
 0x1ab   : > { %p7942_p11 = pnand %p7941_p8, %p7935_p9 }
 0x1ad   : > { %7945 = shalt.err (!%p7942_p11)
}
 0x1ae   : > { %7122 = dma.hbm_to_vmem [thread:$0]  (!%p8824_p12), %s8465_s21, 16, %s1573_s28, [#allocation6]  }
 0x1af   : > { %s7946_s11 = scalar_lea.hbm %s8475_s29, 16 }
 0x1b0   : > { %p7947_p13 = scmp.ne.s32.totalorder %s8475_s29, %s7946_s11  ;;  %p7953_p3 = scmp.lt.u32.totalorder %s7946_s11, %s8475_s29 }
 0x1b2   : > { %p7949_p1 = pnand %p7947_p13, %p8836_p0 }
 0x1b4   : > { %p7950_p2 = pneg %p7949_p1 }
 0x1b6   : > { %p7955_p4 = pnand %p7953_p3, %p7950_p2 }
 0x1b8   : > { %7958 = shalt.err (!%p7955_p4)
}
 0x1b9   : > { %s7959_s18 = scalar_lea.vmem %s1595_s17, 16  ;;  %s7966_s15 = scalar_lea.vmem %s1595_s17, 32 }
 0x1ba   : > { %p7960_p5 = scmp.ne.s32.totalorder %s1595_s17, %s7959_s18  ;;  %p7967_p10 = scmp.lt.s32.totalorder %s1595_s17, %s1595_s17 }
 0x1bb   : > { %p7968_p7 = scmp.lt.s32.totalorder %s7966_s15, %s7959_s18 }
 0x1bc   : > { %p7962_p6 = pnand %p7960_p5, %p8836_p0 }
 0x1bd   : > { %p7969_p8 = por %p7968_p7, %p7967_p10 }
 0x1be   : > { %p7963_p9 = pneg %p7962_p6 }
 0x1c0   : > { %p7970_p11 = pnand %p7969_p8, %p7963_p9 }
 0x1c2   : > { %7973 = shalt.err (!%p7970_p11)
}
 0x1c3   : > { %7128 = dma.hbm_to_vmem [thread:$0]  (!%p8824_p12), %s8475_s29, 16, %s1595_s17, [#allocation9]  }
 0x1c4   : > { %s8415_s28 = smov [#allocation13]   ;;  %s7974_s25 = scalar_lea.hbm %s9908_s8, 128 }
 0x1c5   : > { %s1615_s16 = sshll.u32 %s8415_s28, 4  ;;  %p7975_p13 = scmp.ne.s32.totalorder %s9908_s8, %s7974_s25  ;;  %s1616_s16 = int_to_ptr.vmem [resolvable:$true] %s1615_s16 }
 0x1c6   : > { %p7981_p3 = scmp.lt.u32.totalorder %s7974_s25, %s9908_s8 }
 0x1c7   : > { %p7977_p1 = pnand %p7975_p13, %p8836_p0 }
 0x1c9   : > { %p7978_p2 = pneg %p7977_p1 }
 0x1cb   : > { %p7983_p4 = pnand %p7981_p3, %p7978_p2 }
 0x1cd   : > { %7986 = shalt.err (!%p7983_p4)
}
 0x1ce   : > { %s7987_s23 = scalar_lea.vmem %s1616_s16, 128  ;;  %p7995_p10 = scmp.lt.s32.totalorder %s1616_s16, %s1616_s16 }
 0x1cf   : > { %p7988_p5 = scmp.ne.s32.totalorder %s1616_s16, %s7987_s23  ;;  %p7996_p7 = scmp.lt.s32.totalorder %s7987_s23, %s7987_s23 }
 0x1d1   : > { %p7990_p6 = pnand %p7988_p5, %p8836_p0  ;;  %p7997_p8 = por %p7996_p7, %p7995_p10 }
 0x1d3   : > { %p7991_p9 = pneg %p7990_p6 }
 0x1d5   : > { %p7998_p11 = pnand %p7997_p8, %p7991_p9 }
 0x1d7   : > { %8001 = shalt.err (!%p7998_p11)
}
 0x1d8   : > { %s8416_s17 = smov 64   ;;  %s9924_s11 = sld [smem:[#allocation58_spill]] }
 0x1d9   : > { %s8417_s18 = smov 4   ;;  %s8418_s15 = smov [#allocation16]  }
 0x1da   : > { %7134 = dma.hbm_to_vmem [thread:$0]  (!%p8824_p12), %s9908_s8, 128, %s1616_s16, [#allocation12], %s8416_s17, %s8416_s17, %s8417_s18  }
 0x1db   : > { %s1640_s28 = sshll.u32 %s8418_s15, 4  ;;  %s8419_s25 = smov [#allocation19]   ;;  %s1641_s28 = int_to_ptr.vmem [resolvable:$true] %s1640_s28 }
 0x1dc   : > { %s1662_s3 = sshll.u32 %s8419_s25, 4  ;;  %s8990_s3 = int_to_ptr.vmem [resolvable:$true] %s1662_s3 }
 0x1de   : > { %s8002_s23 = scalar_lea.hbm %s9924_s11, 16 }
 0x1df   : > { %p8003_p13 = scmp.ne.s32.totalorder %s9924_s11, %s8002_s23  ;;  %p8009_p3 = scmp.lt.u32.totalorder %s8002_s23, %s9924_s11 }
 0x1e1   : > { %p8005_p1 = pnand %p8003_p13, %p8836_p0 }
 0x1e3   : > { %p8006_p2 = pneg %p8005_p1 }
 0x1e5   : > { %p8011_p4 = pnand %p8009_p3, %p8006_p2 }
 0x1e7   : > { %8014 = shalt.err (!%p8011_p4)
}
 0x1e8   : > { %s8015_s4 = scalar_lea.vmem %s1641_s28, 16  ;;  %s8022_s16 = scalar_lea.vmem %s1641_s28, 32 }
 0x1e9   : > { %p8016_p5 = scmp.ne.s32.totalorder %s1641_s28, %s8015_s4  ;;  %p8023_p10 = scmp.lt.s32.totalorder %s1641_s28, %s1641_s28 }
 0x1ea   : > { %p8024_p7 = scmp.lt.s32.totalorder %s8022_s16, %s8015_s4 }
 0x1eb   : > { %p8018_p6 = pnand %p8016_p5, %p8836_p0 }
 0x1ec   : > { %p8025_p8 = por %p8024_p7, %p8023_p10 }
 0x1ed   : > { %p8019_p9 = pneg %p8018_p6 }
 0x1ef   : > { %p8026_p11 = pnand %p8025_p8, %p8019_p9 }
 0x1f1   : > { %8029 = shalt.err (!%p8026_p11)
}
 0x1f2   : > { %s9925_s17 = sld [smem:[#allocation59_spill]] }
 0x1f3   : > { %7140 = dma.hbm_to_vmem [thread:$0]  (!%p8824_p12), %s9924_s11, 16, %s1641_s28, [#allocation15]  }
 0x1f8   : > { %s8030_s18 = scalar_lea.hbm %s9925_s17, 16 }
 0x1f9   : > { %p8031_p13 = scmp.ne.s32.totalorder %s9925_s17, %s8030_s18  ;;  %p8037_p3 = scmp.lt.u32.totalorder %s8030_s18, %s9925_s17 }
 0x1fb   : > { %p8033_p1 = pnand %p8031_p13, %p8836_p0 }
 0x1fd   : > { %p8034_p2 = pneg %p8033_p1 }
 0x1ff   : > { %p8039_p4 = pnand %p8037_p3, %p8034_p2 }
 0x201   : > { %8042 = shalt.err (!%p8039_p4)
}
 0x202   : > { %s8043_s4 = scalar_lea.vmem %s8990_s3, 16  ;;  %s8050_s15 = scalar_lea.vmem %s8990_s3, 32 }
 0x203   : > { %p8044_p5 = scmp.ne.s32.totalorder %s8990_s3, %s8043_s4  ;;  %p8051_p10 = scmp.lt.s32.totalorder %s8990_s3, %s8990_s3 }
 0x204   : > { %p8052_p7 = scmp.lt.s32.totalorder %s8050_s15, %s8043_s4 }
 0x205   : > { %p8046_p6 = pnand %p8044_p5, %p8836_p0 }
 0x206   : > { %p8053_p8 = por %p8052_p7, %p8051_p10 }
 0x207   : > { %p8047_p9 = pneg %p8046_p6 }
 0x209   : > { %p8054_p11 = pnand %p8053_p8, %p8047_p9 }
 0x20b   : > { %8057 = shalt.err (!%p8054_p11)
}
 0x20c   : > { %s9926_s28 = sld [smem:[#allocation61_spill]]  ;;  %s8420_s23 = smov [#allocation22]  }
 0x20d   : > { %7146 = dma.hbm_to_vmem [thread:$0]  (!%p8824_p12), %s9925_s17, 16, %s8990_s3, [#allocation18]  }
 0x20e   : > { %s1684_s16 = sshll.u32 %s8420_s23, 4  ;;  %s8421_s18 = smov [#allocation25]   ;;  %s1685_s16 = int_to_ptr.vmem [resolvable:$true] %s1684_s16 }
 0x20f   : > { %s1715_s6 = sshll.u32 %s8421_s18, 4  ;;  %s9018_s6 = int_to_ptr.vmem [resolvable:$true] %s1715_s6 }
 0x212   : > { %s9927_s25 = smov %s9926_s28  ;;  %s8058_s4 = scalar_lea.hbm %s9926_s28, 16 }
 0x213   : > { %p8059_p13 = scmp.ne.s32.totalorder %s9927_s25, %s8058_s4  ;;  %p8065_p3 = scmp.lt.u32.totalorder %s8058_s4, %s9927_s25 }
 0x215   : > { %p8061_p1 = pnand %p8059_p13, %p8836_p0 }
 0x217   : > { %p8062_p2 = pneg %p8061_p1 }
 0x219   : > { %p8067_p4 = pnand %p8065_p3, %p8062_p2 }
 0x21b   : > { %8070 = shalt.err (!%p8067_p4)
}
 0x21c   : > { %s8071_s15 = scalar_lea.vmem %s1685_s16, 16  ;;  %s8078_s3 = scalar_lea.vmem %s1685_s16, 32 }
 0x21d   : > { %p8072_p5 = scmp.ne.s32.totalorder %s1685_s16, %s8071_s15  ;;  %p8079_p10 = scmp.lt.s32.totalorder %s1685_s16, %s1685_s16 }
 0x21e   : > { %p8080_p7 = scmp.lt.s32.totalorder %s8078_s3, %s8071_s15 }
 0x21f   : > { %p8074_p6 = pnand %p8072_p5, %p8836_p0 }
 0x220   : > { %p8081_p8 = por %p8080_p7, %p8079_p10 }
 0x221   : > { %p8075_p9 = pneg %p8074_p6 }
 0x223   : > { %p8082_p11 = pnand %p8081_p8, %p8075_p9 }
 0x225   : > { %8085 = shalt.err (!%p8082_p11)
}
 0x226   : > { %s9928_s28 = sld [smem:[#allocation66_spill]] }
 0x227   : > { %7152 = dma.hbm_to_vmem [thread:$0]  (!%p8824_p12), %s9927_s25, 16, %s1685_s16, [#allocation21]  }
 0x22c   : > { %s9929_s23 = smov %s9928_s28  ;;  %s8086_s18 = scalar_lea.hbm %s9928_s28, 16 }
 0x22d   : > { %p8087_p13 = scmp.ne.s32.totalorder %s9929_s23, %s8086_s18  ;;  %p8093_p3 = scmp.lt.u32.totalorder %s8086_s18, %s9929_s23 }
 0x22f   : > { %p8089_p1 = pnand %p8087_p13, %p8836_p0 }
 0x231   : > { %p8090_p2 = pneg %p8089_p1 }
 0x233   : > { %p8095_p4 = pnand %p8093_p3, %p8090_p2 }
 0x235   : > { %8098 = shalt.err (!%p8095_p4)
}
 0x236   : > { %s8099_s4 = scalar_lea.vmem %s9018_s6, 16  ;;  %s8106_s15 = scalar_lea.vmem %s9018_s6, 32 }
 0x237   : > { %p8100_p5 = scmp.ne.s32.totalorder %s9018_s6, %s8099_s4  ;;  %p8107_p10 = scmp.lt.s32.totalorder %s9018_s6, %s9018_s6 }
 0x238   : > { %p8108_p7 = scmp.lt.s32.totalorder %s8106_s15, %s8099_s4 }
 0x239   : > { %p8102_p6 = pnand %p8100_p5, %p8836_p0 }
 0x23a   : > { %p8109_p8 = por %p8108_p7, %p8107_p10 }
 0x23b   : > { %p8103_p9 = pneg %p8102_p6 }
 0x23d   : > { %p8110_p11 = pnand %p8109_p8, %p8103_p9 }
 0x23f   : > { %8113 = shalt.err (!%p8110_p11)
}
 0x240   : > { %s9930_s16 = sld [smem:[#allocation70_spill]]  ;;  %s8422_s3 = smov [#allocation28]  }
 0x241   : > { %7158 = dma.hbm_to_vmem [thread:$0]  (!%p8824_p12), %s9929_s23, 16, %s9018_s6, [#allocation24]  }
 0x242   : > { %s1743_s28 = sshll.u32 %s8422_s3, 4  ;;  %s8423_s18 = smov [#allocation31]   ;;  %s1744_s28 = int_to_ptr.vmem [resolvable:$true] %s1743_s28 }
 0x243   : > { %s1765_s8 = sshll.u32 %s8423_s18, 4  ;;  %s9046_s8 = int_to_ptr.vmem [resolvable:$true] %s1765_s8 }
 0x246   : > { %s8114_s4 = scalar_lea.hbm %s9930_s16, 16 }
 0x247   : > { %p8115_p13 = scmp.ne.s32.totalorder %s9930_s16, %s8114_s4  ;;  %p8121_p3 = scmp.lt.u32.totalorder %s8114_s4, %s9930_s16 }
 0x249   : > { %p8117_p1 = pnand %p8115_p13, %p8836_p0 }
 0x24b   : > { %p8118_p2 = pneg %p8117_p1 }
 0x24d   : > { %p8123_p4 = pnand %p8121_p3, %p8118_p2 }
 0x24f   : > { %8126 = shalt.err (!%p8123_p4)
}
 0x250   : > { %s8127_s15 = scalar_lea.vmem %s1744_s28, 16  ;;  %s8134_s6 = scalar_lea.vmem %s1744_s28, 32 }
 0x251   : > { %p8128_p5 = scmp.ne.s32.totalorder %s1744_s28, %s8127_s15  ;;  %p8135_p10 = scmp.lt.s32.totalorder %s1744_s28, %s1744_s28 }
 0x252   : > { %p8136_p7 = scmp.lt.s32.totalorder %s8134_s6, %s8127_s15 }
 0x253   : > { %p8130_p6 = pnand %p8128_p5, %p8836_p0 }
 0x254   : > { %p8137_p8 = por %p8136_p7, %p8135_p10 }
 0x255   : > { %p8131_p9 = pneg %p8130_p6 }
 0x257   : > { %p8138_p11 = pnand %p8137_p8, %p8131_p9 }
 0x259   : > { %8141 = shalt.err (!%p8138_p11)
}
 0x25a   : > { %s9931_s3 = sld [smem:[#allocation71_spill]] }
 0x25b   : > { %7164 = dma.hbm_to_vmem [thread:$0]  (!%p8824_p12), %s9930_s16, 16, %s1744_s28, [#allocation27]  }
 0x260   : > { %s8142_s18 = scalar_lea.hbm %s9931_s3, 16 }
 0x261   : > { %p8143_p13 = scmp.ne.s32.totalorder %s9931_s3, %s8142_s18  ;;  %p8149_p3 = scmp.lt.u32.totalorder %s8142_s18, %s9931_s3 }
 0x263   : > { %p8145_p1 = pnand %p8143_p13, %p8836_p0 }
 0x265   : > { %p8146_p2 = pneg %p8145_p1 }
 0x267   : > { %p8151_p4 = pnand %p8149_p3, %p8146_p2 }
 0x269   : > { %8154 = shalt.err (!%p8151_p4)
}
 0x26a   : > { %s8155_s4 = scalar_lea.vmem %s9046_s8, 16  ;;  %s8162_s15 = scalar_lea.vmem %s9046_s8, 32 }
 0x26b   : > { %p8156_p5 = scmp.ne.s32.totalorder %s9046_s8, %s8155_s4  ;;  %p8163_p10 = scmp.lt.s32.totalorder %s9046_s8, %s9046_s8 }
 0x26c   : > { %p8164_p7 = scmp.lt.s32.totalorder %s8162_s15, %s8155_s4 }
 0x26d   : > { %p8158_p6 = pnand %p8156_p5, %p8836_p0 }
 0x26e   : > { %p8165_p8 = por %p8164_p7, %p8163_p10 }
 0x26f   : > { %p8159_p9 = pneg %p8158_p6 }
 0x271   : > { %p8166_p11 = pnand %p8165_p8, %p8159_p9 }
 0x273   : > { %8169 = shalt.err (!%p8166_p11)
}
 0x274   : > { %s9932_s28 = sld [smem:[#allocation73_spill]]  ;;  %s8424_s18 = smov [#allocation34]  }
 0x275   : > { %7170 = dma.hbm_to_vmem [thread:$0]  (!%p8824_p12), %s9931_s3, 16, %s9046_s8, [#allocation30]  }
 0x276   : > { %s1787_s9 = sshll.u32 %s8424_s18, 4  ;;  %s8425_s11 = smov [#allocation35]   ;;  %s1788_s9 = int_to_ptr.vmem [resolvable:$true] %s1787_s9 }
 0x277   : > { %s1891_s12 = sshll.u32 %s8425_s11, 4  ;;  %s9074_s12 = int_to_ptr.vmem [resolvable:$true] %s1891_s12 }
 0x27a   : > { %s9933_s6 = smov %s9932_s28  ;;  %s8170_s4 = scalar_lea.hbm %s9932_s28, 16 }
 0x27b   : > { %p8171_p13 = scmp.ne.s32.totalorder %s9933_s6, %s8170_s4  ;;  %p8177_p3 = scmp.lt.u32.totalorder %s8170_s4, %s9933_s6 }
 0x27d   : > { %p8173_p1 = pnand %p8171_p13, %p8836_p0 }
 0x27f   : > { %p8174_p2 = pneg %p8173_p1 }
 0x281   : > { %p8179_p4 = pnand %p8177_p3, %p8174_p2 }
 0x283   : > { %8182 = shalt.err (!%p8179_p4)
}
 0x284   : > { %s8183_s15 = scalar_lea.vmem %s1788_s9, 16  ;;  %s8190_s8 = scalar_lea.vmem %s1788_s9, 32 }
 0x285   : > { %p8184_p5 = scmp.ne.s32.totalorder %s1788_s9, %s8183_s15  ;;  %p8191_p10 = scmp.lt.s32.totalorder %s1788_s9, %s1788_s9 }
 0x286   : > { %p8192_p7 = scmp.lt.s32.totalorder %s8190_s8, %s8183_s15 }
 0x287   : > { %p8186_p6 = pnand %p8184_p5, %p8836_p0 }
 0x288   : > { %p8193_p8 = por %p8192_p7, %p8191_p10 }
 0x289   : > { %p8187_p9 = pneg %p8186_p6 }
 0x28b   : > { %p8194_p11 = pnand %p8193_p8, %p8187_p9 }
 0x28d   : > { %8197 = shalt.err (!%p8194_p11)
}
 0x28e   : > { %s9934_s11 = sld [smem:[#allocation105_spill]] }
 0x28f   : > { %7176 = dma.hbm_to_vmem [thread:$0]  (!%p8824_p12), %s9933_s6, 16, %s1788_s9, [#allocation33]  }
 0x294   : > { %s8198_s28 = scalar_lea.hbm %s9934_s11, 16 }
 0x295   : > { %p8199_p13 = scmp.ne.s32.totalorder %s9934_s11, %s8198_s28  ;;  %p8205_p3 = scmp.lt.u32.totalorder %s8198_s28, %s9934_s11 }
 0x297   : > { %p8201_p1 = pnand %p8199_p13, %p8836_p0 }
 0x299   : > { %p8202_p2 = pneg %p8201_p1 }
 0x29b   : > { %p8207_p4 = pnand %p8205_p3, %p8202_p2 }
 0x29d   : > { %8210 = shalt.err (!%p8207_p4)
}
 0x29e   : > { %s8211_s18 = scalar_lea.vmem %s9074_s12, 16  ;;  %s8218_s4 = scalar_lea.vmem %s9074_s12, 32 }
 0x29f   : > { %p8212_p5 = scmp.ne.s32.totalorder %s9074_s12, %s8211_s18  ;;  %p8219_p10 = scmp.lt.s32.totalorder %s9074_s12, %s9074_s12 }
 0x2a0   : > { %p8220_p7 = scmp.lt.s32.totalorder %s8218_s4, %s8211_s18 }
 0x2a1   : > { %p8214_p6 = pnand %p8212_p5, %p8836_p0 }
 0x2a2   : > { %p8221_p8 = por %p8220_p7, %p8219_p10 }
 0x2a3   : > { %p8215_p9 = pneg %p8214_p6 }
 0x2a5   : > { %p8222_p11 = pnand %p8221_p8, %p8215_p9 }
 0x2a7   : > { %8225 = shalt.err (!%p8222_p11)
}
 0x2a8   : > { %7179 = dma.hbm_to_vmem [thread:$0]  (!%p8824_p12), %s9934_s11, 16, %s9074_s12, [#allocation36]  }
 0x2a9   : > { %p9935_p13 = scmp.ne.s32.totalorder %s9921_s26, 0 }
 0x2aa   : > { %p9936_p1 = scmp.eq.s32.totalorder (!%p9935_p13), %s8788_s7, 0 }
 0x2ab   : > { %1924 = sbr.rel (%p9935_p13) target bundleno = 13210 (0x339a), region = 276 }
 0x2b2   : > { %8271 = dma.done.wait (%p9936_p1), [#allocation3], 16   ;;  %p9937_p0 = pmov %p9936_p1 }
 0x2b4   : > { %8273 = vsyncadd (%p9937_p0), [#allocation3], 4294967280  ;;  %p9938_p2 = pmov %p9937_p0 }
 0x2b5   : > { %p9939_p3 = pmov %p9937_p0 }
 0x2b6   : > { %8275 = dma.done.wait (%p9938_p2), [#allocation6], 32  }
 0x2b7   : > { %8277 = vsyncadd (%p9939_p3), [#allocation6], 4294967264  ;;  %p9940_p4 = pmov %p9937_p0 }
 0x2b8   : > { %p9941_p12 = pmov %p9937_p0 }
 0x2b9   : > { %8279 = dma.done.wait (%p9940_p4), [#allocation9], 32  }
 0x2ba   : > { %8281 = vsyncadd (%p9941_p12), [#allocation9], 4294967264  ;;  %p9942_p5 = pmov %p9937_p0 }
 0x2bb   : > { %p9943_p6 = pmov %p9937_p0 }
 0x2bc   : > { %8283 = dma.done.wait (%p9942_p5), [#allocation12], 144  }
 0x2bd   : > { %8285 = vsyncadd (%p9943_p6), [#allocation12], 4294967152  ;;  %p9944_p9 = pmov %p9937_p0 }
 0x2be   : > { %p9945_p10 = pmov %p9937_p0 }
 0x2bf   : > { %8287 = dma.done.wait (%p9944_p9), [#allocation15], 32  }
 0x2c0   : > { %8289 = vsyncadd (%p9945_p10), [#allocation15], 4294967264  ;;  %p9946_p7 = pmov %p9937_p0 }
 0x2c1   : > { %p9947_p8 = pmov %p9937_p0 }
 0x2c2   : > { %8291 = dma.done.wait (%p9946_p7), [#allocation18], 32  }
 0x2c3   : > { %8293 = vsyncadd (%p9947_p8), [#allocation18], 4294967264  ;;  %p9948_p11 = pmov %p9937_p0 }
 0x2c4   : > { %p9949_p13 = pmov %p9937_p0 }
 0x2c5   : > { %8295 = dma.done.wait (%p9948_p11), [#allocation21], 32  }
 0x2c6   : > { %8297 = vsyncadd (%p9949_p13), [#allocation21], 4294967264  ;;  %p9950_p1 = pmov %p9937_p0 }
 0x2c8   : > { %8299 = dma.done.wait (%p9950_p1), [#allocation24], 32  }
 0x2c9   : > { %8301 = vsyncadd (%p9937_p0), [#allocation24], 4294967264  ;;  %p9951_p2 = pmov %p9937_p0 }
 0x2ca   : > { %p9952_p3 = pmov %p9937_p0 }
 0x2cb   : > { %8303 = dma.done.wait (%p9951_p2), [#allocation27], 32  }
 0x2cc   : > { %8305 = vsyncadd (%p9952_p3), [#allocation27], 4294967264  ;;  %p9953_p4 = pmov %p9937_p0 }
 0x2cd   : > { %p9954_p12 = pmov %p9937_p0 }
 0x2ce   : > { %8307 = dma.done.wait (%p9953_p4), [#allocation30], 32  }
 0x2cf   : > { %8309 = vsyncadd (%p9954_p12), [#allocation30], 4294967264  ;;  %p9955_p5 = pmov %p9937_p0 }
 0x2d0   : > { %p9956_p6 = pmov %p9937_p0 }
 0x2d1   : > { %8311 = dma.done.wait (%p9955_p5), [#allocation33], 32  }
 0x2d2   : > { %8313 = vsyncadd (%p9956_p6), [#allocation33], 4294967264  ;;  %p9957_p9 = pmov %p9937_p0 }
 0x2d3   : > { %p9958_p10 = pmov %p9937_p0 }
 0x2d4   : > { %8315 = dma.done.wait (%p9957_p9), [#allocation36], 16  }
 0x2d5   : > { %8317 = vsyncadd (%p9958_p10), [#allocation36], 4294967280  ;;  %s9959_s9 = sld [smem:[#allocation51_spill]]  ;;  %p2153_p7 = scmp.lt.s32.totalorder %s8788_s7, 1  ;;  %v8426_v0 = vmov 0.0   ;;  %vm8427_vm0 = vmmov 0  }
 0x2d6   : > { %6729 = vmatprep.subr.bf16.mxu0 %v8426_v0  ;;  %6731 = vmatprep.mubr.msk.bf16.mxu0 %vm8427_vm0, %v8426_v0  ;;  %v7369_v1 = vld [vmem:[#allocation13] sm:$0xff]   ;;  %vm2177_vm1 = vcmask 130048   ;;  %v6375_v5 = vld [vmem:[#allocation8] ss:$0 sm:$0xff]  ;;  %vm2224_vm2 = vcmask 261120   ;;  %s9960_s10 = sld [smem:[#allocation67_spill]] }
 0x2d7   : > { %s2154_s12 = scalar_select %p2153_p7, %s8788_s7, 1  ;;  %6749 = vmatprep.subr.bf16.mxu1 %v8426_v0  ;;  %6751 = vmatprep.mubr.msk.bf16.mxu1 %vm8427_vm0, %v8426_v0  ;;  %v6378_v31 = vld [vmem:[#allocation11] ss:$0 sm:$0xff]  ;;  %v6379_v33 = vld [vmem:[#allocation10] ss:$0 sm:$0xff]  ;;  %vm3662_vm3 = vcmask 523264  }
 0x2d8   : > { %6730 = vmatpush3.bf16.msra.mxu0 %v7369_v1  ;;  %v6380_v62 = vld [vmem:[#allocation16] ss:$0 sm:$0xff]  ;;  %s9824_s15 = smov 80   ;;  %s9827_s8 = smov 96   ;;  %vm3664_vm4 = vcmask 785408   ;;  %vm3690_vm5 = vcmask 1040384  }
 0x2d9   : > { %s6574_s0 = sshll.u32 %s2154_s12, 4  ;;  %6735 = vmatprep.subr.bf16.mxu0 %v8426_v0  ;;  %s9961_s28 = sld [smem:[#allocation68_spill]]  ;;  %vm3692_vm6 = vcmask 1041408   ;;  %vm3694_vm7 = vcmask 1042432   ;;  %vm3698_vm8 = vcmask 1043456   ;;  %vm3834_vm9 = vcmask 519168  }
 0x2da   : > { %s9822_s4 = smov 112   ;;  %s9816_s12 = smov 48   ;;  %vm4021_vm10 = vcmask 27648   ;;  %vm4035_vm11 = vcmask 31744   ;;  %vm4434_vm12 = vcmask 392192  }
 0x2db   : > { %s2157_s26 = scalar_lea.vmem %s9959_s9, %s6574_s0  ;;  %s9820_s9 = smov 64  }
 0x2dc   : > { %v2159_v2 = vld [vmem:[%s2157_s26] sm:$0xff]  ;;  %v2160_v3 = vld [vmem:[%s2157_s26 + $0x8] sm:$0xff]  ;;  %s9963_s0 = sld [smem:[#allocation65_spill]]  ;;  %s9974_s3 = smov 80  }
 0x2dd   : > { %v2163_v4 = vpack.c.bf16 %v2160_v3, %v2159_v2  ;;  %v7370_v52 = vld [vmem:[%s9960_s10] sm:$0xff]   ;;  %v7371_v53 = vld [vmem:[%s9960_s10 + $0x8] sm:$0xff]   ;;  %v6381_v3 = vld [vmem:[#allocation14] ss:$0 sm:$0xff]  ;;  %s9979_s6 = sld [smem:[#allocation76_spill]]  ;;  %s9984_s10 = sld [smem:[#allocation83_spill]] }
 0x2de   : > { %s9986_s11 = sld [smem:[#allocation81_spill]]  ;;  %s9998_s13 = sld [smem:[#allocation91_spill]] }
 0x2df   : > { %6732 = vmatmul.mubr.msk.bf16.vlgmr.msra.gmra.mrb[0].mxu0 %vm2177_vm1, %v2163_v4  ;;  %s9962_s18 = smov %s9961_s28  ;;  %s10003_s5 = sld [smem:[#allocation107_spill]] }
 0x2e0   : > { %6739 = vmatprep.mubr.msk.bf16.mxu0 %vm8427_vm0, %v8426_v0  ;;  %6736 = vmatpush3.bf16.msra.mxu0 %v7370_v52  ;;  %p10013_p11 = scmp.ne.s32.totalorder %s9918_s22, 0 }
 0x2e1   : > { %6737 = vmatprep.subr.bf16.mxu0 %v8426_v0 }
 0x2e2   : > { %s9964_s26 = smov %s9963_s0 }
 0x2e4   : > { %6738 = vmatpush3.bf16.msra.mxu0 %v7371_v53 }
 0x2e5   : > { %6743 = vmatprep.subr.bf16.mxu0 %v8426_v0 }
 0x3b2   : > { %v2215_v6 = vpop.f32.mrb[0].mxu0 }
 0x3b3   : > { %v2216_v7 = vadd.f32 %v6375_v5, %v2215_v6  ;;  %v6733_v8 = vpop.f32.mrb[1].mxu0 }
 0x3b4   : > { %v2218_v9 = vpop.f32.mrb[2].mxu0  ;;  %v6382_v8 = vld [vmem:[#allocation25] ss:$0 sm:$0xff] }
 0x3b5   : > { %v2219_v10 = vadd.f32 %v6375_v5, %v2218_v9  ;;  %v6734_v11 = vpop.f32.mrb[3].mxu0  ;;  %v2225_v12 = vsel %vm2224_vm2, %v2216_v7, 0.0 }
 0x3b6   : > { %2226 = vadd.xlane.f32.xlu0 %v2225_v12 }
 0x3b7   : > { %v2228_v13 = vsel %vm2224_vm2, %v2219_v10, 0.0 }
 0x3ba   : > { %2229 = vadd.xlane.f32.xlu0 %v2228_v13 }
 0x443   : > { %v2227_v14 = vpop.xlane.xlu0 %2226 }
 0x444   : > { %v2232_v15 = vmul.f32 0.03125, %v2227_v14 }
 0x446   : > { %v2234_v16 = vsub.f32 %v2216_v7, %v2232_v15 }
 0x447   : > { %v2230_v17 = vpop.xlane.xlu0 %2229 }
 0x448   : > { %v2233_v18 = vmul.f32 0.03125, %v2230_v17  ;;  %v2236_v19 = vmul.f32 %v2234_v16, %v2234_v16 }
 0x44a   : > { %v2235_v20 = vsub.f32 %v2219_v10, %v2233_v18  ;;  %v2238_v21 = vsel %vm2224_vm2, %v2236_v19, 0.0 }
 0x44b   : > { %2239 = vadd.xlane.f32.xlu1 %v2238_v21 }
 0x44c   : > { %v2237_v22 = vmul.f32 %v2235_v20, %v2235_v20 }
 0x44e   : > { %v2241_v23 = vsel %vm2224_vm2, %v2237_v22, 0.0 }
 0x44f   : > { %2242 = vadd.xlane.f32.xlu1 %v2241_v23 }
 0x4d8   : > { %v2240_v24 = vpop.xlane.xlu1 %2239 }
 0x4d9   : > { %v2244_v25 = vmul.f32 0.03125, %v2240_v24  ;;  %v2384_v24 = vld [vmem:[%s9961_s28] sm:$0xff]  ;;  %s9818_s28 = smov 16  }
 0x4db   : > { %v2246_v26 = vadd.f32 1e-05, %v2244_v25 }
 0x4dc   : > { %v2243_v27 = vpop.xlane.xlu1 %2242 }
 0x4dd   : > { %7498 = vrsqrt.f32 %v2246_v26  ;;  %v2245_v28 = vmul.f32 0.03125, %v2243_v27  ;;  %v2385_v26 = vld [vmem:[%s9962_s18 + $0x8] sm:$0xff] }
 0x4df   : > { %v2247_v29 = vadd.f32 1e-05, %v2245_v28 }
 0x4e1   : > { %7500 = vrsqrt.f32 %v2247_v29 }
 0x4e7   : > { %v7499_v30 = vpop.eup %7498 }
 0x4e8   : > { %v2250_v32 = vmul.f32 %v7499_v30, %v2234_v16 }
 0x4ea   : > { %v2258_v34 = vmul.f32 %v6378_v31, %v2250_v32 }
 0x4eb   : > { %v7501_v35 = vpop.eup %7500 }
 0x4ec   : > { %v9169_v36 = vadd.f32 %v6379_v33, %v2258_v34  ;;  %v2251_v37 = vmul.f32 %v7501_v35, %v2235_v20  ;;  %v6388_v34 = vld [vmem:[%s9962_s18 + $0x10] sm:$0xff] }
 0x4ee   : > { %v2270_v38 = vsel %vm2224_vm2, %v9169_v36, 0.0  ;;  %v2259_v39 = vmul.f32 %v6378_v31, %v2251_v37  ;;  %v6389_v37 = vld [vmem:[%s9962_s18 + $0x18] sm:$0xff] }
 0x4ef   : > { %2271 = vadd.xlane.f32.xlu0 %v2270_v38 }
 0x4f0   : > { %v9173_v40 = vadd.f32 %v6379_v33, %v2259_v39 }
 0x4f2   : > { %v2273_v41 = vsel %vm2224_vm2, %v9173_v40, 0.0 }
 0x4f3   : > { %2274 = vadd.xlane.f32.xlu1 %v2273_v41 }
 0x57c   : > { %v2272_v42 = vpop.xlane.xlu0 %2271 }
 0x57d   : > { %v2276_v43 = vmul.f32 0.03125, %v2272_v42 }
 0x57f   : > { %v2278_v44 = vsub.f32 %v9169_v36, %v2276_v43 }
 0x580   : > { %v2275_v45 = vpop.xlane.xlu1 %2274 }
 0x581   : > { %v2277_v46 = vmul.f32 0.03125, %v2275_v45  ;;  %v2280_v47 = vmul.f32 %v2278_v44, %v2278_v44 }
 0x583   : > { %v2279_v48 = vsub.f32 %v9173_v40, %v2277_v46  ;;  %v2282_v49 = vsel %vm2224_vm2, %v2280_v47, 0.0 }
 0x584   : > { %2283 = vadd.xlane.f32.xlu0 %v2282_v49 }
 0x585   : > { %v2281_v50 = vmul.f32 %v2279_v48, %v2279_v48 }
 0x587   : > { %v2285_v51 = vsel %vm2224_vm2, %v2281_v50, 0.0 }
 0x588   : > { %2286 = vadd.xlane.f32.xlu1 %v2285_v51 }
 0x611   : > { %v2284_v54 = vpop.xlane.xlu0 %2283 }
 0x612   : > { %v2288_v55 = vmul.f32 0.03125, %v2284_v54 }
 0x614   : > { %v2290_v56 = vadd.f32 1e-05, %v2288_v55 }
 0x615   : > { %v2287_v57 = vpop.xlane.xlu1 %2286 }
 0x616   : > { %7502 = vrsqrt.f32 %v2290_v56  ;;  %v2289_v58 = vmul.f32 0.03125, %v2287_v57 }
 0x618   : > { %v2291_v59 = vadd.f32 1e-05, %v2289_v58 }
 0x61a   : > { %7504 = vrsqrt.f32 %v2291_v59 }
 0x620   : > { %v7503_v60 = vpop.eup %7502 }
 0x621   : > { %v2294_v61 = vmul.f32 %v7503_v60, %v2278_v44 }
 0x623   : > { %v2302_v1 = vmul.f32 %v6380_v62, %v2294_v61 }
 0x624   : > { %v7505_v63 = vpop.eup %7504 }
 0x625   : > { %v2295_v2 = vmul.f32 %v7505_v63, %v2279_v48  ;;  %v2310_v5 = vadd.f32 %v6381_v3, %v2302_v1 }
 0x627   : > { %v2303_v4 = vmul.f32 %v6380_v62, %v2295_v2 }
 0x629   : > { %v2311_v6 = vadd.f32 %v6381_v3, %v2303_v4 }
 0x62b   : > { %v2316_v7 = vpack.c.bf16 %v2311_v6, %v2310_v5 }
 0x62d   : > { %6740 = vmatmul.mubr.msk.bf16.vlgmr.msra.gmra.mrb[4].mxu0 %vm2224_vm2, %v2316_v7 }
 0x62e   : > { %6745 = vmatprep.mubr.msk.bf16.mxu0 %vm8427_vm0, %v8426_v0 }
 0x700   : > { %v2373_v9 = vpop.f32.mrb[4].mxu0 }
 0x701   : > { %v2374_v10 = vadd.f32 %v6382_v8, %v2373_v9  ;;  %v6741_v11 = vpop.f32.mrb[5].mxu0 }
 0x702   : > { %v2376_v12 = vpop.f32.mrb[6].mxu0 }
 0x703   : > { %v2377_v13 = vadd.f32 %v6382_v8, %v2376_v12  ;;  %v6742_v14 = vpop.f32.mrb[7].mxu0  ;;  %v2380_v15 = vmul.f32 0.25, %v2374_v10 }
 0x705   : > { %v2381_v16 = vmul.f32 0.25, %v2377_v13  ;;  %v9188_v17 = vpack.c.bf16 %v2377_v13, %v2374_v10 }
 0x707   : > { %2512 = vrot.lane.b32.xlu1 %v9188_v17, %s9824_s15  ;;  %2387 = vrot.lane.b32.xlu0 %v9188_v17, %s9827_s8  ;;  %v2382_v18 = vpack.c.bf16 %v2381_v16, %v2380_v15 }
 0x70b   : > { %2510 = vrot.lane.b32.xlu1 %v2382_v18, %s9822_s4 }
 0x779   : > { %v2388_v19 = vpop.permute.xlu0 %2387  ;;  %v2513_v21 = vpop.permute.xlu1 %2512 }
 0x77a   : > { %v2393_v20 = vsel %vm2177_vm1, %v2388_v19, 0  ;;  %v2518_v22 = vsel %vm2177_vm1, %v2513_v21, 0  ;;  %v7372_v19 = vld [vmem:[%s9963_s0] sm:$0xff]   ;;  %s9965_s0 = sld [smem:[#allocation62_spill]] }
 0x77b   : > { %6744 = vmatpush3.bf16.xpose.msra.mxu0 %v2393_v20 }
 0x77c   : > { %6755 = vmatprep.subr.bf16.mxu0 %v8426_v0 }
 0x77d   : > { %v2511_v23 = vpop.permute.xlu1 %2510 }
 0x782   : > { %6746 = vmatmul.mubr.msk.bf16.vlgmr.msra.gmra.mrb[8].mxu0 %vm2177_vm1, %v2382_v18 }
 0x783   : > { %6756 = vmatpush3.bf16.xpose.msra.mxu0 %v2518_v22  ;;  %6757 = vmatprep.mubr.msk.bf16.mxu0 %vm8427_vm0, %v8426_v0 }
 0x784   : > { %6767 = vmatprep.subr.bf16.mxu0 %v8426_v0 }
 0x78a   : > { %6758 = vmatmul.mubr.msk.bf16.vlgmr.msra.gmra.mrb[12].mxu0 %vm2177_vm1, %v2511_v23 }
 0x78b   : > { %6771 = vmatprep.mubr.msk.bf16.mxu0 %vm8427_vm0, %v8426_v0  ;;  %6768 = vmatpush3.bf16.msra.mxu0 %v7372_v19 }
 0x78c   : > { %6769 = vmatprep.subr.bf16.mxu0 %v8426_v0 }
 0x855   : > { %v2429_v25 = vpop.f32.mrb[8].mxu0 }
 0x856   : > { %v2430_v27 = vadd.f32 %v2429_v25, %v2384_v24  ;;  %v6747_v28 = vpop.f32.mrb[9].mxu0  ;;  %v7373_v24 = vld [vmem:[%s9964_s26 + $0x8] sm:$0xff]  }
 0x857   : > { %v2432_v29 = vpop.f32.mrb[10].mxu0  ;;  %6770 = vmatpush3.bf16.msra.mxu0 %v7373_v24 }
 0x858   : > { %v2433_v30 = vadd.f32 %v2432_v29, %v2385_v26  ;;  %v6748_v31 = vpop.f32.mrb[11].mxu0  ;;  %v2436_v32 = vsel %vm2177_vm1, %v2430_v27, -inf  ;;  %6783 = vmatprep.subr.bf16.mxu0 %v8426_v0 }
 0x859   : > { %2437 = vmax.xlane.f32.xlu1 %v2436_v32 }
 0x85a   : > { %v2439_v33 = vsel %vm2177_vm1, %v2433_v30, -inf }
 0x85b   : > { %2440 = vmax.xlane.f32.xlu0 %v2439_v33 }
 0x85d   : > { %v2554_v35 = vpop.f32.mrb[12].mxu0 }
 0x85e   : > { %v2555_v38 = vadd.f32 %v6388_v34, %v2554_v35  ;;  %v6759_v39 = vpop.f32.mrb[13].mxu0 }
 0x85f   : > { %v2557_v41 = vpop.f32.mrb[14].mxu0 }
 0x860   : > { %v2558_v42 = vadd.f32 %v6389_v37, %v2557_v41  ;;  %v6760_v43 = vpop.f32.mrb[15].mxu0  ;;  %v2561_v44 = vsel %vm2177_vm1, %v2555_v38, -inf  ;;  %v6392_v37 = vld [vmem:[#allocation23] ss:$0 sm:$0xff] }
 0x861   : > { %2562 = vmax.xlane.f32.xlu0 %v2561_v44 }
 0x862   : > { %v2564_v45 = vsel %vm2177_vm1, %v2558_v42, -inf }
 0x865   : > { %2565 = vmax.xlane.f32.xlu0 %v2564_v45 }
 0x8e6   : > { %v2438_v46 = vpop.xlane.xlu1 %2437 }
 0x8e7   : > { %v2442_v47 = vsub.f32 %v2430_v27, %v2438_v46 }
 0x8e8   : > { %v2441_v48 = vpop.xlane.xlu0 %2440 }
 0x8e9   : > { %v2444_v49 = vmul.f32 1.442695, %v2442_v47  ;;  %v2443_v50 = vsub.f32 %v2433_v30, %v2441_v48 }
 0x8eb   : > { %7506 = vpow2.f32 %v2444_v49  ;;  %v2446_v51 = vmul.f32 1.442695, %v2443_v50 }
 0x8ed   : > { %7508 = vpow2.f32 %v2446_v51 }
 0x8ee   : > { %v2563_v52 = vpop.xlane.xlu0 %2562 }
 0x8ef   : > { %v2567_v53 = vsub.f32 %v2555_v38, %v2563_v52 }
 0x8f1   : > { %v2569_v54 = vmul.f32 1.442695, %v2567_v53 }
 0x8f2   : > { %v2566_v55 = vpop.xlane.xlu0 %2565 }
 0x8f3   : > { %7510 = vpow2.f32 %v2569_v54  ;;  %v2568_v56 = vsub.f32 %v2558_v42, %v2566_v55 }
 0x8f5   : > { %v7507_v57 = vpop.eup %7506  ;;  %v2571_v58 = vmul.f32 1.442695, %v2568_v56 }
 0x8f6   : > { %v2448_v59 = vsel %vm2177_vm1, %v7507_v57, 0.0 }
 0x8f7   : > { %v7509_v60 = vpop.eup %7508  ;;  %7512 = vpow2.f32 %v2571_v58  ;;  %2449 = vadd.xlane.f32.xlu1 %v2448_v59 }
 0x8f8   : > { %v2451_v61 = vsel %vm2177_vm1, %v7509_v60, 0.0 }
 0x8f9   : > { %2452 = vadd.xlane.f32.xlu0 %v2451_v61 }
 0x8fd   : > { %v7511_v62 = vpop.eup %7510 }
 0x8fe   : > { %v2573_v63 = vsel %vm2177_vm1, %v7511_v62, 0.0 }
 0x8ff   : > { %2574 = vadd.xlane.f32.xlu1 %v2573_v63 }
 0x901   : > { %v7513_v1 = vpop.eup %7512 }
 0x902   : > { %v2576_v2 = vsel %vm2177_vm1, %v7513_v1, 0.0 }
 0x903   : > { %2577 = vadd.xlane.f32.xlu0 %v2576_v2 }
 0x910   : > { %2459 = vrot.lane.b32.xlu1 %v9188_v17, %s9820_s9 }
 0x919   : > { %2584 = vrot.lane.b32.xlu0 %v9188_v17, %s9816_s12  ;;  %s9966_s12 = smov %s9965_s0 }
 0x91a   : > { %v7375_v58 = vld [vmem:[%s9966_s12 + $0x8] sm:$0xff]   ;;  %s9987_s12 = sld [smem:[#allocation95_spill]] }
 0x984   : > { %v2450_v3 = vpop.xlane.xlu1 %2449 }
 0x985   : > { %7514 = vrcp.f32 %v2450_v3  ;;  %v6396_v3 = vld [vmem:[#allocation19] ss:$0 sm:$0xff] }
 0x986   : > { %v2453_v4 = vpop.xlane.xlu0 %2452 }
 0x987   : > { %7516 = vrcp.f32 %v2453_v4 }
 0x98c   : > { %v2575_v5 = vpop.xlane.xlu1 %2574 }
 0x98d   : > { %7518 = vrcp.f32 %v2575_v5 }
 0x98f   : > { %v7515_v6 = vpop.eup %7514 }
 0x990   : > { %v2460_v7 = vpop.permute.xlu1 %2459  ;;  %v2578_v8 = vpop.xlane.xlu0 %2577  ;;  %v2456_v10 = vmul.f32 %v7515_v6, %v7507_v57  ;;  %v7374_v57 = vld [vmem:[%s9965_s0] sm:$0xff]   ;;  %s9971_s0 = sld [smem:[#allocation78_spill]] }
 0x991   : > { %v7517_v9 = vpop.eup %7516  ;;  %7520 = vrcp.f32 %v2578_v8  ;;  %6750 = vmatpush3.bf16.msra.mxu1 %v2460_v7  ;;  %v6397_v8 = vld [vmem:[#allocation17] ss:$0 sm:$0xff] }
 0x992   : > { %6761 = vmatprep.subr.bf16.mxu1 %v8426_v0  ;;  %v2457_v11 = vmul.f32 %v7517_v9, %v7509_v60 }
 0x994   : > { %v2585_v12 = vpop.permute.xlu0 %2584  ;;  %v2458_v13 = vpack.c.bf16 %v2457_v11, %v2456_v10 }
 0x996   : > { %6752 = vmatmul.mubr.msk.bf16.vlgmr.msra.gmra.mrb[0].mxu1 %vm2177_vm1, %v2458_v13 }
 0x997   : > { %6762 = vmatpush3.bf16.msra.mxu1 %v2585_v12  ;;  %6763 = vmatprep.mubr.msk.bf16.mxu1 %vm8427_vm0, %v8426_v0  ;;  %v7519_v14 = vpop.eup %7518 }
 0x998   : > { %6775 = vmatprep.subr.bf16.mxu1 %v8426_v0  ;;  %v2581_v16 = vmul.f32 %v7519_v14, %v7511_v62 }
 0x99b   : > { %v7521_v15 = vpop.eup %7520 }
 0x99c   : > { %v2582_v17 = vmul.f32 %v7521_v15, %v7513_v1 }
 0x99e   : > { %v2583_v18 = vpack.c.bf16 %v2582_v17, %v2581_v16 }
 0x9a0   : > { %6764 = vmatmul.mubr.msk.bf16.vlgmr.msra.gmra.mrb[4].mxu1 %vm2177_vm1, %v2583_v18 }
 0x9a1   : > { %6779 = vmatprep.mubr.msk.bf16.mxu1 %vm8427_vm0, %v8426_v0  ;;  %6776 = vmatpush3.bf16.msra.mxu1 %v7374_v57 }
 0x9a2   : > { %6777 = vmatprep.subr.bf16.mxu1 %v8426_v0 }
 0x9a5   : > { %6778 = vmatpush3.bf16.msra.mxu1 %v7375_v58 }
 0x9a6   : > { %6803 = vmatprep.subr.bf16.mxu1 %v8426_v0 }
 0xa69   : > { %v2499_v20 = vpop.f32.mrb[0].mxu1 }
 0xa6a   : > { %v6753_v21 = vpop.f32.mrb[1].mxu1 }
 0xa6b   : > { %v2502_v22 = vpop.f32.mrb[2].mxu1  ;;  %v6398_v21 = vld [vmem:[#allocation20] ss:$0 sm:$0xff] }
 0xa6c   : > { %v6754_v23 = vpop.f32.mrb[3].mxu1 }
 0xa73   : > { %v2624_v25 = vpop.f32.mrb[4].mxu1 }
 0xa74   : > { %v6765_v26 = vpop.f32.mrb[5].mxu1 }
 0xa75   : > { %v2627_v27 = vpop.f32.mrb[6].mxu1 }
 0xa76   : > { %v7359_v28 = vpack.i.bf16 %v2627_v27, %v2624_v25  ;;  %v6766_v29 = vpop.f32.mrb[7].mxu1 }
 0xa78   : > { %7360 = vrot.lane.b32.xlu1 %v7359_v28, %s9818_s28  ;;  %s9967_s28 = sld [smem:[#allocation63_spill]] }
 0xa7e   : > { %s9968_s9 = smov %s9967_s28  ;;  %v7376_v13 = vld [vmem:[%s9967_s28] sm:$0xff]   ;;  %s9969_s28 = sld [smem:[#allocation79_spill]] }
 0xa7f   : > { %v7377_v14 = vld [vmem:[%s9968_s9 + $0x8] sm:$0xff]   ;;  %v7378_v15 = vld [vmem:[%s9968_s9 + $0x10] sm:$0xff]   ;;  %v7379_v16 = vld [vmem:[%s9968_s9 + $0x18] sm:$0xff]  }
 0xa80   : > { %v7380_v17 = vld [vmem:[%s9968_s9 + $0x20] sm:$0xff]   ;;  %v7381_v18 = vld [vmem:[%s9968_s9 + $0x28] sm:$0xff]   ;;  %v7382_v19 = vld [vmem:[%s9968_s9 + $0x30] sm:$0xff]  }
 0xa84   : > { %s9970_s4 = smov %s9969_s28 }
 0xaea   : > { %v7361_v30 = vpop.permute.xlu1 %7360 }
 0xaeb   : > { %v7363_v31 = vunpack.i.h.bf16 %v7361_v30  ;;  %v7362_v32 = vunpack.i.l.bf16 %v7361_v30 }
 0xaed   : > { %v2640_v33 = vsel %vm2177_vm1, %v2502_v22, %v7363_v31  ;;  %v2639_v34 = vsel %vm2177_vm1, %v2499_v20, %v7362_v32  ;;  %v7383_v20 = vld [vmem:[%s9968_s9 + $0x38] sm:$0xff]   ;;  %s9980_s9 = smov 16  }
 0xaee   : > { %v2645_v35 = vpack.c.bf16 %v2640_v33, %v2639_v34 }
 0xaf0   : > { %6772 = vmatmul.mubr.msk.bf16.vlgmr.msra.gmra.mrb[16].mxu0 %vm2224_vm2, %v2645_v35 }
 0xaf1   : > { %6799 = vmatprep.mubr.msk.bf16.mxu0 %vm8427_vm0, %v8426_v0  ;;  %6784 = vmatpush3.bf16.msra.mxu0 %v7376_v13 }
 0xaf2   : > { %6785 = vmatprep.subr.bf16.mxu0 %v8426_v0 }
 0xaf5   : > { %6786 = vmatpush3.bf16.msra.mxu0 %v7377_v14  ;;  %v6411_v14 = vld [vmem:[#allocation28] ss:$0 sm:$0xff] }
 0xaf6   : > { %6787 = vmatprep.subr.bf16.mxu0 %v8426_v0 }
 0xaf9   : > { %6788 = vmatpush3.bf16.msra.mxu0 %v7378_v15 }
 0xafa   : > { %6789 = vmatprep.subr.bf16.mxu0 %v8426_v0 }
 0xafd   : > { %6790 = vmatpush3.bf16.msra.mxu0 %v7379_v16 }
 0xafe   : > { %6791 = vmatprep.subr.bf16.mxu0 %v8426_v0 }
 0xb01   : > { %6792 = vmatpush3.bf16.msra.mxu0 %v7380_v17 }
 0xb02   : > { %6793 = vmatprep.subr.bf16.mxu0 %v8426_v0 }
 0xb05   : > { %6794 = vmatpush3.bf16.msra.mxu0 %v7381_v18 }
 0xb06   : > { %6795 = vmatprep.subr.bf16.mxu0 %v8426_v0 }
 0xb09   : > { %6796 = vmatpush3.bf16.msra.mxu0 %v7382_v19  ;;  %v6412_v19 = vld [vmem:[#allocation26] ss:$0 sm:$0xff] }
 0xb0a   : > { %6797 = vmatprep.subr.bf16.mxu0 %v8426_v0 }
 0xb0d   : > { %6798 = vmatpush3.bf16.msra.mxu0 %v7383_v20 }
 0xb0e   : > { %6829 = vmatprep.subr.bf16.mxu0 %v8426_v0 }
 0xbc3   : > { %v2702_v38 = vpop.f32.mrb[16].mxu0 }
 0xbc4   : > { %v2703_v39 = vadd.f32 %v6392_v37, %v2702_v38  ;;  %v6773_v41 = vpop.f32.mrb[17].mxu0 }
 0xbc5   : > { %v2705_v42 = vpop.f32.mrb[18].mxu0 }
 0xbc6   : > { %v9240_v43 = vadd.f32 %v2703_v39, %v9169_v36  ;;  %v2706_v44 = vadd.f32 %v6392_v37, %v2705_v42  ;;  %v6774_v45 = vpop.f32.mrb[19].mxu0 }
 0xbc8   : > { %v9243_v46 = vadd.f32 %v2706_v44, %v9173_v40  ;;  %v2713_v47 = vsel %vm2224_vm2, %v9240_v43, 0.0 }
 0xbc9   : > { %2714 = vadd.xlane.f32.xlu1 %v2713_v47 }
 0xbca   : > { %v2716_v48 = vsel %vm2224_vm2, %v9243_v46, 0.0 }
 0xbcb   : > { %2717 = vadd.xlane.f32.xlu0 %v2716_v48 }
 0xc56   : > { %v2715_v49 = vpop.xlane.xlu1 %2714 }
 0xc57   : > { %v2719_v50 = vmul.f32 0.03125, %v2715_v49 }
 0xc58   : > { %v2718_v51 = vpop.xlane.xlu0 %2717 }
 0xc59   : > { %v2721_v36 = vsub.f32 %v9240_v43, %v2719_v50  ;;  %v2720_v52 = vmul.f32 0.03125, %v2718_v51 }
 0xc5b   : > { %v2722_v53 = vsub.f32 %v9243_v46, %v2720_v52  ;;  %v2723_v40 = vmul.f32 %v2721_v36, %v2721_v36 }
 0xc5d   : > { %v2725_v54 = vsel %vm2224_vm2, %v2723_v40, 0.0  ;;  %v2724_v55 = vmul.f32 %v2722_v53, %v2722_v53 }
 0xc5e   : > { %2726 = vadd.xlane.f32.xlu0 %v2725_v54 }
 0xc5f   : > { %v2728_v56 = vsel %vm2224_vm2, %v2724_v55, 0.0 }
 0xc60   : > { %2729 = vadd.xlane.f32.xlu1 %v2728_v56 }
 0xceb   : > { %v2727_v59 = vpop.xlane.xlu0 %2726 }
 0xcec   : > { %v2731_v60 = vmul.f32 0.03125, %v2727_v59 }
 0xced   : > { %v2730_v61 = vpop.xlane.xlu1 %2729 }
 0xcee   : > { %v2733_v62 = vadd.f32 1e-05, %v2731_v60  ;;  %v2732_v63 = vmul.f32 0.03125, %v2730_v61 }
 0xcf0   : > { %7522 = vrsqrt.f32 %v2733_v62  ;;  %v2734_v1 = vadd.f32 1e-05, %v2732_v63 }
 0xcf2   : > { %7524 = vrsqrt.f32 %v2734_v1 }
 0xcfa   : > { %v7523_v2 = vpop.eup %7522 }
 0xcfb   : > { %v2737_v4 = vmul.f32 %v7523_v2, %v2721_v36  ;;  %v6410_v36 = vld [vmem:[#allocation22] ss:$0 sm:$0xff] }
 0xcfc   : > { %v7525_v5 = vpop.eup %7524 }
 0xcfd   : > { %v2745_v6 = vmul.f32 %v6396_v3, %v2737_v4  ;;  %v2738_v7 = vmul.f32 %v7525_v5, %v2722_v53  ;;  %v7384_v5 = vld [vmem:[%s9969_s28] sm:$0xff]   ;;  %s9972_s28 = sld [smem:[#allocation80_spill]] }
 0xcff   : > { %v2746_v9 = vmul.f32 %v6396_v3, %v2738_v7  ;;  %v2753_v10 = vadd.f32 %v6397_v8, %v2745_v6  ;;  %v7385_v6 = vld [vmem:[%s9970_s4 + $0x8] sm:$0xff]   ;;  %s9978_s4 = sld [smem:[#allocation77_spill]] }
 0xd01   : > { %v2754_v11 = vadd.f32 %v6397_v8, %v2746_v9 }
 0xd03   : > { %v2759_v12 = vpack.c.bf16 %v2754_v11, %v2753_v10  ;;  %s9973_s15 = smov %s9972_s28 }
 0xd05   : > { %6780 = vmatmul.mubr.msk.bf16.vlgmr.msra.gmra.mrb[8].mxu1 %vm2224_vm2, %v2759_v12 }
 0xd06   : > { %6807 = vmatprep.mubr.msk.bf16.mxu1 %vm8427_vm0, %v8426_v0  ;;  %6804 = vmatpush3.bf16.msra.mxu1 %v7384_v5 }
 0xd07   : > { %6805 = vmatprep.subr.bf16.mxu1 %v8426_v0 }
 0xd0a   : > { %6806 = vmatpush3.bf16.msra.mxu1 %v7385_v6 }
 0xd0b   : > { %6811 = vmatprep.subr.bf16.mxu1 %v8426_v0 }
 0xdd8   : > { %v2816_v22 = vpop.f32.mrb[8].mxu1 }
 0xdd9   : > { %v2817_v23 = vadd.f32 %v6398_v21, %v2816_v22  ;;  %v6781_v24 = vpop.f32.mrb[9].mxu1 }
 0xdda   : > { %v2819_v25 = vpop.f32.mrb[10].mxu1  ;;  %v6413_v24 = vld [vmem:[%s9971_s0] ss:$0 sm:$0xff]  ;;  %s9975_s0 = smov 112  }
 0xddb   : > { %v2823_v26 = vmul.f32 %v2817_v23, %v2817_v23  ;;  %v2820_v27 = vadd.f32 %v6398_v21, %v2819_v25  ;;  %v6782_v28 = vpop.f32.mrb[11].mxu1 }
 0xddd   : > { %v2825_v29 = vmul.f32 %v2823_v26, %v2817_v23  ;;  %v2824_v30 = vmul.f32 %v2820_v27, %v2820_v27 }
 0xddf   : > { %v2827_v31 = vmul.f32 0.044715, %v2825_v29  ;;  %v2826_v32 = vmul.f32 %v2824_v30, %v2820_v27 }
 0xde1   : > { %v2829_v33 = vadd.f32 %v2827_v31, %v2817_v23  ;;  %v2828_v34 = vmul.f32 0.044715, %v2826_v32 }
 0xde3   : > { %v2831_v35 = vmul.f32 0.7978846, %v2829_v33  ;;  %v2830_v37 = vadd.f32 %v2828_v34, %v2820_v27 }
 0xde5   : > { %7526 = vtanh.f32 %v2831_v35  ;;  %v2832_v38 = vmul.f32 0.7978846, %v2830_v37 }
 0xde7   : > { %7528 = vtanh.f32 %v2832_v38  ;;  %v3074_v38 = vld [vmem:[%s9972_s28] sm:$0xff]  ;;  %s9976_s28 = smov 64  }
 0xdef   : > { %v7527_v39 = vpop.eup %7526 }
 0xdf0   : > { %v2835_v41 = vadd.f32 1.0, %v7527_v39 }
 0xdf1   : > { %v7529_v42 = vpop.eup %7528 }
 0xdf2   : > { %v2837_v44 = vmul.f32 0.5, %v2835_v41  ;;  %v2836_v45 = vadd.f32 1.0, %v7529_v42  ;;  %v3075_v41 = vld [vmem:[%s9973_s15 + $0x8] sm:$0xff] }
 0xdf4   : > { %v2838_v47 = vmul.f32 0.5, %v2836_v45  ;;  %v2839_v48 = vmul.f32 %v2837_v44, %v2817_v23 }
 0xdf6   : > { %v2840_v49 = vmul.f32 %v2838_v47, %v2820_v27 }
 0xdf8   : > { %v2857_v50 = vpack.c.bf16 %v2840_v49, %v2839_v48 }
 0xdfa   : > { %6800 = vmatmul.mubr.bf16.vlgmr.msra.gmra.mrb[20].mxu0 %v2857_v50 }
 0xdfb   : > { %6831 = vmatprep.mubr.msk.bf16.mxu0 %vm8427_vm0, %v8426_v0 }
 0xecd   : > { %v2940_v51 = vpop.f32.mrb[20].mxu0 }
 0xece   : > { %v2947_v52 = vadd.f32 %v2940_v51, %v9240_v43  ;;  %v6801_v53 = vpop.f32.mrb[21].mxu0 }
 0xecf   : > { %v2943_v40 = vpop.f32.mrb[22].mxu0 }
 0xed0   : > { %v9279_v54 = vadd.f32 %v6410_v36, %v2947_v52  ;;  %v2948_v55 = vadd.f32 %v2943_v40, %v9243_v46  ;;  %v6802_v56 = vpop.f32.mrb[23].mxu0 }
 0xed2   : > { %v9282_v57 = vadd.f32 %v6410_v36, %v2948_v55  ;;  %v2960_v58 = vsel %vm2224_vm2, %v9279_v54, 0.0 }
 0xed3   : > { %2961 = vadd.xlane.f32.xlu0 %v2960_v58 }
 0xed4   : > { %v2963_v59 = vsel %vm2224_vm2, %v9282_v57, 0.0 }
 0xed5   : > { %2964 = vadd.xlane.f32.xlu1 %v2963_v59 }
 0xf60   : > { %v2962_v43 = vpop.xlane.xlu0 %2961 }
 0xf61   : > { %v2966_v60 = vmul.f32 0.03125, %v2962_v43 }
 0xf62   : > { %v2965_v61 = vpop.xlane.xlu1 %2964 }
 0xf63   : > { %v2968_v62 = vsub.f32 %v9279_v54, %v2966_v60  ;;  %v2967_v63 = vmul.f32 0.03125, %v2965_v61 }
 0xf65   : > { %v2969_v46 = vsub.f32 %v9282_v57, %v2967_v63  ;;  %v2970_v1 = vmul.f32 %v2968_v62, %v2968_v62 }
 0xf67   : > { %v2972_v2 = vsel %vm2224_vm2, %v2970_v1, 0.0  ;;  %v2971_v3 = vmul.f32 %v2969_v46, %v2969_v46 }
 0xf68   : > { %2973 = vadd.xlane.f32.xlu0 %v2972_v2 }
 0xf69   : > { %v2975_v4 = vsel %vm2224_vm2, %v2971_v3, 0.0 }
 0xf6a   : > { %2976 = vadd.xlane.f32.xlu1 %v2975_v4 }
 0xff5   : > { %v2974_v7 = vpop.xlane.xlu0 %2973 }
 0xff6   : > { %v2978_v8 = vmul.f32 0.03125, %v2974_v7 }
 0xff7   : > { %v2977_v9 = vpop.xlane.xlu1 %2976 }
 0xff8   : > { %v2980_v10 = vadd.f32 1e-05, %v2978_v8  ;;  %v2979_v11 = vmul.f32 0.03125, %v2977_v9 }
 0xffa   : > { %7530 = vrsqrt.f32 %v2980_v10  ;;  %v2981_v12 = vadd.f32 1e-05, %v2979_v11  ;;  %v6419_v11 = vld [vmem:[%s9973_s15 + $0x10] sm:$0xff] }
 0xffc   : > { %7532 = vrsqrt.f32 %v2981_v12 }
0x1004   : > { %v7531_v13 = vpop.eup %7530 }
0x1005   : > { %v2984_v15 = vmul.f32 %v7531_v13, %v2968_v62  ;;  %v6420_v13 = vld [vmem:[%s9973_s15 + $0x18] sm:$0xff] }
0x1006   : > { %v7533_v16 = vpop.eup %7532 }
0x1007   : > { %v2992_v17 = vmul.f32 %v6411_v14, %v2984_v15  ;;  %v2985_v18 = vmul.f32 %v7533_v16, %v2969_v46 }
0x1009   : > { %v2993_v20 = vmul.f32 %v6411_v14, %v2985_v18  ;;  %v3000_v21 = vadd.f32 %v6412_v19, %v2992_v17 }
0x100b   : > { %v3001_v22 = vadd.f32 %v6412_v19, %v2993_v20 }
0x100d   : > { %v3006_v23 = vpack.c.bf16 %v3001_v22, %v3000_v21 }
0x100f   : > { %6808 = vmatmul.mubr.msk.bf16.vlgmr.msra.gmra.mrb[12].mxu1 %vm2224_vm2, %v3006_v23 }
0x1010   : > { %6813 = vmatprep.mubr.msk.bf16.mxu1 %vm8427_vm0, %v8426_v0 }
0x10e2   : > { %v3063_v25 = vpop.f32.mrb[12].mxu1 }
0x10e3   : > { %v3064_v26 = vadd.f32 %v6413_v24, %v3063_v25  ;;  %v6809_v27 = vpop.f32.mrb[13].mxu1 }
0x10e4   : > { %v3066_v28 = vpop.f32.mrb[14].mxu1 }
0x10e5   : > { %v3067_v29 = vadd.f32 %v6413_v24, %v3066_v28  ;;  %v6810_v30 = vpop.f32.mrb[15].mxu1  ;;  %v3070_v31 = vmul.f32 0.25, %v3064_v26 }
0x10e7   : > { %v3071_v32 = vmul.f32 0.25, %v3067_v29  ;;  %v9300_v33 = vpack.c.bf16 %v3067_v29, %v3064_v26 }
0x10e9   : > { %3077 = vrot.lane.b32.xlu0 %v9300_v33, %s9827_s8  ;;  %v3072_v34 = vpack.c.bf16 %v3071_v32, %v3070_v31  ;;  %s9977_s8 = smov 48  }
0x10ed   : > { %3202 = vrot.lane.b32.xlu0 %v9300_v33, %s9974_s3 }
0x10f1   : > { %3200 = vrot.lane.b32.xlu0 %v3072_v34, %s9975_s0 }
0x115b   : > { %v3078_v35 = vpop.permute.xlu0 %3077 }
0x115c   : > { %v3083_v37 = vsel %vm2177_vm1, %v3078_v35, 0 }
0x115d   : > { %6812 = vmatpush3.bf16.xpose.msra.mxu1 %v3083_v37 }
0x115e   : > { %6817 = vmatprep.subr.bf16.mxu1 %v8426_v0 }
0x115f   : > { %v3203_v3 = vpop.permute.xlu0 %3202 }
0x1160   : > { %v3208_v5 = vsel %vm2177_vm1, %v3203_v3, 0 }
0x1163   : > { %v3201_v6 = vpop.permute.xlu0 %3200 }
0x1164   : > { %6814 = vmatmul.mubr.msk.bf16.vlgmr.msra.gmra.mrb[16].mxu1 %vm2177_vm1, %v3072_v34 }
0x1165   : > { %6819 = vmatprep.mubr.msk.bf16.mxu1 %vm8427_vm0, %v8426_v0 }
0x1237   : > { %v3119_v39 = vpop.f32.mrb[16].mxu1 }
0x1238   : > { %v3120_v42 = vadd.f32 %v3119_v39, %v3074_v38  ;;  %v6815_v44 = vpop.f32.mrb[17].mxu1 }
0x1239   : > { %v3122_v45 = vpop.f32.mrb[18].mxu1 }
0x123a   : > { %v3123_v47 = vadd.f32 %v3122_v45, %v3075_v41  ;;  %v6816_v48 = vpop.f32.mrb[19].mxu1  ;;  %v3126_v49 = vsel %vm2177_vm1, %v3120_v42, -inf }
0x123b   : > { %3127 = vmax.xlane.f32.xlu1 %v3126_v49 }
0x123c   : > { %v3129_v50 = vsel %vm2177_vm1, %v3123_v47, -inf }
0x123f   : > { %3130 = vmax.xlane.f32.xlu1 %v3129_v50 }
0x12c8   : > { %v3128_v51 = vpop.xlane.xlu1 %3127 }
0x12c9   : > { %v3132_v36 = vsub.f32 %v3120_v42, %v3128_v51  ;;  %v7387_v42 = vld [vmem:[%s9978_s4 + $0x8] sm:$0xff]  }
0x12cb   : > { %v3134_v52 = vmul.f32 1.442695, %v3132_v36 }
0x12cc   : > { %v3131_v53 = vpop.xlane.xlu1 %3130 }
0x12cd   : > { %7534 = vpow2.f32 %v3134_v52  ;;  %v3133_v40 = vsub.f32 %v3123_v47, %v3131_v53 }
0x12cf   : > { %v3136_v55 = vmul.f32 1.442695, %v3133_v40 }
0x12d1   : > { %7536 = vpow2.f32 %v3136_v55  ;;  %v6423_v55 = vld [vmem:[%s9979_s6] ss:$0 sm:$0xff]  ;;  %s9982_s6 = sld [smem:[#allocation75_spill]] }
0x12d7   : > { %v7535_v56 = vpop.eup %7534 }
0x12d8   : > { %v3138_v58 = vsel %vm2177_vm1, %v7535_v56, 0.0 }
0x12d9   : > { %3139 = vadd.xlane.f32.xlu1 %v3138_v58 }
0x12db   : > { %v7537_v59 = vpop.eup %7536 }
0x12dc   : > { %v3141_v43 = vsel %vm2177_vm1, %v7537_v59, 0.0 }
0x12dd   : > { %3142 = vadd.xlane.f32.xlu1 %v3141_v43 }
0x12ee   : > { %3149 = vrot.lane.b32.xlu1 %v9300_v33, %s9976_s28 }
0x1366   : > { %v3140_v60 = vpop.xlane.xlu1 %3139 }
0x1367   : > { %7538 = vrcp.f32 %v3140_v60 }
0x136a   : > { %v3143_v61 = vpop.xlane.xlu1 %3142 }
0x136b   : > { %7540 = vrcp.f32 %v3143_v61 }
0x136e   : > { %v3150_v62 = vpop.permute.xlu1 %3149 }
0x136f   : > { %6818 = vmatpush3.bf16.msra.mxu1 %v3150_v62 }
0x1370   : > { %6823 = vmatprep.subr.bf16.mxu1 %v8426_v0 }
0x1371   : > { %v7539_v63 = vpop.eup %7538 }
0x1372   : > { %v3146_v1 = vmul.f32 %v7539_v63, %v7535_v56 }
0x1375   : > { %v7541_v46 = vpop.eup %7540 }
0x1376   : > { %v3147_v2 = vmul.f32 %v7541_v46, %v7537_v59 }
0x1378   : > { %v3148_v4 = vpack.c.bf16 %v3147_v2, %v3146_v1 }
0x137a   : > { %6820 = vmatmul.mubr.msk.bf16.vlgmr.msra.gmra.mrb[20].mxu1 %vm2177_vm1, %v3148_v4 }
0x137b   : > { %6824 = vmatpush3.bf16.xpose.msra.mxu1 %v3208_v5  ;;  %6825 = vmatprep.mubr.msk.bf16.mxu1 %vm8427_vm0, %v8426_v0 }
0x137c   : > { %6835 = vmatprep.subr.bf16.mxu1 %v8426_v0 }
0x1382   : > { %6826 = vmatmul.mubr.msk.bf16.vlgmr.msra.gmra.mrb[24].mxu1 %vm2177_vm1, %v3201_v6 }
0x1383   : > { %6839 = vmatprep.mubr.msk.bf16.mxu1 %vm8427_vm0, %v8426_v0 }
0x144d   : > { %v3189_v7 = vpop.f32.mrb[20].mxu1 }
0x144e   : > { %v6821_v8 = vpop.f32.mrb[21].mxu1 }
0x144f   : > { %v3192_v9 = vpop.f32.mrb[22].mxu1 }
0x1450   : > { %v6822_v10 = vpop.f32.mrb[23].mxu1 }
0x1455   : > { %v3244_v12 = vpop.f32.mrb[24].mxu1 }
0x1456   : > { %v3245_v14 = vadd.f32 %v6419_v11, %v3244_v12  ;;  %v6827_v15 = vpop.f32.mrb[25].mxu1 }
0x1457   : > { %v3247_v16 = vpop.f32.mrb[26].mxu1 }
0x1458   : > { %v3248_v17 = vadd.f32 %v6420_v13, %v3247_v16  ;;  %v6828_v18 = vpop.f32.mrb[27].mxu1  ;;  %v3251_v19 = vsel %vm2177_vm1, %v3245_v14, -inf }
0x1459   : > { %3252 = vmax.xlane.f32.xlu0 %v3251_v19  ;;  %v6427_v19 = vld [vmem:[#allocation31] ss:$0 sm:$0xff] }
0x145a   : > { %v3254_v20 = vsel %vm2177_vm1, %v3248_v17, -inf }
0x145b   : > { %3255 = vmax.xlane.f32.xlu1 %v3254_v20 }
0x14e6   : > { %v3253_v21 = vpop.xlane.xlu0 %3252 }
0x14e7   : > { %v3257_v22 = vsub.f32 %v3245_v14, %v3253_v21 }
0x14e8   : > { %v3256_v23 = vpop.xlane.xlu1 %3255 }
0x14e9   : > { %v3259_v24 = vmul.f32 1.442695, %v3257_v22  ;;  %v3258_v25 = vsub.f32 %v3248_v17, %v3256_v23 }
0x14eb   : > { %7542 = vpow2.f32 %v3259_v24  ;;  %v3261_v26 = vmul.f32 1.442695, %v3258_v25  ;;  %v6428_v24 = vld [vmem:[#allocation29] ss:$0 sm:$0xff] }
0x14ed   : > { %7544 = vpow2.f32 %v3261_v26 }
0x14f5   : > { %v7543_v27 = vpop.eup %7542 }
0x14f6   : > { %v3263_v28 = vsel %vm2177_vm1, %v7543_v27, 0.0 }
0x14f7   : > { %v7545_v29 = vpop.eup %7544  ;;  %3264 = vadd.xlane.f32.xlu0 %v3263_v28 }
0x14f8   : > { %v3266_v30 = vsel %vm2177_vm1, %v7545_v29, 0.0 }
0x14fb   : > { %3267 = vadd.xlane.f32.xlu0 %v3266_v30  ;;  %v7391_v30 = vld [vmem:[%s9982_s6 + $0x8] sm:$0xff]  }
0x1511   : > { %3274 = vrot.lane.b32.xlu0 %v9300_v33, %s9977_s8  ;;  %v7386_v33 = vld [vmem:[%s9978_s4] sm:$0xff]   ;;  %s9981_s4 = sld [smem:[#allocation74_spill]] }
0x1512   : > { %6836 = vmatpush3.bf16.msra.mxu1 %v7386_v33 }
0x1513   : > { %6837 = vmatprep.subr.bf16.mxu1 %v8426_v0 }
0x1516   : > { %6838 = vmatpush3.bf16.msra.mxu1 %v7387_v42 }
0x1517   : > { %6851 = vmatprep.subr.bf16.mxu1 %v8426_v0  ;;  %v7388_v10 = vld [vmem:[%s9981_s4] sm:$0xff]   ;;  %v7389_v11 = vld [vmem:[%s9981_s4 + $0x8] sm:$0xff]   ;;  %s9836_s4 = smov 32  }
0x1584   : > { %v3265_v31 = vpop.xlane.xlu0 %3264 }
0x1585   : > { %7546 = vrcp.f32 %v3265_v31  ;;  %v7392_v31 = vld [vmem:[%s9982_s6 + $0x10] sm:$0xff]  }
0x1588   : > { %v3268_v32 = vpop.xlane.xlu0 %3267 }
0x1589   : > { %7548 = vrcp.f32 %v3268_v32  ;;  %v7393_v32 = vld [vmem:[%s9982_s6 + $0x18] sm:$0xff]  }
0x158c   : > { %v3275_v34 = vpop.permute.xlu0 %3274 }
0x158d   : > { %6830 = vmatpush3.bf16.msra.mxu0 %v3275_v34  ;;  %v7394_v34 = vld [vmem:[%s9982_s6 + $0x20] sm:$0xff]  }
0x158e   : > { %6843 = vmatprep.subr.bf16.mxu0 %v8426_v0 }
0x158f   : > { %v7547_v35 = vpop.eup %7546 }
0x1590   : > { %v3271_v38 = vmul.f32 %v7547_v35, %v7543_v27  ;;  %v7395_v35 = vld [vmem:[%s9982_s6 + $0x28] sm:$0xff]  }
0x1593   : > { %v7549_v37 = vpop.eup %7548 }
0x1594   : > { %v3272_v39 = vmul.f32 %v7549_v37, %v7545_v29  ;;  %v7390_v29 = vld [vmem:[%s9982_s6] sm:$0xff]   ;;  %v7396_v37 = vld [vmem:[%s9982_s6 + $0x30] sm:$0xff]  }
0x1596   : > { %v3273_v41 = vpack.c.bf16 %v3272_v39, %v3271_v38  ;;  %v7397_v38 = vld [vmem:[%s9982_s6 + $0x38] sm:$0xff]   ;;  %v6429_v39 = vld [vmem:[#allocation32] ss:$0 sm:$0xff]  ;;  %s9983_s6 = smov 96  }
0x1598   : > { %6832 = vmatmul.mubr.msk.bf16.vlgmr.msra.gmra.mrb[24].mxu0 %vm2177_vm1, %v3273_v41 }
0x1599   : > { %6847 = vmatprep.mubr.msk.bf16.mxu0 %vm8427_vm0, %v8426_v0  ;;  %6844 = vmatpush3.bf16.msra.mxu0 %v7388_v10 }
0x159a   : > { %6845 = vmatprep.subr.bf16.mxu0 %v8426_v0 }
0x159d   : > { %6846 = vmatpush3.bf16.msra.mxu0 %v7389_v11 }
0x159e   : > { %6871 = vmatprep.subr.bf16.mxu0 %v8426_v0 }
0x166b   : > { %v3314_v44 = vpop.f32.mrb[24].mxu0 }
0x166c   : > { %v6833_v45 = vpop.f32.mrb[25].mxu0 }
0x166d   : > { %v3317_v47 = vpop.f32.mrb[26].mxu0 }
0x166e   : > { %v7364_v48 = vpack.i.bf16 %v3317_v47, %v3314_v44  ;;  %v6834_v49 = vpop.f32.mrb[27].mxu0 }
0x1670   : > { %7365 = vrot.lane.b32.xlu1 %v7364_v48, %s9980_s9 }
0x16e2   : > { %v7366_v50 = vpop.permute.xlu1 %7365 }
0x16e3   : > { %v7368_v51 = vunpack.i.h.bf16 %v7366_v50  ;;  %v7367_v36 = vunpack.i.l.bf16 %v7366_v50 }
0x16e5   : > { %v3330_v52 = vsel %vm2177_vm1, %v3192_v9, %v7368_v51  ;;  %v3329_v53 = vsel %vm2177_vm1, %v3189_v7, %v7367_v36 }
0x16e6   : > { %v3335_v40 = vpack.c.bf16 %v3330_v52, %v3329_v53 }
0x16e8   : > { %6840 = vmatmul.mubr.msk.bf16.vlgmr.msra.gmra.mrb[28].mxu1 %vm2224_vm2, %v3335_v40 }
0x16e9   : > { %6867 = vmatprep.mubr.msk.bf16.mxu1 %vm8427_vm0, %v8426_v0  ;;  %6852 = vmatpush3.bf16.msra.mxu1 %v7390_v29 }
0x16ea   : > { %6853 = vmatprep.subr.bf16.mxu1 %v8426_v0 }
0x16ed   : > { %6854 = vmatpush3.bf16.msra.mxu1 %v7391_v30 }
0x16ee   : > { %6855 = vmatprep.subr.bf16.mxu1 %v8426_v0 }
0x16f1   : > { %6856 = vmatpush3.bf16.msra.mxu1 %v7392_v31 }
0x16f2   : > { %6857 = vmatprep.subr.bf16.mxu1 %v8426_v0 }
0x16f5   : > { %6858 = vmatpush3.bf16.msra.mxu1 %v7393_v32 }
0x16f6   : > { %6859 = vmatprep.subr.bf16.mxu1 %v8426_v0 }
0x16f9   : > { %6860 = vmatpush3.bf16.msra.mxu1 %v7394_v34 }
0x16fa   : > { %6861 = vmatprep.subr.bf16.mxu1 %v8426_v0 }
0x16fd   : > { %6862 = vmatpush3.bf16.msra.mxu1 %v7395_v35  ;;  %v7398_v35 = vld [vmem:[%s9984_s10] sm:$0xff]  }
0x16fe   : > { %6863 = vmatprep.subr.bf16.mxu1 %v8426_v0 }
0x1701   : > { %6864 = vmatpush3.bf16.msra.mxu1 %v7396_v37  ;;  %v7399_v37 = vld [vmem:[%s9984_s10 + $0x8] sm:$0xff]  }
0x1702   : > { %6865 = vmatprep.subr.bf16.mxu1 %v8426_v0 }
0x1705   : > { %6866 = vmatpush3.bf16.msra.mxu1 %v7397_v38 }
0x17bb   : > { %v3392_v56 = vpop.f32.mrb[28].mxu1 }
0x17bc   : > { %v3393_v58 = vadd.f32 %v6423_v55, %v3392_v56  ;;  %v6841_v59 = vpop.f32.mrb[29].mxu1 }
0x17bd   : > { %v3395_v43 = vpop.f32.mrb[30].mxu1 }
0x17be   : > { %v9353_v60 = vadd.f32 %v3393_v58, %v9279_v54  ;;  %v3396_v61 = vadd.f32 %v6423_v55, %v3395_v43  ;;  %v6842_v62 = vpop.f32.mrb[31].mxu1 }
0x17c0   : > { %v9356_v63 = vadd.f32 %v3396_v61, %v9282_v57  ;;  %v3403_v46 = vsel %vm2224_vm2, %v9353_v60, 0.0 }
0x17c1   : > { %3404 = vadd.xlane.f32.xlu1 %v3403_v46 }
0x17c2   : > { %v3406_v1 = vsel %vm2224_vm2, %v9356_v63, 0.0 }
0x17c3   : > { %3407 = vadd.xlane.f32.xlu0 %v3406_v1 }
0x184e   : > { %v3405_v2 = vpop.xlane.xlu1 %3404 }
0x184f   : > { %v3409_v3 = vmul.f32 0.03125, %v3405_v2 }
0x1850   : > { %v3408_v4 = vpop.xlane.xlu0 %3407 }
0x1851   : > { %v3411_v54 = vsub.f32 %v9353_v60, %v3409_v3  ;;  %v3410_v5 = vmul.f32 0.03125, %v3408_v4 }
0x1853   : > { %v3412_v6 = vsub.f32 %v9356_v63, %v3410_v5  ;;  %v3413_v57 = vmul.f32 %v3411_v54, %v3411_v54 }
0x1855   : > { %v3415_v7 = vsel %vm2224_vm2, %v3413_v57, 0.0  ;;  %v3414_v8 = vmul.f32 %v3412_v6, %v3412_v6 }
0x1856   : > { %3416 = vadd.xlane.f32.xlu0 %v3415_v7 }
0x1857   : > { %v3418_v9 = vsel %vm2224_vm2, %v3414_v8, 0.0 }
0x1858   : > { %3419 = vadd.xlane.f32.xlu1 %v3418_v9 }
0x18e3   : > { %v3417_v12 = vpop.xlane.xlu0 %3416 }
0x18e4   : > { %v3421_v13 = vmul.f32 0.03125, %v3417_v12 }
0x18e5   : > { %v3420_v14 = vpop.xlane.xlu1 %3419 }
0x18e6   : > { %v3423_v15 = vadd.f32 1e-05, %v3421_v13  ;;  %v3422_v16 = vmul.f32 0.03125, %v3420_v14 }
0x18e8   : > { %7550 = vrsqrt.f32 %v3423_v15  ;;  %v3424_v17 = vadd.f32 1e-05, %v3422_v16 }
0x18ea   : > { %7552 = vrsqrt.f32 %v3424_v17 }
0x18f2   : > { %v7551_v18 = vpop.eup %7550 }
0x18f3   : > { %v3427_v20 = vmul.f32 %v7551_v18, %v3411_v54  ;;  %v6441_v54 = vld [vmem:[#allocation34] ss:$0 sm:$0xff] }
0x18f4   : > { %v7553_v21 = vpop.eup %7552 }
0x18f5   : > { %v3435_v22 = vmul.f32 %v6427_v19, %v3427_v20  ;;  %v3428_v23 = vmul.f32 %v7553_v21, %v3412_v6 }
0x18f7   : > { %v3436_v25 = vmul.f32 %v6427_v19, %v3428_v23  ;;  %v3443_v26 = vadd.f32 %v6428_v24, %v3435_v22 }
0x18f9   : > { %v3444_v27 = vadd.f32 %v6428_v24, %v3436_v25 }
0x18fb   : > { %v3449_v28 = vpack.c.bf16 %v3444_v27, %v3443_v26 }
0x18fd   : > { %6848 = vmatmul.mubr.msk.bf16.vlgmr.msra.gmra.mrb[28].mxu0 %vm2224_vm2, %v3449_v28 }
0x18fe   : > { %6887 = vmatprep.mubr.msk.bf16.mxu0 %vm8427_vm0, %v8426_v0  ;;  %6872 = vmatpush3.bf16.msra.mxu0 %v7398_v35 }
0x18ff   : > { %6873 = vmatprep.subr.bf16.mxu0 %v8426_v0 }
0x1902   : > { %6874 = vmatpush3.bf16.msra.mxu0 %v7399_v37 }
0x1903   : > { %6875 = vmatprep.subr.bf16.mxu0 %v8426_v0 }
0x19d0   : > { %v3506_v41 = vpop.f32.mrb[28].mxu0 }
0x19d1   : > { %v3507_v33 = vadd.f32 %v6429_v39, %v3506_v41  ;;  %v6849_v42 = vpop.f32.mrb[29].mxu0 }
0x19d2   : > { %v3509_v44 = vpop.f32.mrb[30].mxu0 }
0x19d3   : > { %v3513_v45 = vmul.f32 %v3507_v33, %v3507_v33  ;;  %v3510_v47 = vadd.f32 %v6429_v39, %v3509_v44  ;;  %v6850_v48 = vpop.f32.mrb[31].mxu0  ;;  %v7400_v44 = vld [vmem:[%s9984_s10 + $0x10] sm:$0xff]  }
0x19d4   : > { %6876 = vmatpush3.bf16.msra.mxu0 %v7400_v44  ;;  %v7403_v48 = vld [vmem:[%s9984_s10 + $0x28] sm:$0xff]  }
0x19d5   : > { %v3515_v49 = vmul.f32 %v3513_v45, %v3507_v33  ;;  %v3514_v50 = vmul.f32 %v3510_v47, %v3510_v47  ;;  %6877 = vmatprep.subr.bf16.mxu0 %v8426_v0  ;;  %v7401_v45 = vld [vmem:[%s9984_s10 + $0x18] sm:$0xff]  }
0x19d7   : > { %v3517_v51 = vmul.f32 0.044715, %v3515_v49  ;;  %v3516_v36 = vmul.f32 %v3514_v50, %v3510_v47  ;;  %v7404_v49 = vld [vmem:[%s9984_s10 + $0x30] sm:$0xff]   ;;  %v7405_v50 = vld [vmem:[%s9984_s10 + $0x38] sm:$0xff]  }
0x19d8   : > { %6878 = vmatpush3.bf16.msra.mxu0 %v7401_v45 }
0x19d9   : > { %v3519_v52 = vadd.f32 %v3517_v51, %v3507_v33  ;;  %v3518_v53 = vmul.f32 0.044715, %v3516_v36  ;;  %6879 = vmatprep.subr.bf16.mxu0 %v8426_v0 }
0x19db   : > { %v3521_v40 = vmul.f32 0.7978846, %v3519_v52  ;;  %v3520_v55 = vadd.f32 %v3518_v53, %v3510_v47 }
0x19dd   : > { %7554 = vtanh.f32 %v3521_v40  ;;  %v3522_v56 = vmul.f32 0.7978846, %v3520_v55 }
0x19df   : > { %7556 = vtanh.f32 %v3522_v56  ;;  %v6443_v56 = vld [vmem:[%s9986_s11] ss:$0 sm:$0xff]  ;;  %s9988_s11 = sld [smem:[#allocation85_spill]] }
0x19e7   : > { %v7555_v58 = vpop.eup %7554 }
0x19e8   : > { %v3525_v59 = vadd.f32 1.0, %v7555_v58 }
0x19e9   : > { %v7557_v43 = vpop.eup %7556 }
0x19ea   : > { %v3527_v61 = vmul.f32 0.5, %v3525_v59  ;;  %v3526_v62 = vadd.f32 1.0, %v7557_v43 }
0x19ec   : > { %v3528_v46 = vmul.f32 0.5, %v3526_v62  ;;  %v3529_v1 = vmul.f32 %v3527_v61, %v3507_v33 }
0x19ee   : > { %v3530_v2 = vmul.f32 %v3528_v46, %v3510_v47  ;;  %v7402_v47 = vld [vmem:[%s9984_s10 + $0x20] sm:$0xff]   ;;  %s9990_s10 = sld [smem:[#allocation94_spill]] }
0x19ef   : > { %6880 = vmatpush3.bf16.msra.mxu0 %v7402_v47 }
0x19f0   : > { %v3547_v3 = vpack.c.bf16 %v3530_v2, %v3529_v1  ;;  %6881 = vmatprep.subr.bf16.mxu0 %v8426_v0 }
0x19f2   : > { %6868 = vmatmul.mubr.bf16.vlgmr.msra.gmra.mrb[32].mxu1 %v3547_v3 }
0x19f3   : > { %6882 = vmatpush3.bf16.msra.mxu0 %v7403_v48 }
0x19f4   : > { %6883 = vmatprep.subr.bf16.mxu0 %v8426_v0 }
0x19f7   : > { %6884 = vmatpush3.bf16.msra.mxu0 %v7404_v49 }
0x19f8   : > { %6885 = vmatprep.subr.bf16.mxu0 %v8426_v0 }
0x19fb   : > { %6886 = vmatpush3.bf16.msra.mxu0 %v7405_v50 }
0x19fc   : > { %6891 = vmatprep.subr.bf16.mxu0 %v8426_v0 }
0x1ac5   : > { %v3630_v4 = vpop.f32.mrb[32].mxu1 }
0x1ac6   : > { %v3637_v5 = vadd.f32 %v3630_v4, %v9353_v60  ;;  %v6869_v6 = vpop.f32.mrb[33].mxu1 }
0x1ac7   : > { %v3633_v57 = vpop.f32.mrb[34].mxu1 }
0x1ac8   : > { %v3646_v7 = vadd.f32 %v6441_v54, %v3637_v5  ;;  %v3638_v8 = vadd.f32 %v3633_v57, %v9356_v63  ;;  %v6870_v9 = vpop.f32.mrb[35].mxu1  ;;  %v7408_v57 = vld [vmem:[%s9987_s12 + $0x4] ss:$8 sps:$4 sm:$0xff]  }
0x1ac9   : > { %3927 = vmatprep.subr.bf16.mxu1 %v7408_v57  ;;  %v7409_v9 = vld [vmem:[%s9987_s12 + $0x10] ss:$8 sps:$4 sm:$0xff]  }
0x1aca   : > { %v3647_v10 = vadd.f32 %v6441_v54, %v3638_v8  ;;  %v3653_v11 = vrot.slane %v3646_v7, 1  ;;  %v3649_v12 = vrot.slane %v3646_v7, 4  ;;  %v3657_v13 = vrot.slane %v3646_v7, 5  ;;  %v7411_v8 = vld [vmem:[%s9987_s12 + $0x14] ss:$8 sps:$4 sm:$0xff]  }
0x1acc   : > { %3654 = vrot.lane.b32.xlu1 %v3653_v11, %s9976_s28  ;;  %3650 = vrot.lane.b32.xlu0 %v3649_v12, %s9836_s4  ;;  %v3671_v14 = vrot.slane %v3647_v10, 1  ;;  %v3667_v60 = vrot.slane %v3647_v10, 4  ;;  %v3675_v15 = vrot.slane %v3647_v10, 5  ;;  %v7412_v11 = vld [vmem:[%s9987_s12 + $0x20] ss:$8 sps:$4 sm:$0xff]  }
0x1acd   : > { %v7417_v12 = vld [vmem:[%s9987_s12 + $0x34] ss:$8 sps:$4 sm:$0xff]  }
0x1ad0   : > { %3658 = vrot.lane.b32.xlu1 %v3657_v13, %s9983_s6  ;;  %3672 = vrot.lane.b32.xlu0 %v3671_v14, %s9976_s28  ;;  %v7415_v13 = vld [vmem:[%s9987_s12 + $0x30] ss:$8 sps:$4 sm:$0xff]   ;;  %v8435_v14 = vmov 0  }
0x1ad1   : > { %3959 = vmatprep.mubr.bf16.mxu1 %v8435_v14 }
0x1ad4   : > { %3668 = vrot.lane.b32.xlu1 %v3667_v60, %s9836_s4  ;;  %s9985_s4 = sld [smem:[#allocation82_spill]] }
0x1ad8   : > { %3676 = vrot.lane.b32.xlu1 %v3675_v15, %s9983_s6 }
0x1ada   : > { %v6442_v40 = vld [vmem:[%s9985_s4] ss:$0 sm:$0xff]  ;;  %s9989_s4 = sld [smem:[#allocation84_spill]] }
0x1b3e   : > { %v3655_v63 = vpop.permute.xlu1 %3654  ;;  %v3651_v16 = vpop.permute.xlu0 %3650 }
0x1b3f   : > { %v3661_v17 = vsel %vm2224_vm2, %v3646_v7, %v3651_v16  ;;  %v7406_v7 = vld [vmem:[%s9987_s12] ss:$8 sps:$4 sm:$0xff]  }
0x1b40   : > { %v3663_v19 = vsel %vm3662_vm3, %v3661_v17, %v3655_v63  ;;  %3928 = vmatpush1.bf16.msra.mxu1 %v7406_v7  ;;  %v6452_v17 = vld [vmem:[%s9988_s11] ss:$0 sm:$0xff]  ;;  %s9992_s11 = sld [smem:[#allocation96_spill]] }
0x1b41   : > { %3929 = vmatprep.subr.bf16.mxu1 %v7411_v8 }
0x1b42   : > { %v3659_v18 = vpop.permute.xlu1 %3658  ;;  %v3673_v24 = vpop.permute.xlu0 %3672 }
0x1b43   : > { %v3665_v20 = vsel %vm3664_vm4, %v3663_v19, %v3659_v18  ;;  %v6453_v19 = vld [vmem:[%s9989_s4] ss:$0 sm:$0xff]  ;;  %s9993_s4 = sld [smem:[#allocation93_spill]] }
0x1b44   : > { %v3683_v23 = vrot.slane %v3665_v20, 1  ;;  %3930 = vmatpush1.bf16.msra.mxu1 %v7409_v9 }
0x1b46   : > { %v3669_v21 = vpop.permute.xlu1 %3668  ;;  %v3691_v30 = vsel %vm3690_vm5, %v3665_v20, %v3683_v23  ;;  %v3874_v23 = vlaneseq  ;;  %v6468_v57 = vld [vmem:[%s9992_s11 + $0x8] sm:$0xf] }
0x1b47   : > { %v3679_v22 = vsel %vm2224_vm2, %v3647_v10, %v3669_v21  ;;  %v7414_v10 = vld [vmem:[%s9987_s12 + $0x24] ss:$8 sps:$4 sm:$0xff]   ;;  %s9997_s12 = sld [smem:[#allocation86_spill]] }
0x1b48   : > { %v3680_v25 = vsel %vm3662_vm3, %v3679_v22, %v3673_v24  ;;  %3931 = vmatprep.subr.bf16.mxu1 %v7414_v10  ;;  %v3875_v24 = vshrl.u32 %v3874_v23, 7 }
0x1b49   : > { %3932 = vmatpush1.bf16.msra.mxu1 %v7412_v11 }
0x1b4a   : > { %v3677_v26 = vpop.permute.xlu1 %3676  ;;  %3933 = vmatprep.subr.bf16.mxu1 %v7417_v12 }
0x1b4b   : > { %v3681_v27 = vsel %vm3664_vm4, %v3680_v25, %v3677_v26  ;;  %v9442_v25 = vsub.s32 0, %v3875_v24  ;;  %v3872_v26 = vld [vmem:[%s9990_s10] sm:$0x3]  ;;  %s9991_s10 = smov 32  }
0x1b4c   : > { %v3686_v28 = vrot.slane %v3681_v27, 6  ;;  %v3688_v29 = vrot.slane %v3681_v27, 7 }
0x1b4d   : > { %3934 = vmatpush1.bf16.msra.mxu1 %v7415_v13  ;;  %v3877_v27 = vrot.slane %v3872_v26, %v9442_v25  ;;  %v6471_v13 = vld [vmem:[%s9992_s11 + $0xc] sm:$0xf] }
0x1b4e   : > { %v3693_v31 = vsel %vm3692_vm6, %v3691_v30, %v3686_v28  ;;  %6903 = vmatprep.subr.bf16.mxu1 %v8426_v0 }
0x1b4f   : > { %v3695_v32 = vsel %vm3694_vm7, %v3693_v31, %v3688_v29 }
0x1b50   : > { %v3699_v34 = vsel %vm3698_vm8, %v3695_v32, 0.0 }
0x1b51   : > { %3700 = vadd.xlane.f32.xlu0 %v3699_v34 }
0x1bde   : > { %v3701_v38 = vpop.xlane.xlu0 %3700 }
0x1bdf   : > { %v3703_v39 = vmul.f32 0.0078125, %v3701_v38  ;;  %v9453_v38 = vsub.s32 1, %v3875_v24 }
0x1be1   : > { %v3704_v41 = vsub.f32 %v3695_v32, %v3703_v39  ;;  %v3881_v39 = vrot.slane %v3872_v26, %v9453_v38 }
0x1be3   : > { %v3705_v33 = vmul.f32 %v3704_v41, %v3704_v41 }
0x1be5   : > { %v3706_v42 = vsel %vm3698_vm8, %v3705_v33, 0.0 }
0x1be6   : > { %3707 = vadd.xlane.f32.xlu1 %v3706_v42 }
0x1c73   : > { %v3708_v51 = vpop.xlane.xlu1 %3707 }
0x1c74   : > { %v3709_v36 = vmul.f32 0.0078125, %v3708_v51 }
0x1c76   : > { %v3710_v52 = vadd.f32 1e-05, %v3709_v36 }
0x1c78   : > { %7558 = vrsqrt.f32 %v3710_v52 }
0x1c82   : > { %v7559_v53 = vpop.eup %7558 }
0x1c83   : > { %v3712_v55 = vmul.f32 %v7559_v53, %v3704_v41 }
0x1c85   : > { %v3719_v58 = vmul.f32 %v6442_v40, %v3712_v55  ;;  %v3971_v55 = vld [vmem:[%s9992_s11] sm:$0xf] }
0x1c87   : > { %v3726_v59 = vadd.f32 %v6443_v56, %v3719_v58  ;;  %v6465_v56 = vld [vmem:[%s9992_s11 + $0x4] sm:$0xf]  ;;  %s9994_s11 = sld [smem:[#allocation92_spill]] }
0x1c89   : > { %v3743_v43 = vpack.c.bf16 %v3726_v59, %v3726_v59 }
0x1c8b   : > { %6888 = vmatmul.mubr.bf16.vlgmr.msra.gmra.mrb[32].mxu0 %v3743_v43 }
0x1c8c   : > { %6893 = vmatprep.mubr.msk.bf16.mxu0 %vm8427_vm0, %v8426_v0 }
0x1d5e   : > { %v9421_v61 = vpop.f32.mrb[32].mxu0 }
0x1d5f   : > { %v6889_v62 = vpop.f32.mrb[33].mxu0  ;;  %v3835_v46 = vsel %vm3834_vm9, %v9421_v61, 0.0 }
0x1d60   : > { %3836 = vadd.xlane.f32.xlu0 %v3835_v46  ;;  %v3829_v1 = vpop.f32.mrb[34].mxu0 }
0x1d61   : > { %v6890_v2 = vpop.f32.mrb[35].mxu0 }
0x1ded   : > { %v3837_v3 = vpop.xlane.xlu0 %3836 }
0x1dee   : > { %v3839_v4 = vmul.f32 0.015625, %v3837_v3 }
0x1df0   : > { %v3840_v54 = vsub.f32 %v9421_v61, %v3839_v4 }
0x1df2   : > { %v3841_v5 = vmul.f32 %v3840_v54, %v3840_v54 }
0x1df4   : > { %v3842_v6 = vsel %vm3834_vm9, %v3841_v5, 0.0 }
0x1df5   : > { %3843 = vadd.xlane.f32.xlu0 %v3842_v6 }
0x1e82   : > { %v3844_v60 = vpop.xlane.xlu0 %3843 }
0x1e83   : > { %v3845_v15 = vmul.f32 0.015625, %v3844_v60 }
0x1e85   : > { %v3846_v63 = vadd.f32 1e-05, %v3845_v15 }
0x1e87   : > { %7560 = vrsqrt.f32 %v3846_v63 }
0x1e91   : > { %v7561_v16 = vpop.eup %7560 }
0x1e92   : > { %v3848_v18 = vmul.f32 %v7561_v16, %v3840_v54 }
0x1e94   : > { %v3855_v20 = vmul.f32 %v6452_v17, %v3848_v18 }
0x1e96   : > { %v3862_v21 = vadd.f32 %v6453_v19, %v3855_v20 }
0x1e98   : > { %v3871_v22 = vpack.c.bf16 %v3862_v21, %v3862_v21 }
0x1e9a   : > { %6462 = vmatmul.mubr.msk.bf16.vlgmr.msra.gmra.mrb[36].mxu1 %vm3662_vm3, %v3871_v22 }
0x1e9b   : > { %6905 = vmatprep.mubr.msk.bf16.mxu1 %vm8427_vm0, %v8426_v0 }
0x1f6d   : > { %v3961_v28 = vpop.f32.mrb[36].mxu1 }
0x1f6e   : > { %v3962_v29 = vadd.f32 %v3961_v28, %v3877_v27  ;;  %v3963_v30 = vpop.f32.mrb[37].mxu1 }
0x1f6f   : > { %v3965_v31 = vpop.f32.mrb[38].mxu1  ;;  %v3964_v42 = vadd.f32 %v3963_v30, %v3881_v39 }
0x1f70   : > { %v3968_v32 = vmul.f32 0.25, %v3962_v29  ;;  %v3970_v34 = vpack.c.bf16 %v3962_v29, %v3962_v29  ;;  %v3966_v35 = vpop.f32.mrb[39].mxu1 }
0x1f71   : > { %v9460_v48 = vpack.c.bf16 %v3964_v42, %v3964_v42 }
0x1f72   : > { %4087 = vrot.lane.b32.xlu1 %v3970_v34, %s9977_s8  ;;  %3973 = vrot.lane.b32.xlu0 %v3970_v34, %s9976_s28  ;;  %v3969_v37 = vpack.c.bf16 %v3968_v32, %v3968_v32 }
0x1f73   : > { %v4040_v51 = vsel %vm3692_vm6, %v9460_v48, 0 }
0x1f76   : > { %4198 = vrot.lane.b32.xlu0 %v3969_v37, %s9983_s6  ;;  %4085 = vrot.lane.b32.xlu1 %v3969_v37, %s9975_s0 }
0x1f7a   : > { %4310 = vrot.lane.b32.xlu0 %v3969_v37, %s9974_s3  ;;  %4200 = vrot.lane.b32.xlu1 %v3970_v34, %s9991_s10 }
0x1f7e   : > { %4312 = vrot.lane.b32.xlu1 %v3970_v34, %s9980_s9 }
0x1fe4   : > { %v4088_v41 = vpop.permute.xlu1 %4087  ;;  %v3974_v33 = vpop.permute.xlu0 %3973 }
0x1fe5   : > { %v4093_v44 = vsel %vm2177_vm1, %v4088_v41, 0  ;;  %v3979_v45 = vsel %vm2177_vm1, %v3974_v33, 0 }
0x1fe6   : > { %6892 = vmatpush3.bf16.xpose.msra.mxu0 %v3979_v45  ;;  %6904 = vmatpush3.bf16.xpose.msra.mxu1 %v4093_v44 }
0x1fe7   : > { %6897 = vmatprep.subr.bf16.mxu0 %v8426_v0  ;;  %6915 = vmatprep.subr.bf16.mxu1 %v8426_v0 }
0x1fe8   : > { %v4086_v47 = vpop.permute.xlu1 %4085  ;;  %v4199_v52 = vpop.permute.xlu0 %4198 }
0x1fec   : > { %v4201_v49 = vpop.permute.xlu1 %4200  ;;  %v4311_v40 = vpop.permute.xlu0 %4310 }
0x1fed   : > { %v4206_v50 = vsel %vm2177_vm1, %v4201_v49, 0  ;;  %6894 = vmatmul.mubr.msk.bf16.vlgmr.msra.gmra.mrb[36].mxu0 %vm2177_vm1, %v3969_v37  ;;  %6906 = vmatmul.mubr.msk.bf16.vlgmr.msra.gmra.mrb[40].mxu1 %vm2177_vm1, %v4086_v47 }
0x1fee   : > { %6898 = vmatpush3.bf16.msra.mxu0 %v4040_v51  ;;  %6916 = vmatpush3.bf16.xpose.msra.mxu1 %v4206_v50 }
0x1fef   : > { %6917 = vmatprep.mubr.msk.bf16.mxu1 %vm8427_vm0, %v8426_v0  ;;  %6927 = vmatprep.subr.bf16.mxu1 %v8426_v0 }
0x1ff0   : > { %6899 = vmatprep.mubr.msk.bf16.mxu0 %vm8427_vm0, %v8426_v0  ;;  %6909 = vmatprep.subr.bf16.mxu0 %v8426_v0  ;;  %v4313_v36 = vpop.permute.xlu1 %4312 }
0x1ff1   : > { %v4318_v53 = vsel %vm2177_vm1, %v4313_v36, 0 }
0x1ff5   : > { %6918 = vmatmul.mubr.msk.bf16.vlgmr.msra.gmra.mrb[44].mxu1 %vm2177_vm1, %v4199_v52 }
0x1ff6   : > { %6928 = vmatpush3.bf16.xpose.msra.mxu1 %v4318_v53  ;;  %6929 = vmatprep.mubr.msk.bf16.mxu1 %vm8427_vm0, %v8426_v0 }
0x1ff7   : > { %6939 = vmatprep.subr.bf16.mxu1 %v8426_v0 }
0x1ffd   : > { %6930 = vmatmul.mubr.msk.bf16.vlgmr.msra.gmra.mrb[48].mxu1 %vm2177_vm1, %v4311_v40 }
0x1ffe   : > { %6947 = vmatprep.mubr.msk.bf16.mxu1 %vm8427_vm0, %v8426_v0 }
0x20c0   : > { %v4015_v58 = vpop.f32.mrb[36].mxu0  ;;  %v4129_v59 = vpop.f32.mrb[40].mxu1 }
0x20c1   : > { %v4016_v43 = vadd.f32 %v4015_v58, %v3971_v55  ;;  %v4130_v62 = vadd.f32 %v6465_v56, %v4129_v59  ;;  %v6895_v46 = vpop.f32.mrb[37].mxu0  ;;  %v6907_v1 = vpop.f32.mrb[41].mxu1 }
0x20c2   : > { %v4018_v2 = vpop.f32.mrb[38].mxu0  ;;  %v4132_v3 = vpop.f32.mrb[42].mxu1 }
0x20c3   : > { %v6896_v4 = vpop.f32.mrb[39].mxu0  ;;  %v6908_v54 = vpop.f32.mrb[43].mxu1  ;;  %v4135_v5 = vsel %vm4021_vm10, %v4130_v62, -inf  ;;  %v4022_v6 = vsel %vm4021_vm10, %v4016_v43, -inf }
0x20c4   : > { %4136 = vmax.xlane.f32.xlu0 %v4135_v5  ;;  %4023 = vmax.xlane.f32.xlu1 %v4022_v6  ;;  %v7418_v54 = vld [vmem:[%s9993_s4] sm:$0xff]  }
0x20c5   : > { %6940 = vmatpush3.bf16.msra.mxu1 %v7418_v54  ;;  %v7436_v54 = vld [vmem:[%s9998_s13 + $0x48] sm:$0xff]  }
0x20c6   : > { %6941 = vmatprep.subr.bf16.mxu1 %v8426_v0 }
0x20c8   : > { %v4242_v7 = vpop.f32.mrb[44].mxu1 }
0x20c9   : > { %v4243_v8 = vadd.f32 %v6468_v57, %v4242_v7  ;;  %v6919_v9 = vpop.f32.mrb[45].mxu1 }
0x20ca   : > { %v4245_v10 = vpop.f32.mrb[46].mxu1 }
0x20cb   : > { %v6920_v11 = vpop.f32.mrb[47].mxu1  ;;  %v4248_v12 = vsel %vm4021_vm10, %v4243_v8, -inf }
0x20cc   : > { %4249 = vmax.xlane.f32.xlu0 %v4248_v12  ;;  %v7419_v12 = vld [vmem:[%s9993_s4 + $0x8] sm:$0xff]  }
0x20cd   : > { %6942 = vmatpush3.bf16.msra.mxu1 %v7419_v12  ;;  %v7445_v12 = vld [vmem:[%s9998_s13 + $0x28] sm:$0xff]  }
0x20ce   : > { %6943 = vmatprep.subr.bf16.mxu1 %v8426_v0 }
0x20d0   : > { %v4354_v60 = vpop.f32.mrb[48].mxu1 }
0x20d1   : > { %v4355_v15 = vadd.f32 %v6471_v13, %v4354_v60  ;;  %v6931_v63 = vpop.f32.mrb[49].mxu1  ;;  %v7420_v13 = vld [vmem:[%s9993_s4 + $0x10] sm:$0xff]   ;;  %v7421_v60 = vld [vmem:[%s9993_s4 + $0x18] sm:$0xff]   ;;  %s9995_s4 = sld [smem:[#allocation90_spill]] }
0x20d2   : > { %v4357_v16 = vpop.f32.mrb[50].mxu1  ;;  %6944 = vmatpush3.bf16.msra.mxu1 %v7420_v13  ;;  %v7446_v13 = vld [vmem:[%s9998_s13 + $0x70] sm:$0xff]  }
0x20d3   : > { %v6932_v17 = vpop.f32.mrb[51].mxu1  ;;  %v4360_v18 = vsel %vm4021_vm10, %v4355_v15, -inf  ;;  %6945 = vmatprep.subr.bf16.mxu1 %v8426_v0 }
0x20d4   : > { %4361 = vmax.xlane.f32.xlu0 %v4360_v18 }
0x20d6   : > { %6946 = vmatpush3.bf16.msra.mxu1 %v7421_v60  ;;  %v7447_v60 = vld [vmem:[%s9998_s13 + $0x30] sm:$0xff]  }
0x2151   : > { %v4137_v19 = vpop.xlane.xlu0 %4136  ;;  %v4024_v20 = vpop.xlane.xlu1 %4023 }
0x2152   : > { %v4138_v21 = vsub.f32 %v4130_v62, %v4137_v19  ;;  %v4025_v22 = vsub.f32 %v4016_v43, %v4024_v20 }
0x2154   : > { %v4139_v23 = vmul.f32 1.442695, %v4138_v21  ;;  %v4026_v24 = vmul.f32 1.442695, %v4025_v22 }
0x2156   : > { %7562 = vpow2.f32 %v4139_v23 }
0x2157   : > { %7564 = vpow2.f32 %v4026_v24 }
0x2159   : > { %v4250_v26 = vpop.xlane.xlu0 %4249 }
0x215a   : > { %v4251_v39 = vsub.f32 %v4243_v8, %v4250_v26 }
0x215c   : > { %v4252_v41 = vmul.f32 1.442695, %v4251_v39 }
0x2160   : > { %v7563_v27 = vpop.eup %7562 }
0x2161   : > { %v7565_v28 = vpop.eup %7564  ;;  %v4362_v29 = vpop.xlane.xlu0 %4361  ;;  %v4141_v30 = vsel %vm4021_vm10, %v7563_v27, 0.0 }
0x2162   : > { %v4363_v31 = vsub.f32 %v4355_v15, %v4362_v29  ;;  %4142 = vadd.xlane.f32.xlu0 %v4141_v30  ;;  %v4028_v32 = vsel %vm4021_vm10, %v7565_v28, 0.0  ;;  %v6474_v30 = vld [vmem:[%s9994_s11] ss:$0 sm:$0xff]  ;;  %s9996_s11 = sld [smem:[#allocation87_spill]] }
0x2163   : > { %4029 = vadd.xlane.f32.xlu1 %v4028_v32 }
0x2164   : > { %v4364_v34 = vmul.f32 1.442695, %v4363_v31 }
0x2166   : > { %7566 = vpow2.f32 %v4364_v34 }
0x2167   : > { %7568 = vpow2.f32 %v4252_v41 }
0x2170   : > { %v7567_v35 = vpop.eup %7566 }
0x2171   : > { %v4366_v37 = vsel %vm4021_vm10, %v7567_v35, 0.0  ;;  %v7569_v33 = vpop.eup %7568 }
0x2172   : > { %4367 = vadd.xlane.f32.xlu0 %v4366_v37  ;;  %v4254_v42 = vsel %vm4021_vm10, %v7569_v33, 0.0 }
0x2174   : > { %4148 = vrot.lane.b32.xlu1 %v9460_v48, %s9975_s0 }
0x2188   : > { %4260 = vrot.lane.b32.xlu0 %v9460_v48, %s9983_s6 }
0x2198   : > { %4255 = vadd.xlane.f32.xlu1 %v4254_v42 }
0x21a9   : > { %4372 = vrot.lane.b32.xlu1 %v9460_v48, %s9974_s3 }
0x21ef   : > { %v4143_v45 = vpop.xlane.xlu0 %4142 }
0x21f0   : > { %v4030_v44 = vpop.xlane.xlu1 %4029 }
0x21f1   : > { %7570 = vrcp.f32 %v4030_v44 }
0x21f2   : > { %7572 = vrcp.f32 %v4143_v45 }
0x21f4   : > { %v4149_v50 = vpop.permute.xlu1 %4148 }
0x21f5   : > { %v4154_v53 = vsel %vm3692_vm6, %v4149_v50, 0  ;;  %v7427_v50 = vld [vmem:[%s9995_s4 + $0x14] ss:$8 sps:$4 sm:$0xff]  }
0x21fb   : > { %v7571_v47 = vpop.eup %7570 }
0x21fc   : > { %v4032_v49 = vmul.f32 %v7571_v47, %v7565_v28  ;;  %v7573_v36 = vpop.eup %7572 }
0x21fd   : > { %v4145_v48 = vmul.f32 %v7573_v36, %v7563_v27  ;;  %v7430_v36 = vld [vmem:[%s9995_s4 + $0x24] ss:$8 sps:$4 sm:$0xff]  }
0x21fe   : > { %v4033_v51 = vpack.c.bf16 %v4032_v49, %v4032_v49  ;;  %v7424_v49 = vld [vmem:[%s9995_s4 + $0x4] ss:$8 sps:$4 sm:$0xff]  }
0x21ff   : > { %v4368_v52 = vpop.xlane.xlu0 %4367  ;;  %v4146_v55 = vpack.c.bf16 %v4145_v48, %v4145_v48  ;;  %v7431_v48 = vld [vmem:[%s9995_s4 + $0x30] ss:$8 sps:$4 sm:$0xff]  }
0x2200   : > { %6900 = vmatmul.mubr.msk.bf16.vlgmr.msra.gmra.mrb[40].mxu0 %vm4035_vm11, %v4033_v51  ;;  %v7425_v51 = vld [vmem:[%s9995_s4 + $0x10] ss:$8 sps:$4 sm:$0xff]  }
0x2201   : > { %6910 = vmatpush3.bf16.msra.mxu0 %v4154_v53  ;;  %6911 = vmatprep.mubr.msk.bf16.mxu0 %vm8427_vm0, %v8426_v0  ;;  %v7433_v53 = vld [vmem:[%s9995_s4 + $0x34] ss:$8 sps:$4 sm:$0xff]  }
0x2202   : > { %6921 = vmatprep.subr.bf16.mxu0 %v8426_v0 }
0x2203   : > { %v4261_v40 = vpop.permute.xlu0 %4260 }
0x2204   : > { %v4266_v56 = vsel %vm3692_vm6, %v4261_v40, 0 }
0x2208   : > { %6912 = vmatmul.mubr.msk.bf16.vlgmr.msra.gmra.mrb[44].mxu0 %vm4035_vm11, %v4146_v55 }
0x2209   : > { %6922 = vmatpush3.bf16.msra.mxu0 %v4266_v56  ;;  %6923 = vmatprep.mubr.msk.bf16.mxu0 %vm8427_vm0, %v8426_v0 }
0x220a   : > { %6933 = vmatprep.subr.bf16.mxu0 %v8426_v0 }
0x2225   : > { %v4256_v58 = vpop.xlane.xlu1 %4255 }
0x2226   : > { %7574 = vrcp.f32 %v4256_v58 }
0x2227   : > { %7576 = vrcp.f32 %v4368_v52  ;;  %v7428_v52 = vld [vmem:[%s9995_s4 + $0x20] ss:$8 sps:$4 sm:$0xff]  }
0x2229   : > { %v4373_v62 = vpop.permute.xlu1 %4372 }
0x222a   : > { %v4378_v2 = vsel %vm3692_vm6, %v4373_v62, 0  ;;  %v6481_v62 = vld [vmem:[%s9997_s12] ss:$0 sm:$0xff]  ;;  %s9999_s12 = sld [smem:[#allocation88_spill]] }
0x2230   : > { %v7575_v59 = vpop.eup %7574 }
0x2231   : > { %v4258_v43 = vmul.f32 %v7575_v59, %v7569_v33  ;;  %v7577_v1 = vpop.eup %7576  ;;  %v6480_v59 = vld [vmem:[%s9996_s11] ss:$0 sm:$0xff]  ;;  %s10000_s11 = sld [smem:[#allocation89_spill]] }
0x2232   : > { %v4370_v3 = vmul.f32 %v7577_v1, %v7567_v35 }
0x2233   : > { %v4259_v46 = vpack.c.bf16 %v4258_v43, %v4258_v43 }
0x2234   : > { %v4371_v4 = vpack.c.bf16 %v4370_v3, %v4370_v3  ;;  %v7434_v3 = vld [vmem:[%s9998_s13 + $0x40] sm:$0xff]  }
0x2235   : > { %6924 = vmatmul.mubr.msk.bf16.vlgmr.msra.gmra.mrb[48].mxu0 %vm4035_vm11, %v4259_v46  ;;  %6659 = vmatprep.subr.bf16.mxu1 %v7434_v3  ;;  %v7452_v3 = vld [vmem:[%s8755_s19 + $0x4] ss:$8 sps:$4 sm:$0xff]  }
0x2236   : > { %6934 = vmatpush3.bf16.msra.mxu0 %v4378_v2  ;;  %6935 = vmatprep.mubr.msk.bf16.mxu0 %vm8427_vm0, %v8426_v0 }
0x2237   : > { %4613 = vmatprep.subr.bf16.mxu0 %v7424_v49 }
0x223d   : > { %6936 = vmatmul.mubr.msk.bf16.vlgmr.msra.gmra.mrb[52].mxu0 %vm4035_vm11, %v4371_v4  ;;  %v7435_v4 = vld [vmem:[%s9998_s13] sm:$0xff]  }
0x223e   : > { %4645 = vmatprep.mubr.bf16.mxu0 %v8435_v14 }
0x22d3   : > { %v4076_v5 = vpop.f32.mrb[40].mxu0 }
0x22d4   : > { %v6901_v6 = vpop.f32.mrb[41].mxu0 }
0x22d5   : > { %v4079_v57 = vpop.f32.mrb[42].mxu0  ;;  %v7438_v6 = vld [vmem:[%s9998_s13 + $0x50] sm:$0xff]  }
0x22d6   : > { %v6902_v7 = vpop.f32.mrb[43].mxu0  ;;  %v7439_v57 = vld [vmem:[%s9998_s13 + $0x10] sm:$0xff]  }
0x22d7   : > { %v7440_v7 = vld [vmem:[%s9998_s13 + $0x58] sm:$0xff]  }
0x22db   : > { %v4190_v8 = vpop.f32.mrb[44].mxu0 }
0x22dc   : > { %4421 = vrot.lane.b32.xlu1 %v4190_v8, %s9980_s9  ;;  %v6913_v9 = vpop.f32.mrb[45].mxu0  ;;  %v7441_v8 = vld [vmem:[%s9998_s13 + $0x18] sm:$0xff]  }
0x22dd   : > { %v4193_v10 = vpop.f32.mrb[46].mxu0  ;;  %v7442_v9 = vld [vmem:[%s9998_s13 + $0x60] sm:$0xff]  }
0x22de   : > { %v6914_v11 = vpop.f32.mrb[47].mxu0  ;;  %v7443_v10 = vld [vmem:[%s9998_s13 + $0x20] sm:$0xff]  }
0x22df   : > { %v7444_v11 = vld [vmem:[%s9998_s13 + $0x68] sm:$0xff]  }
0x2308   : > { %v4302_v15 = vpop.f32.mrb[48].mxu0 }
0x2309   : > { %4425 = vrot.lane.b32.xlu1 %v4302_v15, %s9991_s10  ;;  %v6925_v63 = vpop.f32.mrb[49].mxu0  ;;  %v7448_v15 = vld [vmem:[%s9998_s13 + $0x78] sm:$0xff]  }
0x230a   : > { %v4305_v16 = vpop.f32.mrb[50].mxu0  ;;  %v7449_v63 = vld [vmem:[%s9998_s13 + $0x38] sm:$0xff]  }
0x230b   : > { %v6926_v17 = vpop.f32.mrb[51].mxu0  ;;  %v4558_v16 = vld [vmem:[%s9999_s12] sm:$0x3]  ;;  %s10001_s12 = sld [smem:[#allocation98_spill]] }
0x230c   : > { %v4563_v17 = vrot.slane %v4558_v16, %v9442_v25 }
0x2310   : > { %v4414_v18 = vpop.f32.mrb[52].mxu0 }
0x2311   : > { %4429 = vrot.lane.b32.xlu0 %v4414_v18, %s9977_s8  ;;  %v6937_v19 = vpop.f32.mrb[53].mxu0  ;;  %v4567_v18 = vrot.slane %v4558_v16, %v9453_v38 }
0x2312   : > { %v4417_v20 = vpop.f32.mrb[54].mxu0 }
0x2313   : > { %v6938_v21 = vpop.f32.mrb[55].mxu0 }
0x234e   : > { %v4422_v22 = vpop.permute.xlu1 %4421 }
0x234f   : > { %v4432_v24 = vsel %vm2177_vm1, %v4076_v5, %v4422_v22  ;;  %v7437_v5 = vld [vmem:[%s9998_s13 + $0x8] sm:$0xff]  }
0x237b   : > { %v4426_v23 = vpop.permute.xlu1 %4425 }
0x237c   : > { %v4433_v26 = vsel %vm2224_vm2, %v4432_v24, %v4426_v23 }
0x2383   : > { %v4430_v27 = vpop.permute.xlu0 %4429 }
0x2384   : > { %v4435_v28 = vsel %vm4434_vm12, %v4433_v26, %v4430_v27 }
0x2385   : > { %v4444_v29 = vpack.c.bf16 %v4435_v28, %v4435_v28 }
0x2387   : > { %6948 = vmatmul.mubr.msk.bf16.vlgmr.msra.gmra.mrb[52].mxu1 %vm3662_vm3, %v4444_v29 }
0x2388   : > { %6660 = vmatpush3.bf16.msra.mxu1 %v7435_v4  ;;  %v7455_v4 = vld [vmem:[%s8755_s19 + $0x14] ss:$8 sps:$4 sm:$0xff]  }
0x2389   : > { %6661 = vmatprep.subr.bf16.mxu1 %v7436_v54  ;;  %v7453_v54 = vld [vmem:[%s8755_s19 + $0x10] ss:$8 sps:$4 sm:$0xff]  }
0x238c   : > { %6662 = vmatpush3.bf16.msra.mxu1 %v7437_v5  ;;  %v7458_v5 = vld [vmem:[%s8755_s19 + $0x24] ss:$8 sps:$4 sm:$0xff]  }
0x238d   : > { %6663 = vmatprep.subr.bf16.mxu1 %v7438_v6  ;;  %v7456_v6 = vld [vmem:[%s8755_s19 + $0x20] ss:$8 sps:$4 sm:$0xff]  }
0x2390   : > { %6664 = vmatpush3.bf16.msra.mxu1 %v7439_v57  ;;  %v7461_v57 = vld [vmem:[%s8755_s19 + $0x34] ss:$8 sps:$4 sm:$0xff]  }
0x2391   : > { %6665 = vmatprep.subr.bf16.mxu1 %v7440_v7  ;;  %v7459_v7 = vld [vmem:[%s8755_s19 + $0x30] ss:$8 sps:$4 sm:$0xff]  }
0x2394   : > { %6666 = vmatpush3.bf16.msra.mxu1 %v7441_v8 }
0x2395   : > { %6667 = vmatprep.subr.bf16.mxu1 %v7442_v9 }
0x2398   : > { %6668 = vmatpush3.bf16.msra.mxu1 %v7443_v10 }
0x2399   : > { %6669 = vmatprep.subr.bf16.mxu1 %v7444_v11 }
0x239c   : > { %6670 = vmatpush3.bf16.msra.mxu1 %v7445_v12  ;;  %v6508_v12 = vld [vmem:[%s10001_s12] ss:$0 sm:$0xff]  ;;  %s10011_s12 = sld [smem:[#allocation102_spill]] }
0x239d   : > { %6671 = vmatprep.subr.bf16.mxu1 %v7446_v13 }
0x23a0   : > { %6672 = vmatpush3.bf16.msra.mxu1 %v7447_v60 }
0x23a1   : > { %6673 = vmatprep.subr.bf16.mxu1 %v7448_v15 }
0x23a4   : > { %6674 = vmatpush3.bf16.msra.mxu1 %v7449_v63 }
0x23a5   : > { %6963 = vmatprep.subr.bf16.mxu1 %v8426_v0 }
0x245a   : > { %v4513_v31 = vpop.f32.mrb[52].mxu1 }
0x245b   : > { %v4514_v32 = vadd.f32 %v6474_v30, %v4513_v31  ;;  %v6949_v34 = vpop.f32.mrb[53].mxu1 }
0x245c   : > { %v4516_v35 = vpop.f32.mrb[54].mxu1 }
0x245d   : > { %v9531_v37 = vadd.f32 %v4514_v32, %v9421_v61  ;;  %v6950_v39 = vpop.f32.mrb[55].mxu1  ;;  %v7422_v61 = vld [vmem:[%s9995_s4] ss:$8 sps:$4 sm:$0xff]  }
0x245e   : > { %4614 = vmatpush1.bf16.msra.mxu0 %v7422_v61 }
0x245f   : > { %v4522_v41 = vsel %vm3834_vm9, %v9531_v37, 0.0  ;;  %4615 = vmatprep.subr.bf16.mxu0 %v7427_v50 }
0x2460   : > { %4523 = vadd.xlane.f32.xlu1 %v4522_v41 }
0x2462   : > { %4616 = vmatpush1.bf16.msra.mxu0 %v7425_v51 }
0x2463   : > { %4617 = vmatprep.subr.bf16.mxu0 %v7430_v36 }
0x2466   : > { %4618 = vmatpush1.bf16.msra.mxu0 %v7428_v52 }
0x2467   : > { %4619 = vmatprep.subr.bf16.mxu0 %v7433_v53 }
0x246a   : > { %4620 = vmatpush1.bf16.msra.mxu0 %v7431_v48 }
0x246b   : > { %4944 = vmatprep.subr.bf16.mxu0 %v7452_v3 }
0x24ed   : > { %v4524_v33 = vpop.xlane.xlu1 %4523 }
0x24ee   : > { %v4525_v42 = vmul.f32 0.015625, %v4524_v33 }
0x24f0   : > { %v4526_v44 = vsub.f32 %v9531_v37, %v4525_v42 }
0x24f2   : > { %v4527_v45 = vmul.f32 %v4526_v44, %v4526_v44 }
0x24f4   : > { %v4528_v47 = vsel %vm3834_vm9, %v4527_v45, 0.0 }
0x24f5   : > { %4529 = vadd.xlane.f32.xlu0 %v4528_v47 }
0x2582   : > { %v4530_v40 = vpop.xlane.xlu0 %4529 }
0x2583   : > { %v4531_v55 = vmul.f32 0.015625, %v4530_v40  ;;  %v6507_v40 = vld [vmem:[%s10000_s11] ss:$0 sm:$0xff]  ;;  %s10002_s11 = sld [smem:[#allocation97_spill]] }
0x2585   : > { %v4532_v56 = vadd.f32 1e-05, %v4531_v55 }
0x2587   : > { %7578 = vrsqrt.f32 %v4532_v56 }
0x2589   : > { %v6509_v60 = vld [vmem:[%s10002_s11] ss:$0 sm:$0xff]  ;;  %s10012_s11 = sld [smem:[#allocation53_spill]] }
0x2591   : > { %v7579_v58 = vpop.eup %7578 }
0x2592   : > { %v4534_v43 = vmul.f32 %v7579_v58, %v4526_v44 }
0x2594   : > { %v4541_v46 = vmul.f32 %v6480_v59, %v4534_v43 }
0x2596   : > { %v4548_v1 = vadd.f32 %v6481_v62, %v4541_v46 }
0x2598   : > { %v4557_v2 = vpack.c.bf16 %v4548_v1, %v4548_v1 }
0x259a   : > { %6490 = vmatmul.mubr.msk.bf16.vlgmr.msra.gmra.mrb[56].mxu0 %vm3662_vm3, %v4557_v2 }
0x259b   : > { %4976 = vmatprep.mubr.bf16.mxu0 %v8435_v14 }
0x266d   : > { %v4647_v19 = vpop.f32.mrb[56].mxu0 }
0x266e   : > { %v4648_v20 = vadd.f32 %v4647_v19, %v4563_v17  ;;  %v4649_v21 = vpop.f32.mrb[57].mxu0  ;;  %v4889_v17 = vld [vmem:[%s10003_s5] sm:$0x3] }
0x266f   : > { %v4650_v22 = vadd.f32 %v4649_v21, %v4567_v18  ;;  %v4651_v23 = vpop.f32.mrb[58].mxu0  ;;  %v4894_v18 = vrot.slane %v4889_v17, %v9442_v25 }
0x2670   : > { %v4654_v24 = vmul.f32 %v4648_v20, %v4648_v20  ;;  %v4652_v26 = vpop.f32.mrb[59].mxu0 }
0x2671   : > { %v4655_v27 = vmul.f32 %v4650_v22, %v4650_v22 }
0x2672   : > { %v4656_v28 = vmul.f32 %v4654_v24, %v4648_v20 }
0x2673   : > { %v4657_v29 = vmul.f32 %v4655_v27, %v4650_v22 }
0x2674   : > { %v4658_v30 = vmul.f32 0.044715, %v4656_v28  ;;  %v4898_v28 = vrot.slane %v4889_v17, %v9453_v38 }
0x2675   : > { %v4659_v31 = vmul.f32 0.044715, %v4657_v29 }
0x2676   : > { %v4660_v32 = vadd.f32 %v4658_v30, %v4648_v20 }
0x2677   : > { %v4661_v34 = vadd.f32 %v4659_v31, %v4650_v22 }
0x2678   : > { %v4662_v35 = vmul.f32 0.7978846, %v4660_v32 }
0x2679   : > { %v4663_v39 = vmul.f32 0.7978846, %v4661_v34 }
0x267a   : > { %7580 = vtanh.f32 %v4662_v35 }
0x267b   : > { %7582 = vtanh.f32 %v4663_v39 }
0x2684   : > { %v7581_v41 = vpop.eup %7580 }
0x2685   : > { %v7583_v33 = vpop.eup %7582  ;;  %v4666_v42 = vadd.f32 1.0, %v7581_v41 }
0x2686   : > { %v4667_v44 = vadd.f32 1.0, %v7583_v33 }
0x2687   : > { %v4668_v45 = vmul.f32 0.5, %v4666_v42 }
0x2688   : > { %v4669_v47 = vmul.f32 0.5, %v4667_v44 }
0x2689   : > { %v4670_v49 = vmul.f32 %v4668_v45, %v4648_v20 }
0x268a   : > { %v4671_v61 = vmul.f32 %v4669_v47, %v4650_v22 }
0x268b   : > { %v4704_v51 = vpack.c.bf16 %v4670_v49, %v4670_v49 }
0x268c   : > { %v4705_v50 = vpack.c.bf16 %v4671_v61, %v4671_v61  ;;  %v4988_v61 = vld [vmem:[%s8760_s20] sm:$0xf] }
0x268e   : > { %4834 = vmatprep.mubr.bf16.mxu1 %v4705_v50  ;;  %v6521_v50 = vld [vmem:[%s8760_s20 + $0x4] sm:$0xf] }
0x268f   : > { %4835 = vmatmul.mubr.bf16.vlgmr.msra.gmra.mrb[56].mxu1 %v4704_v51 }
0x2690   : > { %6965 = vmatprep.mubr.msk.bf16.mxu1 %vm8427_vm0, %v8426_v0 }
0x2762   : > { %v6675_v36 = vpop.f32.mrb[56].mxu1 }
0x2763   : > { %v6676_v52 = vpop.f32.mrb[57].mxu1 }
0x2764   : > { %v6677_v53 = vadd.f32 %v6676_v52, %v6675_v36  ;;  %v6678_v48 = vpop.f32.mrb[58].mxu1 }
0x2765   : > { %v6679_v55 = vpop.f32.mrb[59].mxu1 }
0x2766   : > { %v4842_v56 = vadd.f32 %v6677_v53, %v9531_v37  ;;  %v7450_v37 = vld [vmem:[%s8755_s19] ss:$8 sps:$4 sm:$0xff]  }
0x2767   : > { %4945 = vmatpush1.bf16.msra.mxu0 %v7450_v37 }
0x2768   : > { %v9573_v58 = vadd.f32 %v6507_v40, %v4842_v56  ;;  %4946 = vmatprep.subr.bf16.mxu0 %v7455_v4 }
0x276a   : > { %v4853_v59 = vsel %vm3834_vm9, %v9573_v58, 0.0 }
0x276b   : > { %4854 = vadd.xlane.f32.xlu0 %v4853_v59  ;;  %4947 = vmatpush1.bf16.msra.mxu0 %v7453_v54 }
0x276c   : > { %4948 = vmatprep.subr.bf16.mxu0 %v7458_v5 }
0x276f   : > { %4949 = vmatpush1.bf16.msra.mxu0 %v7456_v6  ;;  %v6527_v6 = vld [vmem:[%s8760_s20 + $0xc] sm:$0xf] }
0x2770   : > { %4950 = vmatprep.subr.bf16.mxu0 %v7461_v57 }
0x2773   : > { %4951 = vmatpush1.bf16.msra.mxu0 %v7459_v7 }
0x2774   : > { %6951 = vmatprep.subr.bf16.mxu0 %v8426_v0 }
0x27f8   : > { %v4855_v43 = vpop.xlane.xlu0 %4854 }
0x27f9   : > { %v4856_v62 = vmul.f32 0.015625, %v4855_v43 }
0x27fb   : > { %v4857_v46 = vsub.f32 %v9573_v58, %v4856_v62 }
0x27fd   : > { %v4858_v1 = vmul.f32 %v4857_v46, %v4857_v46 }
0x27ff   : > { %v4859_v2 = vsel %vm3834_vm9, %v4858_v1, 0.0  ;;  %v6524_v1 = vld [vmem:[%s8760_s20 + $0x8] sm:$0xf] }
0x2800   : > { %4860 = vadd.xlane.f32.xlu0 %v4859_v2 }
0x288d   : > { %v4861_v8 = vpop.xlane.xlu0 %4860 }
0x288e   : > { %v4862_v9 = vmul.f32 0.015625, %v4861_v8 }
0x2890   : > { %v4863_v10 = vadd.f32 1e-05, %v4862_v9 }
0x2892   : > { %7584 = vrsqrt.f32 %v4863_v10 }
0x289c   : > { %v7585_v11 = vpop.eup %7584 }
0x289d   : > { %v4865_v13 = vmul.f32 %v7585_v11, %v4857_v46 }
0x289f   : > { %v4872_v15 = vmul.f32 %v6508_v12, %v4865_v13 }
0x28a1   : > { %v4879_v63 = vadd.f32 %v6509_v60, %v4872_v15 }
0x28a3   : > { %v4888_v16 = vpack.c.bf16 %v4879_v63, %v4879_v63 }
0x28a5   : > { %6518 = vmatmul.mubr.msk.bf16.vlgmr.msra.gmra.mrb[60].mxu0 %vm3662_vm3, %v4888_v16 }
0x28a6   : > { %6953 = vmatprep.mubr.msk.bf16.mxu0 %vm8427_vm0, %v8426_v0 }
0x2978   : > { %v4978_v19 = vpop.f32.mrb[60].mxu0 }
0x2979   : > { %v4979_v20 = vadd.f32 %v4978_v19, %v4894_v18  ;;  %v4980_v21 = vpop.f32.mrb[61].mxu0 }
0x297a   : > { %v4982_v22 = vpop.f32.mrb[62].mxu0  ;;  %v4981_v31 = vadd.f32 %v4980_v21, %v4898_v28 }
0x297b   : > { %v4985_v23 = vmul.f32 0.25, %v4979_v20  ;;  %v4987_v24 = vpack.c.bf16 %v4979_v20, %v4979_v20  ;;  %v4983_v26 = vpop.f32.mrb[63].mxu0 }
0x297c   : > { %v9607_v39 = vpack.c.bf16 %v4981_v31, %v4981_v31 }
0x297d   : > { %5102 = vrot.lane.b32.xlu0 %v4987_v24, %s9977_s8  ;;  %4990 = vrot.lane.b32.xlu1 %v4987_v24, %s9976_s28  ;;  %v4986_v27 = vpack.c.bf16 %v4985_v23, %v4985_v23  ;;  %s10008_s28 = sld [smem:[#allocation104_spill]] }
0x297e   : > { %v5055_v42 = vsel %vm3692_vm6, %v9607_v39, 0 }
0x2981   : > { %5327 = vrot.lane.b32.xlu0 %v4987_v24, %s9980_s9  ;;  %5100 = vrot.lane.b32.xlu1 %v4986_v27, %s9975_s0 }
0x2985   : > { %5215 = vrot.lane.b32.xlu1 %v4987_v24, %s9991_s10 }
0x2989   : > { %5213 = vrot.lane.b32.xlu1 %v4986_v27, %s9983_s6 }
0x298d   : > { %5325 = vrot.lane.b32.xlu1 %v4986_v27, %s9974_s3 }
0x29ef   : > { %v5103_v29 = vpop.permute.xlu0 %5102  ;;  %v4991_v30 = vpop.permute.xlu1 %4990 }
0x29f0   : > { %v5108_v32 = vsel %vm2177_vm1, %v5103_v29, 0  ;;  %v4996_v34 = vsel %vm2177_vm1, %v4991_v30, 0 }
0x29f1   : > { %6952 = vmatpush3.bf16.xpose.msra.mxu0 %v4996_v34  ;;  %6964 = vmatpush3.bf16.xpose.msra.mxu1 %v5108_v32 }
0x29f2   : > { %6957 = vmatprep.subr.bf16.mxu0 %v8426_v0  ;;  %6975 = vmatprep.subr.bf16.mxu1 %v8426_v0 }
0x29f3   : > { %v5101_v35 = vpop.permute.xlu1 %5100  ;;  %v5328_v44 = vpop.permute.xlu0 %5327 }
0x29f4   : > { %v5333_v47 = vsel %vm2177_vm1, %v5328_v44, 0 }
0x29f7   : > { %v5216_v41 = vpop.permute.xlu1 %5215 }
0x29f8   : > { %v5221_v33 = vsel %vm2177_vm1, %v5216_v41, 0  ;;  %6954 = vmatmul.mubr.msk.bf16.vlgmr.msra.gmra.mrb[64].mxu0 %vm2177_vm1, %v4986_v27  ;;  %6966 = vmatmul.mubr.msk.bf16.vlgmr.msra.gmra.mrb[60].mxu1 %vm2177_vm1, %v5101_v35 }
0x29f9   : > { %6958 = vmatpush3.bf16.msra.mxu0 %v5055_v42  ;;  %6976 = vmatpush3.bf16.xpose.msra.mxu1 %v5221_v33 }
0x29fa   : > { %6977 = vmatprep.mubr.msk.bf16.mxu1 %vm8427_vm0, %v8426_v0  ;;  %6987 = vmatprep.subr.bf16.mxu1 %v8426_v0 }
0x29fb   : > { %6959 = vmatprep.mubr.msk.bf16.mxu0 %vm8427_vm0, %v8426_v0  ;;  %6969 = vmatprep.subr.bf16.mxu0 %v8426_v0  ;;  %v5214_v45 = vpop.permute.xlu1 %5213 }
0x29ff   : > { %v5326_v49 = vpop.permute.xlu1 %5325 }
0x2a00   : > { %6978 = vmatmul.mubr.msk.bf16.vlgmr.msra.gmra.mrb[64].mxu1 %vm2177_vm1, %v5214_v45 }
0x2a01   : > { %6988 = vmatpush3.bf16.xpose.msra.mxu1 %v5333_v47  ;;  %6989 = vmatprep.mubr.msk.bf16.mxu1 %vm8427_vm0, %v8426_v0 }
0x2a02   : > { %6999 = vmatprep.subr.bf16.mxu1 %v8426_v0 }
0x2a08   : > { %6990 = vmatmul.mubr.msk.bf16.vlgmr.msra.gmra.mrb[68].mxu1 %vm2177_vm1, %v5326_v49 }
0x2a09   : > { %7007 = vmatprep.mubr.msk.bf16.mxu1 %vm8427_vm0, %v8426_v0 }
0x2acb   : > { %v5032_v51 = vpop.f32.mrb[64].mxu0  ;;  %v5144_v36 = vpop.f32.mrb[60].mxu1 }
0x2acc   : > { %v5033_v52 = vadd.f32 %v5032_v51, %v4988_v61  ;;  %v5145_v53 = vadd.f32 %v6521_v50, %v5144_v36  ;;  %v6955_v48 = vpop.f32.mrb[65].mxu0  ;;  %v6967_v40 = vpop.f32.mrb[61].mxu1 }
0x2acd   : > { %v5035_v55 = vpop.f32.mrb[66].mxu0  ;;  %v5147_v56 = vpop.f32.mrb[62].mxu1 }
0x2ace   : > { %v6956_v59 = vpop.f32.mrb[67].mxu0  ;;  %v6968_v43 = vpop.f32.mrb[63].mxu1  ;;  %v5150_v62 = vsel %vm4021_vm10, %v5145_v53, -inf  ;;  %v5038_v46 = vsel %vm4021_vm10, %v5033_v52, -inf }
0x2acf   : > { %5151 = vmax.xlane.f32.xlu1 %v5150_v62  ;;  %5039 = vmax.xlane.f32.xlu0 %v5038_v46 }
0x2ad3   : > { %v5257_v2 = vpop.f32.mrb[64].mxu1 }
0x2ad4   : > { %v5258_v3 = vadd.f32 %v6524_v1, %v5257_v2  ;;  %v6979_v37 = vpop.f32.mrb[65].mxu1 }
0x2ad5   : > { %v5260_v4 = vpop.f32.mrb[66].mxu1 }
0x2ad6   : > { %v6980_v54 = vpop.f32.mrb[67].mxu1  ;;  %v5263_v5 = vsel %vm4021_vm10, %v5258_v3, -inf }
0x2ad7   : > { %5264 = vmax.xlane.f32.xlu0 %v5263_v5 }
0x2adb   : > { %v5369_v57 = vpop.f32.mrb[68].mxu1 }
0x2adc   : > { %v5370_v7 = vadd.f32 %v6527_v6, %v5369_v57  ;;  %v6991_v8 = vpop.f32.mrb[69].mxu1 }
0x2add   : > { %v5372_v9 = vpop.f32.mrb[70].mxu1 }
0x2ade   : > { %v6992_v10 = vpop.f32.mrb[71].mxu1  ;;  %v5375_v11 = vsel %vm4021_vm10, %v5370_v7, -inf }
0x2adf   : > { %5376 = vmax.xlane.f32.xlu0 %v5375_v11 }
0x2b5c   : > { %v5152_v12 = vpop.xlane.xlu1 %5151  ;;  %v5040_v13 = vpop.xlane.xlu0 %5039 }
0x2b5d   : > { %v5153_v60 = vsub.f32 %v5145_v53, %v5152_v12  ;;  %v5041_v15 = vsub.f32 %v5033_v52, %v5040_v13 }
0x2b5f   : > { %v5154_v63 = vmul.f32 1.442695, %v5153_v60  ;;  %v5042_v16 = vmul.f32 1.442695, %v5041_v15 }
0x2b61   : > { %7586 = vpow2.f32 %v5154_v63 }
0x2b62   : > { %7588 = vpow2.f32 %v5042_v16 }
0x2b64   : > { %v5265_v17 = vpop.xlane.xlu0 %5264 }
0x2b65   : > { %v5266_v18 = vsub.f32 %v5258_v3, %v5265_v17 }
0x2b67   : > { %v5267_v19 = vmul.f32 1.442695, %v5266_v18 }
0x2b69   : > { %7590 = vpow2.f32 %v5267_v19 }
0x2b6b   : > { %v7587_v20 = vpop.eup %7586 }
0x2b6c   : > { %v7589_v21 = vpop.eup %7588  ;;  %v5156_v22 = vsel %vm4021_vm10, %v7587_v20, 0.0  ;;  %v5377_v27 = vpop.xlane.xlu0 %5376 }
0x2b6d   : > { %5157 = vadd.xlane.f32.xlu1 %v5156_v22  ;;  %v5044_v23 = vsel %vm4021_vm10, %v7589_v21, 0.0  ;;  %v5378_v28 = vsub.f32 %v5370_v7, %v5377_v27 }
0x2b6e   : > { %5045 = vadd.xlane.f32.xlu0 %v5044_v23 }
0x2b6f   : > { %v5379_v29 = vmul.f32 1.442695, %v5378_v28 }
0x2b71   : > { %7592 = vpow2.f32 %v5379_v29 }
0x2b73   : > { %v7591_v24 = vpop.eup %7590 }
0x2b74   : > { %v5269_v26 = vsel %vm4021_vm10, %v7591_v24, 0.0 }
0x2b75   : > { %5270 = vadd.xlane.f32.xlu0 %v5269_v26 }
0x2b7b   : > { %v7593_v30 = vpop.eup %7592 }
0x2b7c   : > { %v5381_v31 = vsel %vm4021_vm10, %v7593_v30, 0.0 }
0x2b7e   : > { %5275 = vrot.lane.b32.xlu1 %v9607_v39, %s9983_s6  ;;  %s10009_s6 = smov %s10008_s28 }
0x2b8b   : > { %5163 = vrot.lane.b32.xlu0 %v9607_v39, %s9975_s0  ;;  %s10007_s0 = sld [smem:[#allocation99_spill]] }
0x2ba2   : > { %5382 = vadd.xlane.f32.xlu1 %v5381_v31 }
0x2bb3   : > { %5387 = vrot.lane.b32.xlu1 %v9607_v39, %s9974_s3  ;;  %s10004_s3 = sld [smem:[#allocation106_spill]] }
0x2bb9   : > { %v7462_v2 = vld [vmem:[%s10004_s3] sm:$0xff]   ;;  %v7463_v3 = vld [vmem:[%s10004_s3 + $0x8] sm:$0xff]   ;;  %v7464_v5 = vld [vmem:[%s10004_s3 + $0x10] sm:$0xff]  }
0x2bba   : > { %7000 = vmatpush3.bf16.msra.mxu1 %v7462_v2  ;;  %v7465_v9 = vld [vmem:[%s10004_s3 + $0x18] sm:$0xff]  }
0x2bbb   : > { %7001 = vmatprep.subr.bf16.mxu1 %v8426_v0  ;;  %v7485_v2 = vld [vmem:[%s10009_s6 + $0x18] sm:$0xff]  }
0x2bbe   : > { %7002 = vmatpush3.bf16.msra.mxu1 %v7463_v3  ;;  %v7486_v3 = vld [vmem:[%s10009_s6 + $0x60] sm:$0xff]  }
0x2bbf   : > { %7003 = vmatprep.subr.bf16.mxu1 %v8426_v0 }
0x2bc2   : > { %7004 = vmatpush3.bf16.msra.mxu1 %v7464_v5  ;;  %v7490_v5 = vld [vmem:[%s10009_s6 + $0x70] sm:$0xff]  }
0x2bc3   : > { %7005 = vmatprep.subr.bf16.mxu1 %v8426_v0 }
0x2bc6   : > { %7006 = vmatpush3.bf16.msra.mxu1 %v7465_v9 }
0x2bfa   : > { %v5158_v34 = vpop.xlane.xlu1 %5157 }
0x2bfb   : > { %v5046_v32 = vpop.xlane.xlu0 %5045 }
0x2bfc   : > { %7594 = vrcp.f32 %v5046_v32 }
0x2bfd   : > { %7596 = vrcp.f32 %v5158_v34 }
0x2bfe   : > { %v5276_v49 = vpop.permute.xlu1 %5275 }
0x2bff   : > { %v5281_v51 = vsel %vm3692_vm6, %v5276_v49, 0 }
0x2c02   : > { %v5271_v35 = vpop.xlane.xlu0 %5270 }
0x2c03   : > { %7598 = vrcp.f32 %v5271_v35 }
0x2c06   : > { %v7595_v41 = vpop.eup %7594  ;;  %v5164_v42 = vpop.permute.xlu0 %5163 }
0x2c07   : > { %v5048_v33 = vmul.f32 %v7595_v41, %v7589_v21  ;;  %v7597_v45 = vpop.eup %7596  ;;  %v5169_v47 = vsel %vm3692_vm6, %v5164_v42, 0 }
0x2c08   : > { %v5160_v39 = vmul.f32 %v7597_v45, %v7587_v20  ;;  %v6530_v20 = vld [vmem:[#allocation35] ss:$0 sm:$0xff] }
0x2c09   : > { %v5049_v44 = vpack.c.bf16 %v5048_v33, %v5048_v33 }
0x2c0a   : > { %v5161_v61 = vpack.c.bf16 %v5160_v39, %v5160_v39 }
0x2c0b   : > { %6960 = vmatmul.mubr.msk.bf16.vlgmr.msra.gmra.mrb[68].mxu0 %vm4035_vm11, %v5049_v44 }
0x2c0c   : > { %6970 = vmatpush3.bf16.msra.mxu0 %v5169_v47  ;;  %6971 = vmatprep.mubr.msk.bf16.mxu0 %vm8427_vm0, %v8426_v0 }
0x2c0d   : > { %6981 = vmatprep.subr.bf16.mxu0 %v8426_v0  ;;  %v7599_v50 = vpop.eup %7598 }
0x2c0e   : > { %v5273_v36 = vmul.f32 %v7599_v50, %v7591_v24 }
0x2c10   : > { %v5274_v52 = vpack.c.bf16 %v5273_v36, %v5273_v36 }
0x2c13   : > { %6972 = vmatmul.mubr.msk.bf16.vlgmr.msra.gmra.mrb[72].mxu0 %vm4035_vm11, %v5161_v61 }
0x2c14   : > { %6982 = vmatpush3.bf16.msra.mxu0 %v5281_v51  ;;  %6983 = vmatprep.mubr.msk.bf16.mxu0 %vm8427_vm0, %v8426_v0 }
0x2c15   : > { %6993 = vmatprep.subr.bf16.mxu0 %v8426_v0 }
0x2c1b   : > { %6984 = vmatmul.mubr.msk.bf16.vlgmr.msra.gmra.mrb[76].mxu0 %vm4035_vm11, %v5274_v52  ;;  %v6537_v52 = vld [vmem:[%s10007_s0] ss:$0 sm:$0xff]  ;;  %s6571_s0 = sshll.u32 %s8788_s7, 4  ;;  %s8436_s7 = smov [#allocation37]  }
0x2c1c   : > { %6995 = vmatprep.mubr.msk.bf16.mxu0 %vm8427_vm0, %v8426_v0  ;;  %s8230_s5 = sshll.u32 %s8436_s7, 4  ;;  %s8231_s5 = int_to_ptr.vmem [resolvable:$false] %s8230_s5 }
0x2c2f   : > { %v5383_v53 = vpop.xlane.xlu1 %5382 }
0x2c30   : > { %7600 = vrcp.f32 %v5383_v53 }
0x2c33   : > { %v5388_v48 = vpop.permute.xlu1 %5387 }
0x2c34   : > { %v5393_v40 = vsel %vm3692_vm6, %v5388_v48, 0 }
0x2c35   : > { %6994 = vmatpush3.bf16.msra.mxu0 %v5393_v40 }
0x2c3a   : > { %v7601_v55 = vpop.eup %7600 }
0x2c3b   : > { %v5385_v56 = vmul.f32 %v7601_v55, %v7593_v30  ;;  %v7478_v55 = vld [vmem:[%s10008_s28 + $0x40] sm:$0xff]  }
0x2c3c   : > { %6702 = vmatprep.subr.bf16.mxu1 %v7478_v55 }
0x2c3d   : > { %v5386_v59 = vpack.c.bf16 %v5385_v56, %v5385_v56  ;;  %v7479_v56 = vld [vmem:[%s10009_s6] sm:$0xff]  }
0x2c3f   : > { %6996 = vmatmul.mubr.msk.bf16.vlgmr.msra.gmra.mrb[80].mxu0 %vm4035_vm11, %v5386_v59  ;;  %v7480_v59 = vld [vmem:[%s10009_s6 + $0x48] sm:$0xff]  }
0x2c40   : > { %5659 = vmatprep.mubr.bf16.mxu0 %v8435_v14 }
0x2cde   : > { %v5091_v43 = vpop.f32.mrb[68].mxu0 }
0x2cdf   : > { %v6961_v62 = vpop.f32.mrb[69].mxu0 }
0x2ce0   : > { %v5094_v46 = vpop.f32.mrb[70].mxu0  ;;  %v7482_v62 = vld [vmem:[%s10009_s6 + $0x50] sm:$0xff]  }
0x2ce1   : > { %v6962_v1 = vpop.f32.mrb[71].mxu0  ;;  %v7483_v46 = vld [vmem:[%s10009_s6 + $0x10] sm:$0xff]  }
0x2ce2   : > { %v7484_v1 = vld [vmem:[%s10009_s6 + $0x58] sm:$0xff]  }
0x2ce6   : > { %v5205_v37 = vpop.f32.mrb[72].mxu0 }
0x2ce7   : > { %5436 = vrot.lane.b32.xlu1 %v5205_v37, %s9980_s9  ;;  %v6973_v4 = vpop.f32.mrb[73].mxu0  ;;  %s10005_s9 = sld [smem:[#allocation103_spill]]  ;;  %v7487_v37 = vld [vmem:[%s10009_s6 + $0x20] sm:$0xff]  }
0x2ce8   : > { %v5208_v54 = vpop.f32.mrb[74].mxu0  ;;  %v7488_v4 = vld [vmem:[%s10009_s6 + $0x68] sm:$0xff]  }
0x2ce9   : > { %v6974_v6 = vpop.f32.mrb[75].mxu0  ;;  %v7489_v54 = vld [vmem:[%s10009_s6 + $0x28] sm:$0xff]  }
0x2cea   : > { %v7491_v6 = vld [vmem:[%s10009_s6 + $0x30] sm:$0xff]  }
0x2ced   : > { %v7468_v35 = vld [vmem:[%s10005_s9 + $0x4] ss:$8 sps:$4 sm:$0xff]   ;;  %v7471_v41 = vld [vmem:[%s10005_s9 + $0x14] ss:$8 sps:$4 sm:$0xff]   ;;  %v7469_v33 = vld [vmem:[%s10005_s9 + $0x10] ss:$8 sps:$4 sm:$0xff]  }
0x2cee   : > { %v5317_v14 = vpop.f32.mrb[76].mxu0  ;;  %5627 = vmatprep.subr.bf16.mxu0 %v7468_v35  ;;  %v7474_v42 = vld [vmem:[%s10005_s9 + $0x24] ss:$8 sps:$4 sm:$0xff]   ;;  %v7472_v44 = vld [vmem:[%s10005_s9 + $0x20] ss:$8 sps:$4 sm:$0xff]  }
0x2cef   : > { %5440 = vrot.lane.b32.xlu0 %v5317_v14, %s9991_s10  ;;  %v6985_v57 = vpop.f32.mrb[77].mxu0  ;;  %v7477_v45 = vld [vmem:[%s10005_s9 + $0x34] ss:$8 sps:$4 sm:$0xff]   ;;  %v7475_v47 = vld [vmem:[%s10005_s9 + $0x30] ss:$8 sps:$4 sm:$0xff]   ;;  %s10010_s10 = sld [smem:[#allocation101_spill]] }
0x2cf0   : > { %v5320_v7 = vpop.f32.mrb[78].mxu0  ;;  %v7492_v14 = vld [vmem:[%s10009_s6 + $0x78] sm:$0xff]  }
0x2cf1   : > { %v6986_v8 = vpop.f32.mrb[79].mxu0  ;;  %v7493_v57 = vld [vmem:[%s10009_s6 + $0x38] sm:$0xff]  }
0x2cf5   : > { %v5572_v7 = vld [vmem:[%s10010_s10] sm:$0x3] }
0x2cf6   : > { %v5577_v8 = vrot.slane %v5572_v7, %v9442_v25  ;;  %v5581_v9 = vrot.slane %v5572_v7, %v9453_v38 }
0x2d12   : > { %v5429_v10 = vpop.f32.mrb[80].mxu0 }
0x2d13   : > { %5444 = vrot.lane.b32.xlu1 %v5429_v10, %s9977_s8  ;;  %v6997_v11 = vpop.f32.mrb[81].mxu0  ;;  %s10006_s8 = sld [smem:[#allocation100_spill]] }
0x2d14   : > { %v5432_v12 = vpop.f32.mrb[82].mxu0 }
0x2d15   : > { %v6998_v13 = vpop.f32.mrb[83].mxu0 }
0x2d19   : > { %v6536_v51 = vld [vmem:[%s10006_s8] ss:$0 sm:$0xff]  ;;  %s2151_s8 = sand.u32 1, %s8328_s1  }
0x2d1a   : > { %s2152_s28 = scalar_lea.vmem [#allocation37], %s2151_s8  ;;  %s5982_s3 = scalar_lea.sflag [#allocation4], %s2151_s8 }
0x2d1b   : > { %s5994_s10 = sshll.u32 %s2152_s28, 4  ;;  %s9734_s10 = int_to_ptr.vmem [resolvable:$true] %s5994_s10 }
0x2d1c   : > { %s8226_s4 = scalar_lea.vmem %s9734_s10, 16  ;;  %p8233_p0 = scmp.lt.s32.totalorder %s9734_s10, %s8231_s5 }
0x2d1d   : > { %p8227_p8 = scmp.ne.s32.totalorder %s9734_s10, %s8226_s4 }
0x2d1f   : > { %p8228_p13 = pnand %p8227_p8, %p10013_p11 }
0x2d21   : > { %p8229_p1 = pneg %p8228_p13 }
0x2d59   : > { %v5437_v60 = vpop.permute.xlu1 %5436 }
0x2d5a   : > { %v5447_v63 = vsel %vm2177_vm1, %v5091_v43, %v5437_v60  ;;  %v7481_v43 = vld [vmem:[%s10009_s6 + $0x8] sm:$0xff]   ;;  %s8232_s6 = scalar_lea.vmem %s8231_s5, 32 }
0x2d5b   : > { %p8234_p2 = scmp.lt.s32.totalorder %s8232_s6, %s8226_s4 }
0x2d5d   : > { %p8235_p3 = por %p8234_p2, %p8233_p0 }
0x2d5f   : > { %p8236_p4 = pnand %p8235_p3, %p8229_p1 }
0x2d61   : > { %v5441_v15 = vpop.permute.xlu0 %5440 }
0x2d62   : > { %v5448_v16 = vsel %vm2224_vm2, %v5447_v63, %v5441_v15 }
0x2d85   : > { %v5445_v17 = vpop.permute.xlu1 %5444 }
0x2d86   : > { %v5449_v18 = vsel %vm4434_vm12, %v5448_v16, %v5445_v17 }
0x2d87   : > { %v5458_v19 = vpack.c.bf16 %v5449_v18, %v5449_v18 }
0x2d89   : > { %7008 = vmatmul.mubr.msk.bf16.vlgmr.msra.gmra.mrb[72].mxu1 %vm3662_vm3, %v5458_v19 }
0x2d8a   : > { %6703 = vmatpush3.bf16.msra.mxu1 %v7479_v56 }
0x2d8b   : > { %6704 = vmatprep.subr.bf16.mxu1 %v7480_v59 }
0x2d8e   : > { %6705 = vmatpush3.bf16.msra.mxu1 %v7481_v43 }
0x2d8f   : > { %6706 = vmatprep.subr.bf16.mxu1 %v7482_v62  ;;  %v6564_v62 = vld [vmem:[#allocation7] ss:$0 sm:$0xff] }
0x2d92   : > { %6707 = vmatpush3.bf16.msra.mxu1 %v7483_v46 }
0x2d93   : > { %6708 = vmatprep.subr.bf16.mxu1 %v7484_v1  ;;  %v6565_v1 = vld [vmem:[#allocation5] ss:$0 sm:$0xff] }
0x2d96   : > { %6709 = vmatpush3.bf16.msra.mxu1 %v7485_v2 }
0x2d97   : > { %6710 = vmatprep.subr.bf16.mxu1 %v7486_v3 }
0x2d9a   : > { %6711 = vmatpush3.bf16.msra.mxu1 %v7487_v37 }
0x2d9b   : > { %6712 = vmatprep.subr.bf16.mxu1 %v7488_v4 }
0x2d9e   : > { %6713 = vmatpush3.bf16.msra.mxu1 %v7489_v54 }
0x2d9f   : > { %6714 = vmatprep.subr.bf16.mxu1 %v7490_v5 }
0x2da2   : > { %6715 = vmatpush3.bf16.msra.mxu1 %v7491_v6 }
0x2da3   : > { %6716 = vmatprep.subr.bf16.mxu1 %v7492_v14 }
0x2da6   : > { %6717 = vmatpush3.bf16.msra.mxu1 %v7493_v57 }
0x2e5c   : > { %v5527_v21 = vpop.f32.mrb[72].mxu1 }
0x2e5d   : > { %v5528_v22 = vadd.f32 %v6530_v20, %v5527_v21  ;;  %v7009_v23 = vpop.f32.mrb[73].mxu1 }
0x2e5e   : > { %v5530_v24 = vpop.f32.mrb[74].mxu1 }
0x2e5f   : > { %v9677_v26 = vadd.f32 %v5528_v22, %v9573_v58  ;;  %v7010_v27 = vpop.f32.mrb[75].mxu1  ;;  %v7466_v58 = vld [vmem:[%s10005_s9] ss:$8 sps:$4 sm:$0xff]  }
0x2e60   : > { %5628 = vmatpush1.bf16.msra.mxu0 %v7466_v58 }
0x2e61   : > { %v5536_v28 = vsel %vm3834_vm9, %v9677_v26, 0.0  ;;  %5629 = vmatprep.subr.bf16.mxu0 %v7471_v41 }
0x2e62   : > { %5537 = vadd.xlane.f32.xlu0 %v5536_v28 }
0x2e64   : > { %5630 = vmatpush1.bf16.msra.mxu0 %v7469_v33 }
0x2e65   : > { %5631 = vmatprep.subr.bf16.mxu0 %v7474_v42 }
0x2e68   : > { %5632 = vmatpush1.bf16.msra.mxu0 %v7472_v44 }
0x2e69   : > { %5633 = vmatprep.subr.bf16.mxu0 %v7477_v45  ;;  %v6563_v45 = vld [vmem:[%s10011_s12] ss:$0 sm:$0xff]  ;;  %s9732_s12 = scalar_lea.hbm %s8765_s30, %s6571_s0 }
0x2e6c   : > { %5634 = vmatpush1.bf16.msra.mxu0 %v7475_v47 }
0x2e6d   : > { %7011 = vmatprep.subr.bf16.mxu0 %v8426_v0 }
0x2eef   : > { %v5538_v29 = vpop.xlane.xlu0 %5537 }
0x2ef0   : > { %v5539_v30 = vmul.f32 0.015625, %v5538_v29 }
0x2ef2   : > { %v5540_v31 = vsub.f32 %v9677_v26, %v5539_v30 }
0x2ef4   : > { %v5541_v32 = vmul.f32 %v5540_v31, %v5540_v31 }
0x2ef6   : > { %v5542_v34 = vsel %vm3834_vm9, %v5541_v32, 0.0 }
0x2ef7   : > { %5543 = vadd.xlane.f32.xlu1 %v5542_v34 }
0x2f84   : > { %v5544_v39 = vpop.xlane.xlu1 %5543 }
0x2f85   : > { %v5545_v49 = vmul.f32 0.015625, %v5544_v39 }
0x2f87   : > { %v5546_v61 = vadd.f32 1e-05, %v5545_v49 }
0x2f89   : > { %7602 = vrsqrt.f32 %v5546_v61 }
0x2f93   : > { %v7603_v50 = vpop.eup %7602 }
0x2f94   : > { %v5548_v36 = vmul.f32 %v7603_v50, %v5540_v31 }
0x2f96   : > { %v5555_v53 = vmul.f32 %v6536_v51, %v5548_v36 }
0x2f98   : > { %v5562_v48 = vadd.f32 %v6537_v52, %v5555_v53  ;;  %v7494_v53 = vld [vmem:[%s10012_s11] sm:$0xff]  }
0x2f9a   : > { %v5571_v40 = vpack.c.bf16 %v5562_v48, %v5562_v48  ;;  %v7495_v48 = vld [vmem:[%s10012_s11 + $0x8] sm:$0xff]  }
0x2f9c   : > { %6546 = vmatmul.mubr.msk.bf16.vlgmr.msra.gmra.mrb[84].mxu0 %vm3662_vm3, %v5571_v40  ;;  %v7496_v40 = vld [vmem:[%s10012_s11 + $0x10] sm:$0xff]  }
0x2f9d   : > { %7019 = vmatprep.mubr.msk.bf16.mxu0 %vm8427_vm0, %v8426_v0  ;;  %7012 = vmatpush3.bf16.msra.mxu0 %v7494_v53 }
0x2f9e   : > { %7013 = vmatprep.subr.bf16.mxu0 %v8426_v0 }
0x2fa1   : > { %7014 = vmatpush3.bf16.msra.mxu0 %v7495_v48 }
0x2fa2   : > { %7015 = vmatprep.subr.bf16.mxu0 %v8426_v0 }
0x2fa5   : > { %7016 = vmatpush3.bf16.msra.mxu0 %v7496_v40 }
0x2fa6   : > { %7017 = vmatprep.subr.bf16.mxu0 %v8426_v0 }
0x306f   : > { %v5661_v10 = vpop.f32.mrb[84].mxu0 }
0x3070   : > { %v5662_v11 = vadd.f32 %v5661_v10, %v5577_v8  ;;  %v5663_v12 = vpop.f32.mrb[85].mxu0  ;;  %v5912_v8 = vld [vmem:[#allocation2] sm:$0x1] }
0x3071   : > { %v5664_v13 = vadd.f32 %v5663_v12, %v5581_v9  ;;  %v5665_v60 = vpop.f32.mrb[86].mxu0 }
0x3072   : > { %v5668_v15 = vmul.f32 %v5662_v11, %v5662_v11  ;;  %v5666_v63 = vpop.f32.mrb[87].mxu0 }
0x3073   : > { %v5669_v16 = vmul.f32 %v5664_v13, %v5664_v13 }
0x3074   : > { %v5670_v17 = vmul.f32 %v5668_v15, %v5662_v11 }
0x3075   : > { %v5671_v18 = vmul.f32 %v5669_v16, %v5664_v13 }
0x3076   : > { %v5672_v19 = vmul.f32 0.044715, %v5670_v17 }
0x3077   : > { %v5673_v20 = vmul.f32 0.044715, %v5671_v18 }
0x3078   : > { %v5674_v21 = vadd.f32 %v5672_v19, %v5662_v11 }
0x3079   : > { %v5675_v22 = vadd.f32 %v5673_v20, %v5664_v13 }
0x307a   : > { %v5676_v23 = vmul.f32 0.7978846, %v5674_v21 }
0x307b   : > { %v5677_v24 = vmul.f32 0.7978846, %v5675_v22 }
0x307c   : > { %7604 = vtanh.f32 %v5676_v23 }
0x307d   : > { %7606 = vtanh.f32 %v5677_v24 }
0x3086   : > { %v7605_v25 = vpop.eup %7604 }
0x3087   : > { %v7607_v38 = vpop.eup %7606  ;;  %v5680_v27 = vadd.f32 1.0, %v7605_v25 }
0x3088   : > { %v5681_v28 = vadd.f32 1.0, %v7607_v38 }
0x3089   : > { %v5682_v29 = vmul.f32 0.5, %v5680_v27 }
0x308a   : > { %v5683_v30 = vmul.f32 0.5, %v5681_v28 }
0x308b   : > { %v5684_v31 = vmul.f32 %v5682_v29, %v5662_v11 }
0x308c   : > { %v5685_v32 = vmul.f32 %v5683_v30, %v5664_v13 }
0x308d   : > { %v5718_v35 = vpack.c.bf16 %v5684_v31, %v5684_v31 }
0x308e   : > { %v5719_v34 = vpack.c.bf16 %v5685_v32, %v5685_v32 }
0x3090   : > { %5848 = vmatprep.mubr.bf16.mxu1 %v5719_v34 }
0x3091   : > { %5849 = vmatmul.mubr.bf16.vlgmr.msra.gmra.mrb[76].mxu1 %v5718_v35 }
0x3164   : > { %v6718_v58 = vpop.f32.mrb[76].mxu1 }
0x3165   : > { %v6719_v41 = vpop.f32.mrb[77].mxu1 }
0x3166   : > { %v6720_v33 = vadd.f32 %v6719_v41, %v6718_v58  ;;  %v6721_v42 = vpop.f32.mrb[78].mxu1 }
0x3167   : > { %v6722_v44 = vpop.f32.mrb[79].mxu1 }
0x3168   : > { %v5856_v47 = vadd.f32 %v6720_v33, %v9677_v26  ;;  %v7497_v26 = vld [vmem:[%s10012_s11 + $0x18] sm:$0xff]  }
0x3169   : > { %7018 = vmatpush3.bf16.msra.mxu0 %v7497_v26 }
0x316a   : > { %v5864_v39 = vadd.f32 %v6563_v45, %v5856_v47 }
0x316c   : > { %v5867_v49 = vsel %vm3834_vm9, %v5864_v39, 0.0 }
0x316d   : > { %5868 = vadd.xlane.f32.xlu0 %v5867_v49 }
0x31fa   : > { %v5869_v61 = vpop.xlane.xlu0 %5868 }
0x31fb   : > { %v5870_v50 = vmul.f32 0.015625, %v5869_v61 }
0x31fd   : > { %v5871_v51 = vsub.f32 %v5864_v39, %v5870_v50 }
0x31ff   : > { %v5872_v36 = vmul.f32 %v5871_v51, %v5871_v51 }
0x3201   : > { %v5873_v52 = vsel %vm3834_vm9, %v5872_v36, 0.0 }
0x3202   : > { %5874 = vadd.xlane.f32.xlu0 %v5873_v52 }
0x328f   : > { %v5875_v55 = vpop.xlane.xlu0 %5874 }
0x3290   : > { %v5876_v56 = vmul.f32 0.015625, %v5875_v55 }
0x3292   : > { %v5877_v59 = vadd.f32 1e-05, %v5876_v56 }
0x3294   : > { %7608 = vrsqrt.f32 %v5877_v59 }
0x329e   : > { %v7609_v43 = vpop.eup %7608 }
0x329f   : > { %v5879_v46 = vmul.f32 %v7609_v43, %v5871_v51 }
0x32a1   : > { %v5886_v2 = vmul.f32 %v6564_v62, %v5879_v46 }
0x32a3   : > { %v5893_v3 = vadd.f32 %v6565_v1, %v5886_v2 }
0x32a5   : > { %v5894_v37 = vsel %vm3834_vm9, %v5893_v3, 0.0 }
0x32a6   : > { %v5895_v4 = vrot.slane %v5894_v37, 4 }
0x32a8   : > { %v5896_v54 = vadd.f32 %v5895_v4, %v5894_v37 }
0x32aa   : > { %v5897_v5 = vrot.slane %v5896_v54, 2 }
0x32ac   : > { %v5898_v0 = vadd.f32 %v5897_v5, %v5896_v54 }
0x32ae   : > { %v5899_v6 = vrot.slane %v5898_v0, 1 }
0x32b0   : > { %v5900_v14 = vadd.f32 %v5899_v6, %v5898_v0 }
0x32b2   : > { %v5902_v57 = vmul.f32 0.25, %v5900_v14 }
0x32b4   : > { %v5911_v7 = vpack.c.bf16 %v5902_v57, %v5902_v57 }
0x32b6   : > { %7020 = vmatmul.mubr.msk.bf16.vlgmr.msra.gmra.mrb[88].mxu0 %vm3662_vm3, %v5911_v7 }
0x3389   : > { %v5974_v9 = vpop.f32.mrb[88].mxu0 }
0x338a   : > { %v5975_v10 = vadd.f32 %v5974_v9, %v5912_v8  ;;  %v7021_v11 = vpop.f32.mrb[89].mxu0 }
0x338b   : > { %v5977_v12 = vpop.f32.mrb[90].mxu0 }
0x338c   : > { %5980 = vst [vmem:[%s2152_s28] sm:$0x1] %v5975_v10  ;;  %v7022_v13 = vpop.f32.mrb[91].mxu0 }
0x338d   : > { %8239 = shalt.err (!%p8236_p4)
}
0x338e   : > { %s8240_s8 = scalar_lea.hbm %s9732_s12, 16  ;;  %s8244_s0 = scalar_lea.hbm %s8765_s30, 32 }
0x338f   : > { %p8241_p12 = scmp.ne.s32.totalorder %s9732_s12, %s8240_s8  ;;  %p8245_p9 = scmp.lt.u32.totalorder %s9732_s12, %s8765_s30 }
0x3390   : > { %p8246_p10 = scmp.lt.u32.totalorder %s8244_s0, %s8240_s8  ;;  %p8248_p8 = scmp.lt.u32.totalorder %s8240_s8, %s9732_s12 }
0x3391   : > { %p8242_p5 = pnand %p8241_p12, %p10013_p11 }
0x3392   : > { %p8247_p7 = por %p8246_p10, %p8245_p9 }
0x3393   : > { %p8243_p6 = pneg %p8242_p5 }
0x3394   : > { %p8249_p13 = por %p8248_p8, %p8247_p7 }
0x3396   : > { %p8250_p1 = pnand %p8249_p13, %p8243_p6 }
0x3398   : > { %8253 = shalt.err (!%p8250_p1)
}
0x3399   : > { %7111 = dma.vmem_to_hbm [thread:$0]  (%p10013_p11), %s9734_s10, 16, %s9732_s12, %s5982_s3  }
0x339a PF: > { %s10014_s5 = sld [smem:[#allocation108_spill]]  ;;  %s10015_s4 = sld [smem:[#allocation112_spill]] }
0x339b   : > { %p7228_p0 = scmp.ge.s32.totalorder %s8336_s2, 2 }
0x33a0   : > { %s6006_s6 = sand.u32 1, %s10014_s5   ;;  %p10016_p2 = scmp.ne.s32.totalorder %s10015_s4, 0 }
0x33a1   : > { %s6007_s28 = scalar_lea.sflag [#allocation4], %s6006_s6 }
0x33a2   : > { %p7181_p3 = pnand %p7228_p0, %p10016_p2 }
0x33a4   : > { %8319 = dma.done.wait (!%p7181_p3), %s6007_s28, 16  }
0x33a5   : > { %8321 = vsyncadd (!%p7181_p3), %s6007_s28, 4294967280  ;;  %s10017_s2 = sld [smem:[#allocation110_spill]]  ;;  %s10018_s7 = sld [smem:[#allocation109_spill]] }
0x33a6   : > { %s10019_s0 = sld [smem:[#allocation111_spill]]  ;;  %s10020_s28 = smov %s8328_s1 }
0x33ab   : > { %p151_p4 = scmp.ge.s32.totalorder %s10017_s2, 4   ;;  %s10021_s1 = smov %s10018_s7 }
0x33ad   :  { %153 = sbr.rel (!%p151_p4) target bundleno = 145 (0x91), region = 472 }
0x33b4   :  { %6011 = vsyncpa [#allocation3], 1 }
0x33b5   :  { %6013 = vsyncpa [#allocation3 + $0x1], 1 }
0x33b6   :  { %6014 = vsyncpa [#allocation6], 1 }
0x33b7   :  { %6015 = vsyncpa [#allocation9], 1 }
0x33b8   :  { %6016 = vsyncpa [#allocation12], 1 }
0x33b9   :  { %6017 = vsyncpa [#allocation15], 1 }
0x33ba   :  { %6018 = vsyncpa [#allocation18], 1 }
0x33bb   :  { %6019 = vsyncpa [#allocation21], 1 }
0x33bc   :  { %6020 = vsyncpa [#allocation24], 1 }
0x33bd   :  { %6021 = vsyncpa [#allocation27], 1 }
0x33be   :  { %6022 = vsyncpa [#allocation30], 1 }
0x33bf   :  { %6023 = vsyncpa [#allocation33], 1 }
0x33c0   :  { %6024 = vsyncpa [#allocation36], 1 }
0x33c1   :  { %6025 = vsyncpa [#allocation4], 1 }
0x33c2   :  { %6027 = vsyncpa [#allocation4 + $0x1], 1 }

</bundles_post_ra>
